<compile_context>
chip_gen: v5e
topology: v5e:2x2
jax: 0.10.0
libtpu: 0.0.40
codegen_flags: <defaults>
</compile_context>

<pallas_src>
import jax
import jax.numpy as jnp
from jax.experimental import pallas as pl
from jax.experimental.pallas import tpu as pltpu


def three_stream_core_2stream_decode(xt_seq, video, event, clip, clip_mask,
                                     state, params, *, tt_max=8):
    """Runs T decode steps of ThreeStream_Core_2stream in one pallas_call.

    xt_seq:    [T, B, E_IN]   per-step word embeddings
    video:     unused by the PyTorch forward (kept for interface parity)
    event:     [B, EV]        step-invariant event context
    clip:      [B, S, C]      step-invariant clip features
    clip_mask: [B, S]
    state:     (h [2,B,R], c [2,B,R])
    returns:   (outputs [T, B, 2R], (h [2,B,R], c [2,B,R]))
    """
    del video  # expanded-but-never-used in the PyTorch forward
    h_in, c_in = state
    T, B, E_IN = xt_seq.shape
    R = h_in.shape[-1]
    S = clip.shape[1]
    C = clip.shape[2]
    H = params['h2att_w'].shape[1]
    f32 = jnp.float32

    # ---- weight/bias re-layout (step-invariant, hoisted to the wrapper) ----
    def ig(a, b):
        # interleave stream-0 / stream-1 gate columns -> [..., 8R] in order
        # [i0 i1 f0 f1 g0 g1 o0 o1]  (PyTorch LSTMCell gate order is i,f,g,o)
        parts = []
        for k in range(4):
            parts.append(a[..., k * R:(k + 1) * R])
            parts.append(b[..., k * R:(k + 1) * R])
        return jnp.concatenate(parts, axis=-1)

    w_ih0 = params['w_ih0']                      # [E_IN + EV, 4R]
    w_ih1 = params['w_ih1']                      # [E_IN + C , 4R]
    W0x, W0e = w_ih0[:E_IN], w_ih0[E_IN:]
    W1x, W1a = w_ih1[:E_IN], w_ih1[E_IN:]

    Wx = ig(W0x, W1x)                                          # [E_IN, 8R]
    z4 = jnp.zeros((R, 4 * R), f32)
    W_rec = jnp.concatenate([                                  # [2R, 8R + H]
        jnp.concatenate([ig(params['w_hh0'], z4), jnp.zeros((R, H), f32)], 1),
        jnp.concatenate([ig(z4, params['w_hh1']), params['h2att_w']], 1),
    ], axis=0)
    W_att = ig(jnp.zeros((C, 4 * R), f32), W1a)                # [C, 8R]

    b0_eff = params['b0'] + event @ W0e                        # [B, 4R]
    b1_b = jnp.broadcast_to(params['b1'], (B, 4 * R))
    b_eff = ig(b0_eff, b1_b)                                   # [B, 8R]

    # xt projection hoisted over all T: one big matmul, biases folded in.
    gx_seq = (xt_seq.reshape(T * B, E_IN) @ Wx).reshape(T, B, 8 * R) \
        + b_eff[None]

    # attention clip projection hoisted; h2att bias folded in too.
    attp = (jnp.einsum('bsc,ch->bsh', clip, params['ctx2att_w'])
            + params['ctx2att_b'] + params['h2att_b'])         # [B, S, H]

    # recurrent state packed lane-wise: [B, 2R] = [h0 | h1]
    h_flat = jnp.concatenate([h_in[0], h_in[1]], axis=1)
    c_flat = jnp.concatenate([c_in[0], c_in[1]], axis=1)

    # ---- pad batch to a multiple of 8 sublanes, time to a multiple of Tt ----
    Bp = max(8, -(-B // 8) * 8)
    pb = Bp - B
    Tt = min(T, tt_max)
    NTB = -(-T // Tt)
    Tp = NTB * Tt
    pt = Tp - T
    needs_guard = (Tp != T)

    def padb(x, axis):
        if pb == 0:
            return x
        w = [(0, 0)] * x.ndim
        w[axis] = (0, pb)
        return jnp.pad(x, w)

    gx_p = padb(gx_seq, 1)
    if pt:
        gx_p = jnp.pad(gx_p, ((0, pt), (0, 0), (0, 0)))
    attp_p = padb(attp, 0)
    clip_p = padb(clip, 0)
    mask_p = clip_mask.astype(f32)
    if pb:
        # padded rows get an all-ones mask so renormalization never hits 0/0
        mask_p = jnp.concatenate([mask_p, jnp.ones((pb, S), f32)], 0)
    h_p = padb(h_flat, 0)
    c_p = padb(c_flat, 0)

    # ---------------------------- kernel ----------------------------
    def kernel(gx_ref, h0_ref, c0_ref, wrec_ref, watt_ref, attp_ref, clip_ref,
               mask_ref, aw_ref, ab_ref, out_ref, hN_ref, cN_ref, h_s, c_s):
        tb = pl.program_id(0)

        @pl.when(tb == 0)
        def _():
            h_s[...] = h0_ref[...]
            c_s[...] = c0_ref[...]

        wrec = wrec_ref[...]                 # [2R, 8R+H]
        watt = watt_ref[...]                 # [C, 8R]
        attp_v = attp_ref[...]               # [Bp, S, H]
        clip_v = clip_ref[...]               # [Bp, S, C]
        mask_v = mask_ref[...]               # [Bp, S]
        aw = aw_ref[0]                       # [H]
        ab = ab_ref[0, 0]

        h_prev = h_s[...]                    # [Bp, 2R] = [h0 | h1]
        c_prev = c_s[...]

        # statically unrolled inner time loop (Tt <= tt_max): the scheduler
        # sees every step — same effect as lax.fori_loop(..., unroll=True).
        for i in range(Tt):
            # ONE merged recurrent matmul: [h0|h1] @ [[whh0,0,0],[0,whh1,h2att]]
            rec = jnp.dot(h_prev, wrec, preferred_element_type=jnp.float32)
            att_h = rec[:, 8 * R:]                                   # [Bp, H]

            # additive attention driven by pre_h1 (= h1 part of h_prev)
            dott = jnp.tanh(attp_v + att_h[:, None, :])              # [Bp,S,H]
            score = jnp.sum(dott * aw[None, None, :], axis=-1) + ab  # [Bp, S]
            # softmax + mask: the initial normalization cancels exactly with
            # the post-mask renormalization, so it is dropped.
            score = score - jnp.max(score, axis=-1, keepdims=True)
            w = jnp.exp(score) * mask_v
            w = w / jnp.sum(w, axis=-1, keepdims=True)
            att_res = jnp.sum(w[:, :, None] * clip_v, axis=1)        # [Bp, C]

            # both streams' gates in one [Bp, 8R] slab
            # (gate columns interleaved [i0 i1 f0 f1 g0 g1 o0 o1])
            gates = (gx_ref[i] + rec[:, :8 * R]
                     + jnp.dot(att_res, watt,
                               preferred_element_type=jnp.float32))
            # full-vreg sigmoid+tanh (EUP slack at 8R=256); see review note for
            # the per-slice variant once R grows.
            sg = jax.nn.sigmoid(gates)
            tg = jnp.tanh(gates)
            c_new = sg[:, 2 * R:4 * R] * c_prev \
                + sg[:, 0:2 * R] * tg[:, 4 * R:6 * R]
            h_new = sg[:, 6 * R:8 * R] * jnp.tanh(c_new)             # [Bp, 2R]

            # output block stays VMEM-resident; one contiguous store per step,
            # single HBM writeback per Tt block. (dropout0/1: identity.)
            out_ref[i] = h_new

            if needs_guard:   # only compiled when T is padded to Tp
                keep = (tb * Tt + i) < T
                h_new = jnp.where(keep, h_new, h_prev)
                c_new = jnp.where(keep, c_new, c_prev)
            h_prev, c_prev = h_new, c_new

        h_s[...] = h_prev
        c_s[...] = c_prev

        @pl.when(tb == pl.num_programs(0) - 1)
        def _():
            hN_ref[...] = h_prev
            cN_ref[...] = c_prev

    # ---------------------------- specs ----------------------------
    def cspec(x):
        nd = x.ndim
        return pl.BlockSpec(x.shape, lambda tb, _nd=nd: (0,) * _nd)

    invariants = (h_p, c_p, W_rec, W_att, attp_p, clip_p, mask_p,
                  params['alpha_w'], params['alpha_b'])
    in_specs = ([pl.BlockSpec((Tt, Bp, 8 * R), lambda tb: (tb, 0, 0))]
                + [cspec(a) for a in invariants])
    out_specs = (pl.BlockSpec((Tt, Bp, 2 * R), lambda tb: (tb, 0, 0)),
                 cspec(h_p), cspec(c_p))
    out_shape = (jax.ShapeDtypeStruct((Tp, Bp, 2 * R), f32),
                 jax.ShapeDtypeStruct((Bp, 2 * R), f32),
                 jax.ShapeDtypeStruct((Bp, 2 * R), f32))

    out_seq, h_out, c_out = pl.pallas_call(
        kernel,
        grid=(NTB,),
        in_specs=in_specs,
        out_specs=out_specs,
        out_shape=out_shape,
        scratch_shapes=[pltpu.VMEM((Bp, 2 * R), f32),
                        pltpu.VMEM((Bp, 2 * R), f32)],
        compiler_params=pltpu.CompilerParams(
            dimension_semantics=("arbitrary",),
            vmem_limit_bytes=32 * 1024 * 1024),
    )(gx_p, *invariants)

    out = out_seq[:T, :B]
    h_new = jnp.stack([h_out[:B, :R], h_out[:B, R:2 * R]])
    c_new = jnp.stack([c_out[:B, :R], c_out[:B, R:2 * R]])
    return out, (h_new, c_new)


def reference(xt_seq, video, event, clip, clip_mask, state, p):
    """Pure-JAX re-implementation of the PyTorch forward, looped over T."""
    del video

    def lstm(x, h, c, w_ih, w_hh, b):
        gates = x @ w_ih + h @ w_hh + b
        i, f, g, o = jnp.split(gates, 4, axis=1)
        cn = jax.nn.sigmoid(f) * c + jax.nn.sigmoid(i) * jnp.tanh(g)
        return jax.nn.sigmoid(o) * jnp.tanh(cn), cn

    h_s, c_s = state
    outs = []
    for t in range(xt_seq.shape[0]):
        xt = xt_seq[t]
        pre_h1 = h_s[1]
        x0 = jnp.concatenate([xt, event], 1)
        h0, c0 = lstm(x0, h_s[0], c_s[0], p['w_ih0'], p['w_hh0'], p['b0'])
        att = jnp.einsum('bsc,ch->bsh', clip, p['ctx2att_w']) + p['ctx2att_b']
        att_h = pre_h1 @ p['h2att_w'] + p['h2att_b']
        dot = jnp.tanh(att + att_h[:, None, :])
        score = jnp.sum(dot * p['alpha_w'][0][None, None, :], -1) \
            + p['alpha_b'][0, 0]
        w = jax.nn.softmax(score, axis=-1)
        w = w * clip_mask
        w = w / jnp.sum(w, -1, keepdims=True)
        att_res = jnp.einsum('bs,bsc->bc', w, clip)
        x1 = jnp.concatenate([xt, att_res], 1)
        h1, c1 = lstm(x1, h_s[1], c_s[1], p['w_ih1'], p['w_hh1'], p['b1'])
        outs.append(jnp.concatenate([h0, h1], 1))
        h_s = jnp.stack([h0, h1])
        c_s = jnp.stack([c0, c1])
    return jnp.stack(outs), (h_s, c_s)


if __name__ == "__main__":
    T, B, S = 6, 4, 8
    R = 32        # CG_rnn_size
    E_IN = 32     # CG_input_encoding_size
    V_DIM = 16    # video_context_dim (unused by forward)
    EV_DIM = 16   # event_context_dim
    C_DIM = 32    # clip_context_dim (att_feat_size)
    H_ATT = 32    # CG_att_hid_size

    key = jax.random.PRNGKey(0)
    ks = jax.random.split(key, 24)

    def rnd(k, shape, scale=0.1):
        return scale * jax.random.normal(k, shape, jnp.float32)

    params = {
        'w_ih0': rnd(ks[0], (E_IN + EV_DIM, 4 * R)),
        'w_hh0': rnd(ks[1], (R, 4 * R)),
        'b0':    rnd(ks[2], (1, 4 * R)),
        'w_ih1': rnd(ks[3], (E_IN + C_DIM, 4 * R)),
        'w_hh1': rnd(ks[4], (R, 4 * R)),
        'b1':    rnd(ks[5], (1, 4 * R)),
        'ctx2att_w': rnd(ks[6], (C_DIM, H_ATT)),
        'ctx2att_b': rnd(ks[7], (1, H_ATT)),
        'h2att_w':   rnd(ks[8], (R, H_ATT)),
        'h2att_b':   rnd(ks[9], (1, H_ATT)),
        'alpha_w':   rnd(ks[10], (1, H_ATT)),
        'alpha_b':   rnd(ks[11], (1, 1)),
    }

    xt_seq = rnd(ks[12], (T, B, E_IN), 1.0)
    video = rnd(ks[13], (1, V_DIM), 1.0)
    event = rnd(ks[14], (B, EV_DIM), 1.0)
    clip = rnd(ks[15], (B, S, C_DIM), 1.0)
    lengths = jnp.array([8, 6, 4, 3])
    clip_mask = (jnp.arange(S)[None, :] < lengths[:, None]).astype(jnp.float32)
    h_state = rnd(ks[16], (2, B, R), 1.0)
    c_state = rnd(ks[17], (2, B, R), 1.0)
    state = (h_state, c_state)

    out, (h_new, c_new) = three_stream_core_2stream_decode(
        xt_seq, video, event, clip, clip_mask, state, params)
    jax.block_until_ready((out, h_new, c_new))

    out_r, (h_r, c_r) = reference(xt_seq, video, event, clip, clip_mask,
                                  state, params)
    err = max(float(jnp.max(jnp.abs(out - out_r))),
              float(jnp.max(jnp.abs(h_new - h_r))),
              float(jnp.max(jnp.abs(c_new - c_r))))
    assert err < 1e-3, f"max abs error {err}"
    print("KERNEL_OK")
</pallas_src>

<mosaic_0001>
module attributes {stable_mosaic.version = 11 : i64} {
  func.func @kernel(%arg0: i32, %arg1: memref<6x8x256xf32, #tpu.memory_space<vmem>>, %arg2: memref<8x64xf32, #tpu.memory_space<vmem>>, %arg3: memref<8x64xf32, #tpu.memory_space<vmem>>, %arg4: memref<64x288xf32, #tpu.memory_space<vmem>>, %arg5: memref<32x256xf32, #tpu.memory_space<vmem>>, %arg6: memref<8x8x32xf32, #tpu.memory_space<vmem>>, %arg7: memref<8x8x32xf32, #tpu.memory_space<vmem>>, %arg8: memref<8x8xf32, #tpu.memory_space<vmem>>, %arg9: memref<1x32xf32, #tpu.memory_space<vmem>>, %arg10: memref<1x1xf32, #tpu.memory_space<vmem>>, %arg11: memref<6x8x64xf32, #tpu.memory_space<vmem>>, %arg12: memref<8x64xf32, #tpu.memory_space<vmem>>, %arg13: memref<8x64xf32, #tpu.memory_space<vmem>>, %arg14: memref<8x64xf32, #tpu.memory_space<vmem>>, %arg15: memref<8x64xf32, #tpu.memory_space<vmem>>) attributes {dimension_semantics = [#tpu.dimension_semantics<arbitrary>], iteration_bounds = array<i64: 1>, scalar_prefetch = 0 : i64, scratch_operands = 2 : i64, tpu.core_type = #tpu.core_type<tc>, window_params = [{transform_indices = @transform_0, window_bounds = array<i64: 6, 8, 256>}, {pipeline_mode = #tpu.pipeline_mode<synchronous>, transform_indices = @transform_1, window_bounds = array<i64: 8, 64>}, {pipeline_mode = #tpu.pipeline_mode<synchronous>, transform_indices = @transform_2, window_bounds = array<i64: 8, 64>}, {pipeline_mode = #tpu.pipeline_mode<synchronous>, transform_indices = @transform_3, window_bounds = array<i64: 64, 288>}, {pipeline_mode = #tpu.pipeline_mode<synchronous>, transform_indices = @transform_4, window_bounds = array<i64: 32, 256>}, {pipeline_mode = #tpu.pipeline_mode<synchronous>, transform_indices = @transform_5, window_bounds = array<i64: 8, 8, 32>}, {pipeline_mode = #tpu.pipeline_mode<synchronous>, transform_indices = @transform_6, window_bounds = array<i64: 8, 8, 32>}, {pipeline_mode = #tpu.pipeline_mode<synchronous>, transform_indices = @transform_7, window_bounds = array<i64: 8, 8>}, {pipeline_mode = #tpu.pipeline_mode<synchronous>, transform_indices = @transform_8, window_bounds = array<i64: 1, 32>}, {pipeline_mode = #tpu.pipeline_mode<synchronous>, transform_indices = @transform_9, window_bounds = array<i64: 1, 1>}, {transform_indices = @transform_10, window_bounds = array<i64: 6, 8, 64>}, {pipeline_mode = #tpu.pipeline_mode<synchronous>, transform_indices = @transform_11, window_bounds = array<i64: 8, 64>}, {pipeline_mode = #tpu.pipeline_mode<synchronous>, transform_indices = @transform_12, window_bounds = array<i64: 8, 64>}]} {
    %c0_i32 = arith.constant 0 : i32
    %0 = arith.cmpi eq, %arg0, %c0_i32 : i32
    %1 = arith.extui %0 : i1 to i32
    %c0_i32_0 = arith.constant 0 : i32
    %2 = arith.cmpi ne, %1, %c0_i32_0 : i32
    scf.if %2 {
      %c0_98 = arith.constant 0 : index
      %c0_99 = arith.constant 0 : index
      %319 = vector.load %arg2[%c0_98, %c0_99] : memref<8x64xf32, #tpu.memory_space<vmem>>, vector<8x64xf32>
      %c0_100 = arith.constant 0 : index
      %c0_101 = arith.constant 0 : index
      %320 = vector.load %arg14[%c0_100, %c0_101] : memref<8x64xf32, #tpu.memory_space<vmem>>, vector<8x64xf32>
      tpu.vector_store %arg14[%c0_100, %c0_101], %319 {strides = array<i32>} : memref<8x64xf32, #tpu.memory_space<vmem>>, vector<8x64xf32>,
      %c0_102 = arith.constant 0 : index
      %c0_103 = arith.constant 0 : index
      %321 = vector.load %arg3[%c0_102, %c0_103] : memref<8x64xf32, #tpu.memory_space<vmem>>, vector<8x64xf32>
      %c0_104 = arith.constant 0 : index
      %c0_105 = arith.constant 0 : index
      %322 = vector.load %arg15[%c0_104, %c0_105] : memref<8x64xf32, #tpu.memory_space<vmem>>, vector<8x64xf32>
      tpu.vector_store %arg15[%c0_104, %c0_105], %321 {strides = array<i32>} : memref<8x64xf32, #tpu.memory_space<vmem>>, vector<8x64xf32>,
    } else {
    }
    %c0 = arith.constant 0 : index
    %c0_1 = arith.constant 0 : index
    %3 = vector.load %arg4[%c0, %c0_1] : memref<64x288xf32, #tpu.memory_space<vmem>>, vector<64x288xf32>
    %c0_2 = arith.constant 0 : index
    %c0_3 = arith.constant 0 : index
    %4 = vector.load %arg5[%c0_2, %c0_3] : memref<32x256xf32, #tpu.memory_space<vmem>>, vector<32x256xf32>
    %c0_4 = arith.constant 0 : index
    %c0_5 = arith.constant 0 : index
    %c0_6 = arith.constant 0 : index
    %5 = vector.load %arg6[%c0_4, %c0_5, %c0_6] : memref<8x8x32xf32, #tpu.memory_space<vmem>>, vector<8x8x32xf32>
    %c0_7 = arith.constant 0 : index
    %c0_8 = arith.constant 0 : index
    %c0_9 = arith.constant 0 : index
    %6 = vector.load %arg7[%c0_7, %c0_8, %c0_9] : memref<8x8x32xf32, #tpu.memory_space<vmem>>, vector<8x8x32xf32>
    %c0_10 = arith.constant 0 : index
    %c0_11 = arith.constant 0 : index
    %7 = vector.load %arg8[%c0_10, %c0_11] : memref<8x8xf32, #tpu.memory_space<vmem>>, vector<8x8xf32>
    %c0_12 = arith.constant 0 : index
    %c0_13 = arith.constant 0 : index
    %8 = vector.load %arg9[%c0_12, %c0_13] : memref<1x32xf32, #tpu.memory_space<vmem>>, vector<1x32xf32>
    %9 = vector.shape_cast %8 : vector<1x32xf32> to vector<32xf32>
    %c0_14 = arith.constant 0 : index
    %c0_15 = arith.constant 0 : index
    %10 = vector.load %arg10[%c0_14, %c0_15] : memref<1x1xf32, #tpu.memory_space<vmem>>, vector<1x1xf32>
    %11 = vector.extract %10[0, 0] : f32 from vector<1x1xf32>
    %c0_16 = arith.constant 0 : index
    %c0_17 = arith.constant 0 : index
    %12 = vector.load %arg14[%c0_16, %c0_17] : memref<8x64xf32, #tpu.memory_space<vmem>>, vector<8x64xf32>
    %c0_18 = arith.constant 0 : index
    %c0_19 = arith.constant 0 : index
    %13 = vector.load %arg15[%c0_18, %c0_19] : memref<8x64xf32, #tpu.memory_space<vmem>>, vector<8x64xf32>
    %cst = arith.constant dense<0.000000e+00> : vector<8x288xf32>
    %14 = tpu.matmul %12, %3, %cst {dimension_numbers = #tpu.dot_dimension_numbers<[1], [0], [0], [1], [0, 0, 1, 1], [], []>} : vector<8x64xf32>, vector<64x288xf32>, vector<8x288xf32> -> vector<8x288xf32>
    %15 = vector.extract_strided_slice %14 {offsets = [0, 256], sizes = [8, 32], strides = [1, 1]} : vector<8x288xf32> to vector<8x32xf32>
    %16 = vector.shape_cast %15 : vector<8x32xf32> to vector<8x1x32xf32>
    %17 = vector.broadcast %16 : vector<8x1x32xf32> to vector<8x8x32xf32>
    %18 = arith.addf %5, %17 : vector<8x8x32xf32>
    %19 = math.tanh %18 : vector<8x8x32xf32>
    %20 = vector.shape_cast %9 : vector<32xf32> to vector<1x1x32xf32>
    %21 = vector.broadcast %20 : vector<1x1x32xf32> to vector<8x8x32xf32>
    %22 = arith.mulf %19, %21 : vector<8x8x32xf32>
    %cst_20 = arith.constant dense<0.000000e+00> : vector<8x8xf32>
    %23 = vector.multi_reduction <add>, %22, %cst_20 [2] : vector<8x8x32xf32> to vector<8x8xf32>
    %24 = vector.broadcast %11 : f32 to vector<8x8xf32>
    %25 = arith.addf %23, %24 : vector<8x8xf32>
    %cst_21 = arith.constant dense<0xFF800000> : vector<8xf32>
    %26 = vector.multi_reduction <maximumf>, %25, %cst_21 [1] : vector<8x8xf32> to vector<8xf32>
    %27 = vector.shape_cast %26 : vector<8xf32> to vector<8x1xf32>
    %28 = vector.broadcast %27 : vector<8x1xf32> to vector<8x8xf32>
    %29 = arith.subf %25, %28 : vector<8x8xf32>
    %30 = math.exp %29 : vector<8x8xf32>
    %31 = arith.mulf %30, %7 : vector<8x8xf32>
    %cst_22 = arith.constant dense<0.000000e+00> : vector<8xf32>
    %32 = vector.multi_reduction <add>, %31, %cst_22 [1] : vector<8x8xf32> to vector<8xf32>
    %33 = vector.shape_cast %32 : vector<8xf32> to vector<8x1xf32>
    %34 = vector.broadcast %33 : vector<8x1xf32> to vector<8x8xf32>
    %35 = arith.divf %31, %34 : vector<8x8xf32>
    %36 = vector.shape_cast %35 : vector<8x8xf32> to vector<8x8x1xf32>
    %37 = vector.broadcast %36 : vector<8x8x1xf32> to vector<8x8x32xf32>
    %38 = arith.mulf %37, %6 : vector<8x8x32xf32>
    %cst_23 = arith.constant dense<0.000000e+00> : vector<8x32xf32>
    %39 = vector.multi_reduction <add>, %38, %cst_23 [1] : vector<8x8x32xf32> to vector<8x32xf32>
    %c0_24 = arith.constant 0 : index
    %c0_25 = arith.constant 0 : index
    %c0_26 = arith.constant 0 : index
    %40 = vector.load %arg1[%c0_24, %c0_25, %c0_26] : memref<6x8x256xf32, #tpu.memory_space<vmem>>, vector<1x8x256xf32>
    %41 = vector.shape_cast %40 : vector<1x8x256xf32> to vector<8x256xf32>
    %42 = vector.extract_strided_slice %14 {offsets = [0, 0], sizes = [8, 256], strides = [1, 1]} : vector<8x288xf32> to vector<8x256xf32>
    %43 = arith.addf %41, %42 : vector<8x256xf32>
    %cst_27 = arith.constant dense<0.000000e+00> : vector<8x256xf32>
    %44 = tpu.matmul %39, %4, %cst_27 {dimension_numbers = #tpu.dot_dimension_numbers<[1], [0], [0], [1], [0, 0, 1, 1], [], []>} : vector<8x32xf32>, vector<32x256xf32>, vector<8x256xf32> -> vector<8x256xf32>
    %45 = arith.addf %43, %44 : vector<8x256xf32>
    %46 = arith.negf %45 : vector<8x256xf32>
    %47 = math.exp %46 : vector<8x256xf32>
    %cst_28 = arith.constant 1.000000e+00 : f32
    %48 = vector.broadcast %cst_28 : f32 to vector<8x256xf32>
    %49 = arith.addf %48, %47 : vector<8x256xf32>
    %50 = arith.divf %48, %49 : vector<8x256xf32>
    %51 = math.tanh %45 : vector<8x256xf32>
    %52 = vector.extract_strided_slice %50 {offsets = [0, 64], sizes = [8, 64], strides = [1, 1]} : vector<8x256xf32> to vector<8x64xf32>
    %53 = arith.mulf %52, %13 : vector<8x64xf32>
    %54 = vector.extract_strided_slice %50 {offsets = [0, 0], sizes = [8, 64], strides = [1, 1]} : vector<8x256xf32> to vector<8x64xf32>
    %55 = vector.extract_strided_slice %51 {offsets = [0, 128], sizes = [8, 64], strides = [1, 1]} : vector<8x256xf32> to vector<8x64xf32>
    %56 = arith.mulf %54, %55 : vector<8x64xf32>
    %57 = arith.addf %53, %56 : vector<8x64xf32>
    %58 = vector.extract_strided_slice %50 {offsets = [0, 192], sizes = [8, 64], strides = [1, 1]} : vector<8x256xf32> to vector<8x64xf32>
    %59 = math.tanh %57 : vector<8x64xf32>
    %60 = arith.mulf %58, %59 : vector<8x64xf32>
    %c0_29 = arith.constant 0 : index
    %c0_30 = arith.constant 0 : index
    %c0_31 = arith.constant 0 : index
    %61 = vector.load %arg11[%c0_29, %c0_30, %c0_31] : memref<6x8x64xf32, #tpu.memory_space<vmem>>, vector<1x8x64xf32>
    %62 = vector.shape_cast %61 : vector<1x8x64xf32> to vector<8x64xf32>
    %63 = vector.shape_cast %60 : vector<8x64xf32> to vector<1x8x64xf32>
    tpu.vector_store %arg11[%c0_29, %c0_30, %c0_31], %63 {strides = array<i32>} : memref<6x8x64xf32, #tpu.memory_space<vmem>>, vector<1x8x64xf32>,
    %cst_32 = arith.constant dense<0.000000e+00> : vector<8x288xf32>
    %64 = tpu.matmul %60, %3, %cst_32 {dimension_numbers = #tpu.dot_dimension_numbers<[1], [0], [0], [1], [0, 0, 1, 1], [], []>} : vector<8x64xf32>, vector<64x288xf32>, vector<8x288xf32> -> vector<8x288xf32>
    %65 = vector.extract_strided_slice %64 {offsets = [0, 256], sizes = [8, 32], strides = [1, 1]} : vector<8x288xf32> to vector<8x32xf32>
    %66 = vector.shape_cast %65 : vector<8x32xf32> to vector<8x1x32xf32>
    %67 = vector.broadcast %66 : vector<8x1x32xf32> to vector<8x8x32xf32>
    %68 = arith.addf %5, %67 : vector<8x8x32xf32>
    %69 = math.tanh %68 : vector<8x8x32xf32>
    %70 = vector.shape_cast %9 : vector<32xf32> to vector<1x1x32xf32>
    %71 = vector.broadcast %70 : vector<1x1x32xf32> to vector<8x8x32xf32>
    %72 = arith.mulf %69, %71 : vector<8x8x32xf32>
    %cst_33 = arith.constant dense<0.000000e+00> : vector<8x8xf32>
    %73 = vector.multi_reduction <add>, %72, %cst_33 [2] : vector<8x8x32xf32> to vector<8x8xf32>
    %74 = vector.broadcast %11 : f32 to vector<8x8xf32>
    %75 = arith.addf %73, %74 : vector<8x8xf32>
    %cst_34 = arith.constant dense<0xFF800000> : vector<8xf32>
    %76 = vector.multi_reduction <maximumf>, %75, %cst_34 [1] : vector<8x8xf32> to vector<8xf32>
    %77 = vector.shape_cast %76 : vector<8xf32> to vector<8x1xf32>
    %78 = vector.broadcast %77 : vector<8x1xf32> to vector<8x8xf32>
    %79 = arith.subf %75, %78 : vector<8x8xf32>
    %80 = math.exp %79 : vector<8x8xf32>
    %81 = arith.mulf %80, %7 : vector<8x8xf32>
    %cst_35 = arith.constant dense<0.000000e+00> : vector<8xf32>
    %82 = vector.multi_reduction <add>, %81, %cst_35 [1] : vector<8x8xf32> to vector<8xf32>
    %83 = vector.shape_cast %82 : vector<8xf32> to vector<8x1xf32>
    %84 = vector.broadcast %83 : vector<8x1xf32> to vector<8x8xf32>
    %85 = arith.divf %81, %84 : vector<8x8xf32>
    %86 = vector.shape_cast %85 : vector<8x8xf32> to vector<8x8x1xf32>
    %87 = vector.broadcast %86 : vector<8x8x1xf32> to vector<8x8x32xf32>
    %88 = arith.mulf %87, %6 : vector<8x8x32xf32>
    %cst_36 = arith.constant dense<0.000000e+00> : vector<8x32xf32>
    %89 = vector.multi_reduction <add>, %88, %cst_36 [1] : vector<8x8x32xf32> to vector<8x32xf32>
    %c1 = arith.constant 1 : index
    %c0_37 = arith.constant 0 : index
    %c0_38 = arith.constant 0 : index
    %90 = vector.load %arg1[%c1, %c0_37, %c0_38] : memref<6x8x256xf32, #tpu.memory_space<vmem>>, vector<1x8x256xf32>
    %91 = vector.shape_cast %90 : vector<1x8x256xf32> to vector<8x256xf32>
    %92 = vector.extract_strided_slice %64 {offsets = [0, 0], sizes = [8, 256], strides = [1, 1]} : vector<8x288xf32> to vector<8x256xf32>
    %93 = arith.addf %91, %92 : vector<8x256xf32>
    %cst_39 = arith.constant dense<0.000000e+00> : vector<8x256xf32>
    %94 = tpu.matmul %89, %4, %cst_39 {dimension_numbers = #tpu.dot_dimension_numbers<[1], [0], [0], [1], [0, 0, 1, 1], [], []>} : vector<8x32xf32>, vector<32x256xf32>, vector<8x256xf32> -> vector<8x256xf32>
    %95 = arith.addf %93, %94 : vector<8x256xf32>
    %96 = arith.negf %95 : vector<8x256xf32>
    %97 = math.exp %96 : vector<8x256xf32>
    %cst_40 = arith.constant 1.000000e+00 : f32
    %98 = vector.broadcast %cst_40 : f32 to vector<8x256xf32>
    %99 = arith.addf %98, %97 : vector<8x256xf32>
    %100 = arith.divf %98, %99 : vector<8x256xf32>
    %101 = math.tanh %95 : vector<8x256xf32>
    %102 = vector.extract_strided_slice %100 {offsets = [0, 64], sizes = [8, 64], strides = [1, 1]} : vector<8x256xf32> to vector<8x64xf32>
    %103 = arith.mulf %102, %57 : vector<8x64xf32>
    %104 = vector.extract_strided_slice %100 {offsets = [0, 0], sizes = [8, 64], strides = [1, 1]} : vector<8x256xf32> to vector<8x64xf32>
    %105 = vector.extract_strided_slice %101 {offsets = [0, 128], sizes = [8, 64], strides = [1, 1]} : vector<8x256xf32> to vector<8x64xf32>
    %106 = arith.mulf %104, %105 : vector<8x64xf32>
    %107 = arith.addf %103, %106 : vector<8x64xf32>
    %108 = vector.extract_strided_slice %100 {offsets = [0, 192], sizes = [8, 64], strides = [1, 1]} : vector<8x256xf32> to vector<8x64xf32>
    %109 = math.tanh %107 : vector<8x64xf32>
    %110 = arith.mulf %108, %109 : vector<8x64xf32>
    %c1_41 = arith.constant 1 : index
    %c0_42 = arith.constant 0 : index
    %c0_43 = arith.constant 0 : index
    %111 = vector.load %arg11[%c1_41, %c0_42, %c0_43] : memref<6x8x64xf32, #tpu.memory_space<vmem>>, vector<1x8x64xf32>
    %112 = vector.shape_cast %111 : vector<1x8x64xf32> to vector<8x64xf32>
    %113 = vector.shape_cast %110 : vector<8x64xf32> to vector<1x8x64xf32>
    tpu.vector_store %arg11[%c1_41, %c0_42, %c0_43], %113 {strides = array<i32>} : memref<6x8x64xf32, #tpu.memory_space<vmem>>, vector<1x8x64xf32>,
    %cst_44 = arith.constant dense<0.000000e+00> : vector<8x288xf32>
    %114 = tpu.matmul %110, %3, %cst_44 {dimension_numbers = #tpu.dot_dimension_numbers<[1], [0], [0], [1], [0, 0, 1, 1], [], []>} : vector<8x64xf32>, vector<64x288xf32>, vector<8x288xf32> -> vector<8x288xf32>
    %115 = vector.extract_strided_slice %114 {offsets = [0, 256], sizes = [8, 32], strides = [1, 1]} : vector<8x288xf32> to vector<8x32xf32>
    %116 = vector.shape_cast %115 : vector<8x32xf32> to vector<8x1x32xf32>
    %117 = vector.broadcast %116 : vector<8x1x32xf32> to vector<8x8x32xf32>
    %118 = arith.addf %5, %117 : vector<8x8x32xf32>
    %119 = math.tanh %118 : vector<8x8x32xf32>
    %120 = vector.shape_cast %9 : vector<32xf32> to vector<1x1x32xf32>
    %121 = vector.broadcast %120 : vector<1x1x32xf32> to vector<8x8x32xf32>
    %122 = arith.mulf %119, %121 : vector<8x8x32xf32>
    %cst_45 = arith.constant dense<0.000000e+00> : vector<8x8xf32>
    %123 = vector.multi_reduction <add>, %122, %cst_45 [2] : vector<8x8x32xf32> to vector<8x8xf32>
    %124 = vector.broadcast %11 : f32 to vector<8x8xf32>
    %125 = arith.addf %123, %124 : vector<8x8xf32>
    %cst_46 = arith.constant dense<0xFF800000> : vector<8xf32>
    %126 = vector.multi_reduction <maximumf>, %125, %cst_46 [1] : vector<8x8xf32> to vector<8xf32>
    %127 = vector.shape_cast %126 : vector<8xf32> to vector<8x1xf32>
    %128 = vector.broadcast %127 : vector<8x1xf32> to vector<8x8xf32>
    %129 = arith.subf %125, %128 : vector<8x8xf32>
    %130 = math.exp %129 : vector<8x8xf32>
    %131 = arith.mulf %130, %7 : vector<8x8xf32>
    %cst_47 = arith.constant dense<0.000000e+00> : vector<8xf32>
    %132 = vector.multi_reduction <add>, %131, %cst_47 [1] : vector<8x8xf32> to vector<8xf32>
    %133 = vector.shape_cast %132 : vector<8xf32> to vector<8x1xf32>
    %134 = vector.broadcast %133 : vector<8x1xf32> to vector<8x8xf32>
    %135 = arith.divf %131, %134 : vector<8x8xf32>
    %136 = vector.shape_cast %135 : vector<8x8xf32> to vector<8x8x1xf32>
    %137 = vector.broadcast %136 : vector<8x8x1xf32> to vector<8x8x32xf32>
    %138 = arith.mulf %137, %6 : vector<8x8x32xf32>
    %cst_48 = arith.constant dense<0.000000e+00> : vector<8x32xf32>
    %139 = vector.multi_reduction <add>, %138, %cst_48 [1] : vector<8x8x32xf32> to vector<8x32xf32>
    %c2 = arith.constant 2 : index
    %c0_49 = arith.constant 0 : index
    %c0_50 = arith.constant 0 : index
    %140 = vector.load %arg1[%c2, %c0_49, %c0_50] : memref<6x8x256xf32, #tpu.memory_space<vmem>>, vector<1x8x256xf32>
    %141 = vector.shape_cast %140 : vector<1x8x256xf32> to vector<8x256xf32>
    %142 = vector.extract_strided_slice %114 {offsets = [0, 0], sizes = [8, 256], strides = [1, 1]} : vector<8x288xf32> to vector<8x256xf32>
    %143 = arith.addf %141, %142 : vector<8x256xf32>
    %cst_51 = arith.constant dense<0.000000e+00> : vector<8x256xf32>
    %144 = tpu.matmul %139, %4, %cst_51 {dimension_numbers = #tpu.dot_dimension_numbers<[1], [0], [0], [1], [0, 0, 1, 1], [], []>} : vector<8x32xf32>, vector<32x256xf32>, vector<8x256xf32> -> vector<8x256xf32>
    %145 = arith.addf %143, %144 : vector<8x256xf32>
    %146 = arith.negf %145 : vector<8x256xf32>
    %147 = math.exp %146 : vector<8x256xf32>
    %cst_52 = arith.constant 1.000000e+00 : f32
    %148 = vector.broadcast %cst_52 : f32 to vector<8x256xf32>
    %149 = arith.addf %148, %147 : vector<8x256xf32>
    %150 = arith.divf %148, %149 : vector<8x256xf32>
    %151 = math.tanh %145 : vector<8x256xf32>
    %152 = vector.extract_strided_slice %150 {offsets = [0, 64], sizes = [8, 64], strides = [1, 1]} : vector<8x256xf32> to vector<8x64xf32>
    %153 = arith.mulf %152, %107 : vector<8x64xf32>
    %154 = vector.extract_strided_slice %150 {offsets = [0, 0], sizes = [8, 64], strides = [1, 1]} : vector<8x256xf32> to vector<8x64xf32>
    %155 = vector.extract_strided_slice %151 {offsets = [0, 128], sizes = [8, 64], strides = [1, 1]} : vector<8x256xf32> to vector<8x64xf32>
    %156 = arith.mulf %154, %155 : vector<8x64xf32>
    %157 = arith.addf %153, %156 : vector<8x64xf32>
    %158 = vector.extract_strided_slice %150 {offsets = [0, 192], sizes = [8, 64], strides = [1, 1]} : vector<8x256xf32> to vector<8x64xf32>
    %159 = math.tanh %157 : vector<8x64xf32>
    %160 = arith.mulf %158, %159 : vector<8x64xf32>
    %c2_53 = arith.constant 2 : index
    %c0_54 = arith.constant 0 : index
    %c0_55 = arith.constant 0 : index
    %161 = vector.load %arg11[%c2_53, %c0_54, %c0_55] : memref<6x8x64xf32, #tpu.memory_space<vmem>>, vector<1x8x64xf32>
    %162 = vector.shape_cast %161 : vector<1x8x64xf32> to vector<8x64xf32>
    %163 = vector.shape_cast %160 : vector<8x64xf32> to vector<1x8x64xf32>
    tpu.vector_store %arg11[%c2_53, %c0_54, %c0_55], %163 {strides = array<i32>} : memref<6x8x64xf32, #tpu.memory_space<vmem>>, vector<1x8x64xf32>,
    %cst_56 = arith.constant dense<0.000000e+00> : vector<8x288xf32>
    %164 = tpu.matmul %160, %3, %cst_56 {dimension_numbers = #tpu.dot_dimension_numbers<[1], [0], [0], [1], [0, 0, 1, 1], [], []>} : vector<8x64xf32>, vector<64x288xf32>, vector<8x288xf32> -> vector<8x288xf32>
    %165 = vector.extract_strided_slice %164 {offsets = [0, 256], sizes = [8, 32], strides = [1, 1]} : vector<8x288xf32> to vector<8x32xf32>
    %166 = vector.shape_cast %165 : vector<8x32xf32> to vector<8x1x32xf32>
    %167 = vector.broadcast %166 : vector<8x1x32xf32> to vector<8x8x32xf32>
    %168 = arith.addf %5, %167 : vector<8x8x32xf32>
    %169 = math.tanh %168 : vector<8x8x32xf32>
    %170 = vector.shape_cast %9 : vector<32xf32> to vector<1x1x32xf32>
    %171 = vector.broadcast %170 : vector<1x1x32xf32> to vector<8x8x32xf32>
    %172 = arith.mulf %169, %171 : vector<8x8x32xf32>
    %cst_57 = arith.constant dense<0.000000e+00> : vector<8x8xf32>
    %173 = vector.multi_reduction <add>, %172, %cst_57 [2] : vector<8x8x32xf32> to vector<8x8xf32>
    %174 = vector.broadcast %11 : f32 to vector<8x8xf32>
    %175 = arith.addf %173, %174 : vector<8x8xf32>
    %cst_58 = arith.constant dense<0xFF800000> : vector<8xf32>
    %176 = vector.multi_reduction <maximumf>, %175, %cst_58 [1] : vector<8x8xf32> to vector<8xf32>
    %177 = vector.shape_cast %176 : vector<8xf32> to vector<8x1xf32>
    %178 = vector.broadcast %177 : vector<8x1xf32> to vector<8x8xf32>
    %179 = arith.subf %175, %178 : vector<8x8xf32>
    %180 = math.exp %179 : vector<8x8xf32>
    %181 = arith.mulf %180, %7 : vector<8x8xf32>
    %cst_59 = arith.constant dense<0.000000e+00> : vector<8xf32>
    %182 = vector.multi_reduction <add>, %181, %cst_59 [1] : vector<8x8xf32> to vector<8xf32>
    %183 = vector.shape_cast %182 : vector<8xf32> to vector<8x1xf32>
    %184 = vector.broadcast %183 : vector<8x1xf32> to vector<8x8xf32>
    %185 = arith.divf %181, %184 : vector<8x8xf32>
    %186 = vector.shape_cast %185 : vector<8x8xf32> to vector<8x8x1xf32>
    %187 = vector.broadcast %186 : vector<8x8x1xf32> to vector<8x8x32xf32>
    %188 = arith.mulf %187, %6 : vector<8x8x32xf32>
    %cst_60 = arith.constant dense<0.000000e+00> : vector<8x32xf32>
    %189 = vector.multi_reduction <add>, %188, %cst_60 [1] : vector<8x8x32xf32> to vector<8x32xf32>
    %c3 = arith.constant 3 : index
    %c0_61 = arith.constant 0 : index
    %c0_62 = arith.constant 0 : index
    %190 = vector.load %arg1[%c3, %c0_61, %c0_62] : memref<6x8x256xf32, #tpu.memory_space<vmem>>, vector<1x8x256xf32>
    %191 = vector.shape_cast %190 : vector<1x8x256xf32> to vector<8x256xf32>
    %192 = vector.extract_strided_slice %164 {offsets = [0, 0], sizes = [8, 256], strides = [1, 1]} : vector<8x288xf32> to vector<8x256xf32>
    %193 = arith.addf %191, %192 : vector<8x256xf32>
    %cst_63 = arith.constant dense<0.000000e+00> : vector<8x256xf32>
    %194 = tpu.matmul %189, %4, %cst_63 {dimension_numbers = #tpu.dot_dimension_numbers<[1], [0], [0], [1], [0, 0, 1, 1], [], []>} : vector<8x32xf32>, vector<32x256xf32>, vector<8x256xf32> -> vector<8x256xf32>
    %195 = arith.addf %193, %194 : vector<8x256xf32>
    %196 = arith.negf %195 : vector<8x256xf32>
    %197 = math.exp %196 : vector<8x256xf32>
    %cst_64 = arith.constant 1.000000e+00 : f32
    %198 = vector.broadcast %cst_64 : f32 to vector<8x256xf32>
    %199 = arith.addf %198, %197 : vector<8x256xf32>
    %200 = arith.divf %198, %199 : vector<8x256xf32>
    %201 = math.tanh %195 : vector<8x256xf32>
    %202 = vector.extract_strided_slice %200 {offsets = [0, 64], sizes = [8, 64], strides = [1, 1]} : vector<8x256xf32> to vector<8x64xf32>
    %203 = arith.mulf %202, %157 : vector<8x64xf32>
    %204 = vector.extract_strided_slice %200 {offsets = [0, 0], sizes = [8, 64], strides = [1, 1]} : vector<8x256xf32> to vector<8x64xf32>
    %205 = vector.extract_strided_slice %201 {offsets = [0, 128], sizes = [8, 64], strides = [1, 1]} : vector<8x256xf32> to vector<8x64xf32>
    %206 = arith.mulf %204, %205 : vector<8x64xf32>
    %207 = arith.addf %203, %206 : vector<8x64xf32>
    %208 = vector.extract_strided_slice %200 {offsets = [0, 192], sizes = [8, 64], strides = [1, 1]} : vector<8x256xf32> to vector<8x64xf32>
    %209 = math.tanh %207 : vector<8x64xf32>
    %210 = arith.mulf %208, %209 : vector<8x64xf32>
    %c3_65 = arith.constant 3 : index
    %c0_66 = arith.constant 0 : index
    %c0_67 = arith.constant 0 : index
    %211 = vector.load %arg11[%c3_65, %c0_66, %c0_67] : memref<6x8x64xf32, #tpu.memory_space<vmem>>, vector<1x8x64xf32>
    %212 = vector.shape_cast %211 : vector<1x8x64xf32> to vector<8x64xf32>
    %213 = vector.shape_cast %210 : vector<8x64xf32> to vector<1x8x64xf32>
    tpu.vector_store %arg11[%c3_65, %c0_66, %c0_67], %213 {strides = array<i32>} : memref<6x8x64xf32, #tpu.memory_space<vmem>>, vector<1x8x64xf32>,
    %cst_68 = arith.constant dense<0.000000e+00> : vector<8x288xf32>
    %214 = tpu.matmul %210, %3, %cst_68 {dimension_numbers = #tpu.dot_dimension_numbers<[1], [0], [0], [1], [0, 0, 1, 1], [], []>} : vector<8x64xf32>, vector<64x288xf32>, vector<8x288xf32> -> vector<8x288xf32>
    %215 = vector.extract_strided_slice %214 {offsets = [0, 256], sizes = [8, 32], strides = [1, 1]} : vector<8x288xf32> to vector<8x32xf32>
    %216 = vector.shape_cast %215 : vector<8x32xf32> to vector<8x1x32xf32>
    %217 = vector.broadcast %216 : vector<8x1x32xf32> to vector<8x8x32xf32>
    %218 = arith.addf %5, %217 : vector<8x8x32xf32>
    %219 = math.tanh %218 : vector<8x8x32xf32>
    %220 = vector.shape_cast %9 : vector<32xf32> to vector<1x1x32xf32>
    %221 = vector.broadcast %220 : vector<1x1x32xf32> to vector<8x8x32xf32>
    %222 = arith.mulf %219, %221 : vector<8x8x32xf32>
    %cst_69 = arith.constant dense<0.000000e+00> : vector<8x8xf32>
    %223 = vector.multi_reduction <add>, %222, %cst_69 [2] : vector<8x8x32xf32> to vector<8x8xf32>
    %224 = vector.broadcast %11 : f32 to vector<8x8xf32>
    %225 = arith.addf %223, %224 : vector<8x8xf32>
    %cst_70 = arith.constant dense<0xFF800000> : vector<8xf32>
    %226 = vector.multi_reduction <maximumf>, %225, %cst_70 [1] : vector<8x8xf32> to vector<8xf32>
    %227 = vector.shape_cast %226 : vector<8xf32> to vector<8x1xf32>
    %228 = vector.broadcast %227 : vector<8x1xf32> to vector<8x8xf32>
    %229 = arith.subf %225, %228 : vector<8x8xf32>
    %230 = math.exp %229 : vector<8x8xf32>
    %231 = arith.mulf %230, %7 : vector<8x8xf32>
    %cst_71 = arith.constant dense<0.000000e+00> : vector<8xf32>
    %232 = vector.multi_reduction <add>, %231, %cst_71 [1] : vector<8x8xf32> to vector<8xf32>
    %233 = vector.shape_cast %232 : vector<8xf32> to vector<8x1xf32>
    %234 = vector.broadcast %233 : vector<8x1xf32> to vector<8x8xf32>
    %235 = arith.divf %231, %234 : vector<8x8xf32>
    %236 = vector.shape_cast %235 : vector<8x8xf32> to vector<8x8x1xf32>
    %237 = vector.broadcast %236 : vector<8x8x1xf32> to vector<8x8x32xf32>
    %238 = arith.mulf %237, %6 : vector<8x8x32xf32>
    %cst_72 = arith.constant dense<0.000000e+00> : vector<8x32xf32>
    %239 = vector.multi_reduction <add>, %238, %cst_72 [1] : vector<8x8x32xf32> to vector<8x32xf32>
    %c4 = arith.constant 4 : index
    %c0_73 = arith.constant 0 : index
    %c0_74 = arith.constant 0 : index
    %240 = vector.load %arg1[%c4, %c0_73, %c0_74] : memref<6x8x256xf32, #tpu.memory_space<vmem>>, vector<1x8x256xf32>
    %241 = vector.shape_cast %240 : vector<1x8x256xf32> to vector<8x256xf32>
    %242 = vector.extract_strided_slice %214 {offsets = [0, 0], sizes = [8, 256], strides = [1, 1]} : vector<8x288xf32> to vector<8x256xf32>
    %243 = arith.addf %241, %242 : vector<8x256xf32>
    %cst_75 = arith.constant dense<0.000000e+00> : vector<8x256xf32>
    %244 = tpu.matmul %239, %4, %cst_75 {dimension_numbers = #tpu.dot_dimension_numbers<[1], [0], [0], [1], [0, 0, 1, 1], [], []>} : vector<8x32xf32>, vector<32x256xf32>, vector<8x256xf32> -> vector<8x256xf32>
    %245 = arith.addf %243, %244 : vector<8x256xf32>
    %246 = arith.negf %245 : vector<8x256xf32>
    %247 = math.exp %246 : vector<8x256xf32>
    %cst_76 = arith.constant 1.000000e+00 : f32
    %248 = vector.broadcast %cst_76 : f32 to vector<8x256xf32>
    %249 = arith.addf %248, %247 : vector<8x256xf32>
    %250 = arith.divf %248, %249 : vector<8x256xf32>
    %251 = math.tanh %245 : vector<8x256xf32>
    %252 = vector.extract_strided_slice %250 {offsets = [0, 64], sizes = [8, 64], strides = [1, 1]} : vector<8x256xf32> to vector<8x64xf32>
    %253 = arith.mulf %252, %207 : vector<8x64xf32>
    %254 = vector.extract_strided_slice %250 {offsets = [0, 0], sizes = [8, 64], strides = [1, 1]} : vector<8x256xf32> to vector<8x64xf32>
    %255 = vector.extract_strided_slice %251 {offsets = [0, 128], sizes = [8, 64], strides = [1, 1]} : vector<8x256xf32> to vector<8x64xf32>
    %256 = arith.mulf %254, %255 : vector<8x64xf32>
    %257 = arith.addf %253, %256 : vector<8x64xf32>
    %258 = vector.extract_strided_slice %250 {offsets = [0, 192], sizes = [8, 64], strides = [1, 1]} : vector<8x256xf32> to vector<8x64xf32>
    %259 = math.tanh %257 : vector<8x64xf32>
    %260 = arith.mulf %258, %259 : vector<8x64xf32>
    %c4_77 = arith.constant 4 : index
    %c0_78 = arith.constant 0 : index
    %c0_79 = arith.constant 0 : index
    %261 = vector.load %arg11[%c4_77, %c0_78, %c0_79] : memref<6x8x64xf32, #tpu.memory_space<vmem>>, vector<1x8x64xf32>
    %262 = vector.shape_cast %261 : vector<1x8x64xf32> to vector<8x64xf32>
    %263 = vector.shape_cast %260 : vector<8x64xf32> to vector<1x8x64xf32>
    tpu.vector_store %arg11[%c4_77, %c0_78, %c0_79], %263 {strides = array<i32>} : memref<6x8x64xf32, #tpu.memory_space<vmem>>, vector<1x8x64xf32>,
    %cst_80 = arith.constant dense<0.000000e+00> : vector<8x288xf32>
    %264 = tpu.matmul %260, %3, %cst_80 {dimension_numbers = #tpu.dot_dimension_numbers<[1], [0], [0], [1], [0, 0, 1, 1], [], []>} : vector<8x64xf32>, vector<64x288xf32>, vector<8x288xf32> -> vector<8x288xf32>
    %265 = vector.extract_strided_slice %264 {offsets = [0, 256], sizes = [8, 32], strides = [1, 1]} : vector<8x288xf32> to vector<8x32xf32>
    %266 = vector.shape_cast %265 : vector<8x32xf32> to vector<8x1x32xf32>
    %267 = vector.broadcast %266 : vector<8x1x32xf32> to vector<8x8x32xf32>
    %268 = arith.addf %5, %267 : vector<8x8x32xf32>
    %269 = math.tanh %268 : vector<8x8x32xf32>
    %270 = vector.shape_cast %9 : vector<32xf32> to vector<1x1x32xf32>
    %271 = vector.broadcast %270 : vector<1x1x32xf32> to vector<8x8x32xf32>
    %272 = arith.mulf %269, %271 : vector<8x8x32xf32>
    %cst_81 = arith.constant dense<0.000000e+00> : vector<8x8xf32>
    %273 = vector.multi_reduction <add>, %272, %cst_81 [2] : vector<8x8x32xf32> to vector<8x8xf32>
    %274 = vector.broadcast %11 : f32 to vector<8x8xf32>
    %275 = arith.addf %273, %274 : vector<8x8xf32>
    %cst_82 = arith.constant dense<0xFF800000> : vector<8xf32>
    %276 = vector.multi_reduction <maximumf>, %275, %cst_82 [1] : vector<8x8xf32> to vector<8xf32>
    %277 = vector.shape_cast %276 : vector<8xf32> to vector<8x1xf32>
    %278 = vector.broadcast %277 : vector<8x1xf32> to vector<8x8xf32>
    %279 = arith.subf %275, %278 : vector<8x8xf32>
    %280 = math.exp %279 : vector<8x8xf32>
    %281 = arith.mulf %280, %7 : vector<8x8xf32>
    %cst_83 = arith.constant dense<0.000000e+00> : vector<8xf32>
    %282 = vector.multi_reduction <add>, %281, %cst_83 [1] : vector<8x8xf32> to vector<8xf32>
    %283 = vector.shape_cast %282 : vector<8xf32> to vector<8x1xf32>
    %284 = vector.broadcast %283 : vector<8x1xf32> to vector<8x8xf32>
    %285 = arith.divf %281, %284 : vector<8x8xf32>
    %286 = vector.shape_cast %285 : vector<8x8xf32> to vector<8x8x1xf32>
    %287 = vector.broadcast %286 : vector<8x8x1xf32> to vector<8x8x32xf32>
    %288 = arith.mulf %287, %6 : vector<8x8x32xf32>
    %cst_84 = arith.constant dense<0.000000e+00> : vector<8x32xf32>
    %289 = vector.multi_reduction <add>, %288, %cst_84 [1] : vector<8x8x32xf32> to vector<8x32xf32>
    %c5 = arith.constant 5 : index
    %c0_85 = arith.constant 0 : index
    %c0_86 = arith.constant 0 : index
    %290 = vector.load %arg1[%c5, %c0_85, %c0_86] : memref<6x8x256xf32, #tpu.memory_space<vmem>>, vector<1x8x256xf32>
    %291 = vector.shape_cast %290 : vector<1x8x256xf32> to vector<8x256xf32>
    %292 = vector.extract_strided_slice %264 {offsets = [0, 0], sizes = [8, 256], strides = [1, 1]} : vector<8x288xf32> to vector<8x256xf32>
    %293 = arith.addf %291, %292 : vector<8x256xf32>
    %cst_87 = arith.constant dense<0.000000e+00> : vector<8x256xf32>
    %294 = tpu.matmul %289, %4, %cst_87 {dimension_numbers = #tpu.dot_dimension_numbers<[1], [0], [0], [1], [0, 0, 1, 1], [], []>} : vector<8x32xf32>, vector<32x256xf32>, vector<8x256xf32> -> vector<8x256xf32>
    %295 = arith.addf %293, %294 : vector<8x256xf32>
    %296 = arith.negf %295 : vector<8x256xf32>
    %297 = math.exp %296 : vector<8x256xf32>
    %cst_88 = arith.constant 1.000000e+00 : f32
    %298 = vector.broadcast %cst_88 : f32 to vector<8x256xf32>
    %299 = arith.addf %298, %297 : vector<8x256xf32>
    %300 = arith.divf %298, %299 : vector<8x256xf32>
    %301 = math.tanh %295 : vector<8x256xf32>
    %302 = vector.extract_strided_slice %300 {offsets = [0, 64], sizes = [8, 64], strides = [1, 1]} : vector<8x256xf32> to vector<8x64xf32>
    %303 = arith.mulf %302, %257 : vector<8x64xf32>
    %304 = vector.extract_strided_slice %300 {offsets = [0, 0], sizes = [8, 64], strides = [1, 1]} : vector<8x256xf32> to vector<8x64xf32>
    %305 = vector.extract_strided_slice %301 {offsets = [0, 128], sizes = [8, 64], strides = [1, 1]} : vector<8x256xf32> to vector<8x64xf32>
    %306 = arith.mulf %304, %305 : vector<8x64xf32>
    %307 = arith.addf %303, %306 : vector<8x64xf32>
    %308 = vector.extract_strided_slice %300 {offsets = [0, 192], sizes = [8, 64], strides = [1, 1]} : vector<8x256xf32> to vector<8x64xf32>
    %309 = math.tanh %307 : vector<8x64xf32>
    %310 = arith.mulf %308, %309 : vector<8x64xf32>
    %c5_89 = arith.constant 5 : index
    %c0_90 = arith.constant 0 : index
    %c0_91 = arith.constant 0 : index
    %311 = vector.load %arg11[%c5_89, %c0_90, %c0_91] : memref<6x8x64xf32, #tpu.memory_space<vmem>>, vector<1x8x64xf32>
    %312 = vector.shape_cast %311 : vector<1x8x64xf32> to vector<8x64xf32>
    %313 = vector.shape_cast %310 : vector<8x64xf32> to vector<1x8x64xf32>
    tpu.vector_store %arg11[%c5_89, %c0_90, %c0_91], %313 {strides = array<i32>} : memref<6x8x64xf32, #tpu.memory_space<vmem>>, vector<1x8x64xf32>,
    %c0_92 = arith.constant 0 : index
    %c0_93 = arith.constant 0 : index
    %314 = vector.load %arg14[%c0_92, %c0_93] : memref<8x64xf32, #tpu.memory_space<vmem>>, vector<8x64xf32>
    tpu.vector_store %arg14[%c0_92, %c0_93], %310 {strides = array<i32>} : memref<8x64xf32, #tpu.memory_space<vmem>>, vector<8x64xf32>,
    %c0_94 = arith.constant 0 : index
    %c0_95 = arith.constant 0 : index
    %315 = vector.load %arg15[%c0_94, %c0_95] : memref<8x64xf32, #tpu.memory_space<vmem>>, vector<8x64xf32>
    tpu.vector_store %arg15[%c0_94, %c0_95], %307 {strides = array<i32>} : memref<8x64xf32, #tpu.memory_space<vmem>>, vector<8x64xf32>,
    %c0_i32_96 = arith.constant 0 : i32
    %316 = arith.cmpi eq, %arg0, %c0_i32_96 : i32
    %317 = arith.extui %316 : i1 to i32
    %c0_i32_97 = arith.constant 0 : i32
    %318 = arith.cmpi ne, %317, %c0_i32_97 : i32
    scf.if %318 {
      %c0_98 = arith.constant 0 : index
      %c0_99 = arith.constant 0 : index
      %319 = vector.load %arg12[%c0_98, %c0_99] : memref<8x64xf32, #tpu.memory_space<vmem>>, vector<8x64xf32>
      tpu.vector_store %arg12[%c0_98, %c0_99], %310 {strides = array<i32>} : memref<8x64xf32, #tpu.memory_space<vmem>>, vector<8x64xf32>,
      %c0_100 = arith.constant 0 : index
      %c0_101 = arith.constant 0 : index
      %320 = vector.load %arg13[%c0_100, %c0_101] : memref<8x64xf32, #tpu.memory_space<vmem>>, vector<8x64xf32>
      tpu.vector_store %arg13[%c0_100, %c0_101], %307 {strides = array<i32>} : memref<8x64xf32, #tpu.memory_space<vmem>>, vector<8x64xf32>,
    } else {
    }
    return
  }
  func.func @transform_0(%arg0: i32) -> (i32, i32, i32) {
    %c0_i32 = arith.constant 0 : i32
    %c0_i32_0 = arith.constant 0 : i32
    %c0_i32_1 = arith.constant 0 : i32
    return %arg0, %c0_i32, %c0_i32_0 : i32, i32, i32
  }
  func.func @transform_1(%arg0: i32) -> (i32, i32) {
    %c0_i32 = arith.constant 0 : i32
    %c0_i32_0 = arith.constant 0 : i32
    %c0_i32_1 = arith.constant 0 : i32
    return %c0_i32, %c0_i32_0 : i32, i32
  }
  func.func @transform_2(%arg0: i32) -> (i32, i32) {
    %c0_i32 = arith.constant 0 : i32
    %c0_i32_0 = arith.constant 0 : i32
    %c0_i32_1 = arith.constant 0 : i32
    return %c0_i32, %c0_i32_0 : i32, i32
  }
  func.func @transform_3(%arg0: i32) -> (i32, i32) {
    %c0_i32 = arith.constant 0 : i32
    %c0_i32_0 = arith.constant 0 : i32
    %c0_i32_1 = arith.constant 0 : i32
    return %c0_i32, %c0_i32_0 : i32, i32
  }
  func.func @transform_4(%arg0: i32) -> (i32, i32) {
    %c0_i32 = arith.constant 0 : i32
    %c0_i32_0 = arith.constant 0 : i32
    %c0_i32_1 = arith.constant 0 : i32
    return %c0_i32, %c0_i32_0 : i32, i32
  }
  func.func @transform_5(%arg0: i32) -> (i32, i32, i32) {
    %c0_i32 = arith.constant 0 : i32
    %c0_i32_0 = arith.constant 0 : i32
    %c0_i32_1 = arith.constant 0 : i32
    %c0_i32_2 = arith.constant 0 : i32
    return %c0_i32, %c0_i32_0, %c0_i32_1 : i32, i32, i32
  }
  func.func @transform_6(%arg0: i32) -> (i32, i32, i32) {
    %c0_i32 = arith.constant 0 : i32
    %c0_i32_0 = arith.constant 0 : i32
    %c0_i32_1 = arith.constant 0 : i32
    %c0_i32_2 = arith.constant 0 : i32
    return %c0_i32, %c0_i32_0, %c0_i32_1 : i32, i32, i32
  }
  func.func @transform_7(%arg0: i32) -> (i32, i32) {
    %c0_i32 = arith.constant 0 : i32
    %c0_i32_0 = arith.constant 0 : i32
    %c0_i32_1 = arith.constant 0 : i32
    return %c0_i32, %c0_i32_0 : i32, i32
  }
  func.func @transform_8(%arg0: i32) -> (i32, i32) {
    %c0_i32 = arith.constant 0 : i32
    %c0_i32_0 = arith.constant 0 : i32
    %c0_i32_1 = arith.constant 0 : i32
    return %c0_i32, %c0_i32_0 : i32, i32
  }
  func.func @transform_9(%arg0: i32) -> (i32, i32) {
    %c0_i32 = arith.constant 0 : i32
    %c0_i32_0 = arith.constant 0 : i32
    %c0_i32_1 = arith.constant 0 : i32
    return %c0_i32, %c0_i32_0 : i32, i32
  }
  func.func @transform_10(%arg0: i32) -> (i32, i32, i32) {
    %c0_i32 = arith.constant 0 : i32
    %c0_i32_0 = arith.constant 0 : i32
    %c0_i32_1 = arith.constant 0 : i32
    return %arg0, %c0_i32, %c0_i32_0 : i32, i32, i32
  }
  func.func @transform_11(%arg0: i32) -> (i32, i32) {
    %c0_i32 = arith.constant 0 : i32
    %c0_i32_0 = arith.constant 0 : i32
    %c0_i32_1 = arith.constant 0 : i32
    return %c0_i32, %c0_i32_0 : i32, i32
  }
  func.func @transform_12(%arg0: i32) -> (i32, i32) {
    %c0_i32 = arith.constant 0 : i32
    %c0_i32_0 = arith.constant 0 : i32
    %c0_i32_1 = arith.constant 0 : i32
    return %c0_i32, %c0_i32_0 : i32, i32
  }
}

</mosaic_0001>

<bundles_post_ra>
// kernel: tpu_custom_call.1
= control target key start
LH: loop header
LB: loop body
LE: loop exit
PB: predicated region body
PF: predicated region fallthrough
CT: control target
= control target key end

     0   :  { %s6841_s0 = inlined_call_operand.hbm [shape: f32[6,8,256], index: 0, kind: input, shape index: {}]   ;;  %s6842_s1 = inlined_call_operand.hbm [shape: f32[8,64], index: 1, kind: input, shape index: {}]   ;;  %s6843_s2 = inlined_call_operand.hbm [shape: f32[8,64], index: 2, kind: input, shape index: {}]   ;;  %s6844_s3 = inlined_call_operand.hbm [shape: f32[64,288], index: 3, kind: input, shape index: {}]   ;;  %s6845_s4 = inlined_call_operand.hbm [shape: f32[32,256], index: 4, kind: input, shape index: {}]   ;;  %s6846_s5 = inlined_call_operand.hbm [shape: f32[8,8,32], index: 5, kind: input, shape index: {}]   ;;  %s6847_s6 = inlined_call_operand.hbm [shape: f32[8,8,32], index: 6, kind: input, shape index: {}]   ;;  %s6848_s7 = inlined_call_operand.vmem [shape: f32[8,8], index: 7, kind: input, shape index: {}]   ;;  %s6849_s8 = inlined_call_operand.vmem [shape: f32[1,32], index: 8, kind: input, shape index: {}]   ;;  %s6850_s9 = inlined_call_operand.<no memory space> [shape: f32[1,1], index: 9, kind: input, shape index: {}]   ;;  %s6851_s10 = inlined_call_operand.hbm [shape: f32[6,8,64], index: 10, kind: output, shape index: {0}]   ;;  %s6852_s11 = inlined_call_operand.hbm [shape: f32[8,64], index: 11, kind: output, shape index: {1}]   ;;  %s6853_s12 = inlined_call_operand.hbm [shape: f32[8,64], index: 12, kind: output, shape index: {2}]  }
   0x1   :  { %v18_v0 = vstv %s6850_s9 }
   0x2   :  { %19 = vst [vmem:[#allocation4] sm:$0x1] %v18_v0 }
   0x3   :  { %20 = vsyncpa [#allocation6], 0 }
   0x4   :  { %21 = vsyncpa [#allocation9], 0 }
   0x5   :  { %22 = vsyncpa [#allocation12], 0 }
   0x6   :  { %23 = vsyncpa [#allocation15], 0 }
   0x7   :  { %24 = vsyncpa [#allocation7], 0  ;;  %s44_s25 = sshll.u32 %s6842_s1, 4  ;;  %s45_s25 = int_to_ptr.hbm [resolvable:$true] %s44_s25 }
   0x8   :  { %25 = vsyncpa [#allocation19], 0  ;;  %s4907_s26 = smov [#allocation8]   ;;  %s65_s30 = sshll.u32 %s6844_s3, 4  ;;  %s66_s30 = int_to_ptr.hbm [resolvable:$true] %s65_s30 }
   0x9   :  { %s46_s27 = sshll.u32 %s4907_s26, 4  ;;  %s4908_s9 = smov [#allocation11]   ;;  %s47_s27 = int_to_ptr.vmem [resolvable:$true] %s46_s27 }
   0xa   :  { %49 = dma.hbm_to_vmem [thread:$0]  %s45_s25, 128, %s47_s27, [#allocation9]  }
   0xb   :  { %s67_s13 = sshll.u32 %s4908_s9, 4  ;;  %s4909_s14 = smov 384   ;;  %s68_s13 = int_to_ptr.vmem [resolvable:$true] %s67_s13 }
   0xc   :  { %s4910_s15 = smov 24   ;;  %s91_s1 = sshll.u32 %s6846_s5, 4  ;;  %s92_s1 = int_to_ptr.hbm [resolvable:$true] %s91_s1 }
   0xd   :  { %73 = dma.hbm_to_vmem [thread:$0]  %s66_s30, 3072, %s68_s13, [#allocation12], %s4909_s14, %s4909_s14, %s4910_s15  }
   0xe   :  { %s4911_s18 = smov [#allocation14]   ;;  %s30_s3 = sshll.u32 %s6841_s0, 4  ;;  %s31_s3 = int_to_ptr.hbm [resolvable:$true] %s30_s3 }
   0xf   :  { %s93_s19 = sshll.u32 %s4911_s18, 4  ;;  %s4912_s22 = smov 128   ;;  %s94_s19 = int_to_ptr.vmem [resolvable:$true] %s93_s19 }
  0x10   :  { %s4913_s23 = smov 8   ;;  %s4914_s24 = smov [#allocation5]  }
  0x11   :  { %99 = dma.hbm_to_vmem [thread:$0]  %s92_s1, 1024, %s94_s19, [#allocation15], %s4912_s22, %s4912_s22, %s4913_s23  }
  0x12   :  { %s32_s25 = sshll.u32 %s4914_s24, 4  ;;  %s4915_s26 = smov 256   ;;  %s33_s25 = int_to_ptr.vmem [resolvable:$true] %s32_s25 }
  0x13   :  { %s4916_s5 = smov 16   ;;  %s55_s29 = sshll.u32 %s6843_s2, 4  ;;  %s56_s29 = int_to_ptr.hbm [resolvable:$true] %s55_s29 }
  0x14   :  { %38 = dma.hbm_to_vmem [thread:$0]  %s31_s3, 1536, %s33_s25, [#allocation6], %s4915_s26, %s4915_s26, %s4916_s5  }
  0x15   :  { %s4917_s30 = smov [#allocation10]   ;;  %s78_s14 = sshll.u32 %s6845_s4, 4  ;;  %s79_s14 = int_to_ptr.hbm [resolvable:$true] %s78_s14 }
  0x16   :  { %s57_s0 = sshll.u32 %s4917_s30, 4  ;;  %s4918_s15 = smov [#allocation13]   ;;  %s58_s0 = int_to_ptr.vmem [resolvable:$true] %s57_s0 }
  0x17   :  { %60 = dma.hbm_to_vmem [thread:$0]  %s56_s29, 128, %s58_s0, [#allocation9]  }
  0x18   :  { %s80_s16 = sshll.u32 %s4918_s15, 4  ;;  %s104_s18 = sshll.u32 %s6847_s6, 4  ;;  %s81_s16 = int_to_ptr.vmem [resolvable:$true] %s80_s16  ;;  %s105_s18 = int_to_ptr.hbm [resolvable:$true] %s104_s18 }
  0x19   :  { %86 = dma.hbm_to_vmem [thread:$0]  %s79_s14, 1024, %s81_s16, [#allocation12], %s4915_s26, %s4915_s26, %s4916_s5  }
  0x1a   :  { %s4919_s2 = smov [#allocation16]  }
  0x1b   :  { %s106_s19 = sshll.u32 %s4919_s2, 4  ;;  %s107_s19 = int_to_ptr.vmem [resolvable:$true] %s106_s19 }
  0x1c   :  { %112 = dma.hbm_to_vmem [thread:$0]  %s105_s18, 1024, %s107_s19, [#allocation15], %s4912_s22, %s4912_s22, %s4913_s23  }
  0x1d   :  { %4895 = dma.done.wait [#allocation6], 1536  }
  0x1e   :  { %4896 = vsyncadd [#allocation6], 4294965760 }
  0x1f   :  { %4897 = dma.done.wait [#allocation9], 256  }
  0x20   :  { %4898 = vsyncadd [#allocation9], 4294967040 }
  0x21   :  { %4899 = dma.done.wait [#allocation12], 4096  }
  0x22   :  { %4900 = vsyncadd [#allocation12], 4294963200 }
  0x23   :  { %4901 = dma.done.wait [#allocation15], 2048  }
  0x24   :  { %4902 = vsyncadd [#allocation15], 4294965248  ;;  %v179_v1 = vld [vmem:[#allocation11 + $0xb8] sm:$0xff]  ;;  %v176_v2 = vld [vmem:[#allocation11 + $0xa0] sm:$0xff]  ;;  %vm152_vm0 = vcmask 523264   ;;  %v367_v36 = vlaneseq  ;;  %vm325_vm1 = vcmask 261120  }
  0x25   :  { %262 = vmatpush.msra.mxu2 %v179_v1  ;;  %v173_v3 = vld [vmem:[#allocation11 + $0x88] sm:$0xff]  ;;  %v151_v4 = vld [vmem:[#allocation8] sm:$0xff]  ;;  %v167_v6 = vld [vmem:[#allocation11 + $0x58] sm:$0xff]  ;;  %vm377_vm2 = vcmask 1041409   ;;  %vm379_vm3 = vcmask 1042434   ;;  %vm381_vm4 = vcmask 1043459  }
  0x26   :  { %153 = vst.msk [vmem:[#allocation2] sm:$0xff] %vm152_vm0, %v151_v4  ;;  %v170_v5 = vld [vmem:[#allocation11 + $0x70] sm:$0xff]  ;;  %v164_v7 = vld [vmem:[#allocation11 + $0x40] sm:$0xff]  ;;  %v161_v8 = vld [vmem:[#allocation11 + $0x28] sm:$0xff]  ;;  %v440_v41 = vshrl.u32 %v367_v36, 7  ;;  %vm383_vm5 = vcmask 1044484  }
  0x27   :  { %263 = vmatpush.msra.mxu2 %v176_v2  ;;  %v158_v9 = vld [vmem:[#allocation11 + $0x10] sm:$0xff]  ;;  %v188_v12 = vld [vmem:[#allocation14] sm:$0xff]  ;;  %v189_v19 = vld [vmem:[#allocation14 + $0x8] sm:$0xff]  ;;  %vm6857_vm6 = vcmask 1045509   ;;  %vm6856_vm7 = vcmask 1046534   ;;  %vm6855_vm8 = vcmask 1047559  }
  0x28   :  { %v192_v14 = vld [vmem:[#allocation14 + $0x20] sm:$0xff]  ;;  %v190_v18 = vld [vmem:[#allocation14 + $0x10] sm:$0xff]  ;;  %v206_v22 = vld [vmem:[#allocation4] sm:$0x1]  ;;  %4190 = vset.pattern.permute.xlu2 %v440_v41  ;;  %4189 = vset.pattern.permute.xlu1 %v440_v41  ;;  %vm6854_vm9 = vcmask 64512   ;;  %s4079_s14 = sshll.u32 %s6851_s10, 4  ;;  %s4080_s14 = int_to_ptr.hbm [resolvable:$true] %s4079_s14 }
  0x29   :  { %264 = vmatpush.msra.mxu2 %v173_v3  ;;  %4168 = vpush %v206_v22  ;;  %v193_v27 = vld [vmem:[#allocation14 + $0x28] sm:$0xff]  ;;  %v191_v34 = vld [vmem:[#allocation14 + $0x18] sm:$0xff]  ;;  %v194_v42 = vld [vmem:[#allocation14 + $0x30] sm:$0xff]  ;;  %4188 = vset.pattern.permute.xlu0 %v440_v41  ;;  %s4923_s15 = smov [#allocation18]   ;;  %s4093_s18 = sshll.u32 %s6852_s11, 4  ;;  %s4094_s18 = int_to_ptr.hbm [resolvable:$true] %s4093_s18 }
  0x2a   :  { %v4194_v37 = vld [vmem:[%s6849_s8] ss:$0 sm:$0xff]  ;;  %s4091_s16 = sshll.u32 %s4923_s15, 4  ;;  %s4924_s2 = smov [#allocation20]   ;;  %s4092_s16 = int_to_ptr.vmem [resolvable:$true] %s4091_s16 }
  0x2b   :  { %265 = vmatpush.msra.mxu2 %v170_v5  ;;  %v195_v48 = vld [vmem:[#allocation14 + $0x38] sm:$0xff]  ;;  %s4102_s19 = sshll.u32 %s4924_s2, 4  ;;  %s4104_s20 = sshll.u32 %s6853_s12, 4  ;;  %s4103_s19 = int_to_ptr.vmem [resolvable:$true] %s4102_s19  ;;  %s4105_s20 = int_to_ptr.hbm [resolvable:$true] %s4104_s20 }
  0x2d   :  { %266 = vmatpush.msra.mxu2 %v167_v6  ;;  %v5021_v10 = vld [vmem:[#allocation2] sm:$0xff] }
  0x2f   :  { %267 = vmatpush.msra.mxu2 %v164_v7 }
  0x31   :  { %268 = vmatpush.msra.mxu2 %v161_v8 }
  0x33   :  { %269 = vmatpush.msra.mxu2 %v158_v9 }
  0x34   :  { %4128 = vmatmul.msk.f32.vlgmr.msra.gmra.mxu2 %vm152_vm0, %v5021_v10 }
  0x35   :  { %972 = vmatpush.msrb.mxu2 %v179_v1 }
  0x37   :  { %973 = vmatpush.msrb.mxu2 %v176_v2 }
  0x39   :  { %974 = vmatpush.msrb.mxu2 %v173_v3 }
  0x3b   :  { %975 = vmatpush.msrb.mxu2 %v170_v5 }
  0x3d   :  { %976 = vmatpush.msrb.mxu2 %v167_v6 }
  0x3f   :  { %977 = vmatpush.msrb.mxu2 %v164_v7 }
  0x41   :  { %978 = vmatpush.msrb.mxu2 %v161_v8 }
  0x43   :  { %979 = vmatpush.msrb.mxu2 %v158_v9 }
  0x45   :  { %1600 = vmatpush.msra.mxu2 %v179_v1 }
  0x47   :  { %1601 = vmatpush.msra.mxu2 %v176_v2 }
  0x49   :  { %1602 = vmatpush.msra.mxu2 %v173_v3 }
  0x4b   :  { %1603 = vmatpush.msra.mxu2 %v170_v5 }
  0x4d   :  { %1604 = vmatpush.msra.mxu2 %v167_v6 }
  0x4f   :  { %1605 = vmatpush.msra.mxu2 %v164_v7  ;;  %v204_v7 = vld [vmem:[%s6848_s7] sm:$0xff]  ;;  %s4921_s7 = smov 64  }
  0x51   :  { %1606 = vmatpush.msra.mxu2 %v161_v8  ;;  %v452_v8 = vperm.slane %v204_v7, 2 }
  0x53   :  { %1607 = vmatpush.msra.mxu2 %v158_v9  ;;  %v459_v9 = vperm.slane %v204_v7, 3 }
  0x5a   :  { %s4169_s3 = spop %4168 }
  0xb7   :  { %v271_v11 = vpop.f32.mrf.mxu2 }
  0xb8   :  { %v282_v13 = vperm.slane %v271_v11, 0  ;;  %v278_v15 = vrot.slane %v271_v11, 4  ;;  %v276_v16 = vrot.slane %v271_v11, 2  ;;  %v275_v17 = vrot.slane %v271_v11, 1 }
  0xb9   :  { %v279_v20 = vrot.slane %v271_v11, 5  ;;  %v277_v21 = vrot.slane %v271_v11, 3  ;;  %v280_v30 = vrot.slane %v271_v11, 6  ;;  %v281_v39 = vrot.slane %v271_v11, 7 }
  0xba   :  { %v298_v23 = vadd.f32 %v282_v13, %v188_v12  ;;  %v286_v24 = vperm.slane %v278_v15, 0  ;;  %v284_v25 = vperm.slane %v276_v16, 0  ;;  %v283_v26 = vperm.slane %v275_v17, 0 }
  0xbb   :  { %v287_v28 = vperm.slane %v279_v20, 0  ;;  %v285_v29 = vperm.slane %v277_v21, 0  ;;  %v288_v40 = vperm.slane %v280_v30, 0  ;;  %v289_v45 = vperm.slane %v281_v39, 0 }
  0xbc   :  { %4195 = vtanh.f32 %v298_v23  ;;  %v302_v31 = vadd.f32 %v286_v24, %v192_v14  ;;  %v300_v32 = vadd.f32 %v284_v25, %v190_v18  ;;  %v299_v33 = vadd.f32 %v283_v26, %v189_v19 }
  0xbd   :  { %v303_v35 = vadd.f32 %v287_v28, %v193_v27  ;;  %v301_v38 = vadd.f32 %v285_v29, %v191_v34  ;;  %v304_v47 = vadd.f32 %v288_v40, %v194_v42  ;;  %v305_v55 = vadd.f32 %v289_v45, %v195_v48 }
  0xbe   :  { %4197 = vtanh.f32 %v302_v31  ;;  %v445_v11 = vperm.slane %v204_v7, 1  ;;  %v438_v12 = vperm.slane %v204_v7, 0  ;;  %v466_v13 = vperm.slane %v204_v7, 4 }
  0xbf   :  { %4199 = vtanh.f32 %v300_v32  ;;  %v487_v15 = vperm.slane %v204_v7, 7  ;;  %v5040_v18 = vstv %s4169_s3  ;;  %v480_v19 = vperm.slane %v204_v7, 6 }
  0xc0   :  { %4201 = vtanh.f32 %v299_v33  ;;  %6892 = vst [vmem:[#allocation27_spill] sm:$0xff] %v5040_v18  ;;  %v5043_v20 = vand.u32 127, %v367_v36 }
  0xc1   :  { %4203 = vtanh.f32 %v303_v35 }
  0xc2   :  { %v4196_v43 = vpop.eup %4195  ;;  %4205 = vtanh.f32 %v301_v38  ;;  %6893 = vst [vmem:[#allocation28_spill] sm:$0xff] %v5043_v20 }
  0xc3   :  { %v317_v44 = vmul.f32 %v4196_v43, %v4194_v37  ;;  %4207 = vtanh.f32 %v304_v47 }
  0xc4   :  { %v4198_v46 = vpop.eup %4197  ;;  %4209 = vtanh.f32 %v305_v55 }
  0xc5   :  { %v4200_v49 = vpop.eup %4199  ;;  %v326_v50 = vsel %vm325_vm1, %v317_v44, 0.0  ;;  %v321_v51 = vmul.f32 %v4198_v46, %v4194_v37 }
  0xc6   :  { %v4202_v52 = vpop.eup %4201  ;;  %327 = vadd.xlane.f32.xlu0 %v326_v50  ;;  %v319_v53 = vmul.f32 %v4200_v49, %v4194_v37  ;;  %v473_v50 = vperm.slane %v204_v7, 5 }
  0xc7   :  { %v338_v54 = vsel %vm325_vm1, %v321_v51, 0.0  ;;  %v4204_v56 = vpop.eup %4203  ;;  %v318_v59 = vmul.f32 %v4202_v52, %v4194_v37  ;;  %v4920_v51 = vmov 0  }
  0xc8   :  { %339 = vadd.xlane.f32.xlu2 %v338_v54  ;;  %v332_v57 = vsel %vm325_vm1, %v319_v53, 0.0  ;;  %v4206_v58 = vpop.eup %4205  ;;  %v322_v60 = vmul.f32 %v4204_v56, %v4194_v37 }
  0xc9   :  { %333 = vadd.xlane.f32.xlu1 %v332_v57  ;;  %v320_v61 = vmul.f32 %v4206_v58, %v4194_v37  ;;  %v329_v62 = vsel %vm325_vm1, %v318_v59, 0.0  ;;  %v4208_v63 = vpop.eup %4207 }
  0xca   :  { %v341_v0 = vsel %vm325_vm1, %v322_v60, 0.0  ;;  %v4210_v2 = vpop.eup %4209  ;;  %v323_v3 = vmul.f32 %v4208_v63, %v4194_v37 }
  0xcb   :  { %v335_v1 = vsel %vm325_vm1, %v320_v61, 0.0  ;;  %v324_v4 = vmul.f32 %v4210_v2, %v4194_v37 }
  0xcc   :  { %v344_v5 = vsel %vm325_vm1, %v323_v3, 0.0 }
  0xcd   :  { %v347_v6 = vsel %vm325_vm1, %v324_v4, 0.0 }
  0xce   :  { %330 = vadd.xlane.f32.xlu0 %v329_v62 }
  0xd0   :  { %342 = vadd.xlane.f32.xlu2 %v341_v0 }
  0xd1   :  { %336 = vadd.xlane.f32.xlu1 %v335_v1 }
  0xd6   :  { %345 = vadd.xlane.f32.xlu0 %v344_v5 }
  0xd9   :  { %348 = vadd.xlane.f32.xlu1 %v347_v6 }
  0xe8   :  { %457 = vperm.xlu2 %4190, %v452_v8  }
  0xea   :  { %443 = vperm.xlu0 %4188, %v438_v12  }
  0xf0   :  { %464 = vperm.xlu2 %4190, %v459_v9  }
  0xf2   :  { %450 = vperm.xlu1 %4189, %v445_v11   ;;  %492 = vperm.xlu0 %4188, %v487_v15  }
  0xfa   :  { %471 = vperm.xlu1 %4189, %v466_v13   ;;  %4193 = vset.pattern.permute.xlu0 %v4920_v51 }
 0x102   :  { %485 = vperm.xlu1 %4189, %v480_v19  }
 0x10a   :  { %4192 = vset.pattern.permute.xlu1 %v4920_v51 }
 0x139   :  { %v328_v14 = vpop.xlane.xlu0 %327 }
 0x13a   :  { %v351_v21 = vadd.f32 %v5040_v18, %v328_v14 }
 0x13b   :  { %v340_v16 = vpop.xlane.xlu2 %339 }
 0x13c   :  { %v334_v17 = vpop.xlane.xlu1 %333  ;;  %v369_v25 = vperm.slane %v351_v21, %v5043_v20  ;;  %v355_v26 = vadd.f32 %v5040_v18, %v340_v16 }
 0x13d   :  { %v353_v22 = vadd.f32 %v5040_v18, %v334_v17 }
 0x13e   :  { %v373_v36 = vperm.slane %v355_v26, %v5043_v20 }
 0x13f   :  { %v371_v30 = vperm.slane %v353_v22, %v5043_v20 }
 0x141   :  { %v331_v23 = vpop.xlane.xlu0 %330 }
 0x142   :  { %v352_v24 = vadd.f32 %v5040_v18, %v331_v23 }
 0x143   :  { %v343_v28 = vpop.xlane.xlu2 %342 }
 0x144   :  { %v370_v27 = vperm.slane %v352_v24, %v5043_v20  ;;  %v337_v29 = vpop.xlane.xlu1 %336  ;;  %v5055_v33 = vadd.f32 %v5040_v18, %v343_v28 }
 0x145   :  { %v354_v31 = vadd.f32 %v5040_v18, %v337_v29 }
 0x146   :  { %v378_v32 = vsel %vm377_vm2, %v370_v27, %v369_v25  ;;  %v374_v41 = vperm.slane %v5055_v33, %v5043_v20 }
 0x147   :  { %v372_v34 = vperm.slane %v354_v31, %v5043_v20  ;;  %v380_v35 = vsel %vm379_vm3, %v371_v30, %v378_v32 }
 0x149   :  { %v382_v37 = vsel %vm381_vm4, %v372_v34, %v380_v35  ;;  %v346_v38 = vpop.xlane.xlu0 %345 }
 0x14a   :  { %v357_v39 = vadd.f32 %v5040_v18, %v346_v38  ;;  %v384_v40 = vsel %vm383_vm5, %v373_v36, %v382_v37 }
 0x14b   :  { %v386_v45 = vsel %vm6857_vm6, %v374_v41, %v384_v40  ;;  %v5072_v52 = vpop.permute.xlu2 %457 }
 0x14c   :  { %v375_v42 = vperm.slane %v357_v39, %v5043_v20  ;;  %v349_v43 = vpop.xlane.xlu1 %348  ;;  %6894 = vst [vmem:[#allocation29_spill] sm:$0xff] %v5072_v52 }
 0x14d   :  { %v358_v44 = vadd.f32 %v5040_v18, %v349_v43 }
 0x14e   :  { %v388_v46 = vsel %vm6856_vm7, %v375_v42, %v386_v45 }
 0x14f   :  { %v376_v47 = vperm.slane %v358_v44, %v5043_v20 }
 0x151   :  { %v390_v48 = vsel %vm6855_vm8, %v376_v47, %v388_v46 }
 0x152   :  { %v393_v49 = vsel %vm6854_vm9, %v390_v48, -inf }
 0x153   :  { %394 = vmax.xlane.f32.xlu2 %v393_v49  ;;  %v5074_v53 = vpop.permute.xlu2 %464 }
 0x154   :  { %6895 = vst [vmem:[#allocation30_spill] sm:$0xff] %v5074_v53 }
 0x15c   :  { %v5078_v7 = vpop.permute.xlu0 %443 }
 0x15d   :  { %6897 = vst [vmem:[#allocation32_spill] sm:$0xff] %v5078_v7 }
 0x164   :  { %v5076_v6 = vpop.permute.xlu1 %450  ;;  %v5095_v27 = vpop.permute.xlu0 %492 }
 0x165   :  { %6896 = vst [vmem:[#allocation31_spill] sm:$0xff] %v5076_v6 }
 0x166   :  { %6899 = vst [vmem:[#allocation34_spill] sm:$0xff] %v5095_v27 }
 0x16b   :  { %478 = vperm.xlu2 %4190, %v473_v50  }
 0x173   :  { %4191 = vset.pattern.permute.xlu2 %v4920_v51 }
 0x1c6   :  { %v395_v54 = vpop.xlane.xlu2 %394 }
 0x1c7   :  { %v399_v55 = vperm.slane %v395_v54, 2  ;;  %v398_v56 = vperm.slane %v395_v54, 1  ;;  %v397_v57 = vperm.slane %v395_v54, 0  ;;  %v401_v58 = vperm.slane %v395_v54, 4 }
 0x1c8   :  { %v404_v59 = vperm.slane %v395_v54, 7  ;;  %v400_v63 = vperm.slane %v395_v54, 3  ;;  %v403_v11 = vperm.slane %v395_v54, 6  ;;  %v402_v13 = vperm.slane %v395_v54, 5 }
 0x1c9   :  { %v415_v60 = vsub.f32 %v353_v22, %v399_v55  ;;  %v414_v61 = vsub.f32 %v352_v24, %v398_v56  ;;  %v413_v62 = vsub.f32 %v351_v21, %v397_v57  ;;  %v417_v4 = vsub.f32 %v355_v26, %v401_v58  ;;  %v5092_v24 = vpop.permute.xlu1 %471 }
 0x1ca   :  { %v420_v3 = vsub.f32 %v358_v44, %v404_v59  ;;  %v416_v5 = vsub.f32 %v354_v31, %v400_v63  ;;  %v419_v17 = vsub.f32 %v357_v39, %v403_v11  ;;  %v418_v22 = vsub.f32 %v5055_v33, %v402_v13  ;;  %6898 = vst [vmem:[#allocation33_spill] sm:$0xff] %v5092_v24 }
 0x1cb   :  { %v425_v0 = vmul.f32 1.442695, %v415_v60  ;;  %v423_v1 = vmul.f32 1.442695, %v414_v61  ;;  %v421_v2 = vmul.f32 1.442695, %v413_v62 }
 0x1cc   :  { %v435_v8 = vmul.f32 1.442695, %v420_v3  ;;  %v429_v9 = vmul.f32 1.442695, %v417_v4  ;;  %v427_v12 = vmul.f32 1.442695, %v416_v5 }
 0x1cd   :  { %4211 = vpow2.f32 %v425_v0  ;;  %v433_v25 = vmul.f32 1.442695, %v419_v17  ;;  %v431_v28 = vmul.f32 1.442695, %v418_v22 }
 0x1ce   :  { %4213 = vpow2.f32 %v423_v1  ;;  %v5111_v37 = vpop.permute.xlu2 %478 }
 0x1cf   :  { %4215 = vpow2.f32 %v421_v2  ;;  %6901 = vst [vmem:[#allocation36_spill] sm:$0xff] %v5111_v37 }
 0x1d0   :  { %4217 = vpow2.f32 %v435_v8 }
 0x1d1   :  { %4219 = vpow2.f32 %v429_v9  ;;  %v5109_v35 = vpop.permute.xlu1 %485 }
 0x1d2   :  { %4221 = vpow2.f32 %v427_v12  ;;  %6900 = vst [vmem:[#allocation35_spill] sm:$0xff] %v5109_v35 }
 0x1d3   :  { %v4212_v14 = vpop.eup %4211  ;;  %4223 = vpow2.f32 %v433_v25 }
 0x1d4   :  { %v4214_v15 = vpop.eup %4213  ;;  %v5081_v16 = vmul.f32 %v4212_v14, %v5072_v52  ;;  %4225 = vpow2.f32 %v431_v28 }
 0x1d5   :  { %v4216_v19 = vpop.eup %4215  ;;  %v5084_v21 = vmul.f32 %v4214_v15, %v5076_v6 }
 0x1d6   :  { %525 = vperm.xlu0 %4193, %v5081_v16   ;;  %v5089_v23 = vmul.f32 %v4216_v19, %v5078_v7  ;;  %v4218_v26 = vpop.eup %4217 }
 0x1d7   :  { %522 = vperm.xlu1 %4192, %v5084_v21   ;;  %v4220_v29 = vpop.eup %4219  ;;  %v5098_v31 = vmul.f32 %v4218_v26, %v5095_v27 }
 0x1d8   :  { %519 = vperm.xlu2 %4191, %v5089_v23   ;;  %v4222_v30 = vpop.eup %4221  ;;  %v5101_v32 = vmul.f32 %v4220_v29, %v5092_v24 }
 0x1d9   :  { %v5104_v33 = vmul.f32 %v4222_v30, %v5074_v53  ;;  %v4224_v34 = vpop.eup %4223 }
 0x1da   :  { %v4226_v36 = vpop.eup %4225  ;;  %v5114_v38 = vmul.f32 %v4224_v34, %v5109_v35 }
 0x1db   :  { %v5117_v39 = vmul.f32 %v4226_v36, %v5111_v37 }
 0x1de   :  { %540 = vperm.xlu0 %4193, %v5098_v31  }
 0x1df   :  { %531 = vperm.xlu1 %4192, %v5101_v32  }
 0x1e0   :  { %528 = vperm.xlu2 %4191, %v5104_v33  }
 0x1e7   :  { %537 = vperm.xlu1 %4192, %v5114_v38  }
 0x1e8   :  { %534 = vperm.xlu2 %4191, %v5117_v39  }
 0x232   :  { %v520_v40 = vpop.permute.xlu2 %519 }
 0x233   :  { %v542_v45 = vperm.slane %v520_v40, %v5043_v20 }
 0x23a   :  { %v529_v42 = vpop.permute.xlu2 %528 }
 0x23b   :  { %v545_v51 = vperm.slane %v529_v42, %v5043_v20 }
 0x242   :  { %v535_v54 = vpop.permute.xlu2 %534 }
 0x243   :  { %v547_v58 = vperm.slane %v535_v54, %v5043_v20 }
 0x248   :  { %v526_v44 = vpop.permute.xlu0 %525 }
 0x249   :  { %v523_v41 = vpop.permute.xlu1 %522  ;;  %v544_v46 = vperm.slane %v526_v44, %v5043_v20 }
 0x24a   :  { %v543_v43 = vperm.slane %v523_v41, %v5043_v20 }
 0x24c   :  { %v550_v47 = vsel %vm377_vm2, %v543_v43, %v542_v45 }
 0x24d   :  { %v551_v49 = vsel %vm379_vm3, %v544_v46, %v550_v47 }
 0x24e   :  { %v552_v55 = vsel %vm381_vm4, %v545_v51, %v551_v49 }
 0x250   :  { %v541_v57 = vpop.permute.xlu0 %540 }
 0x251   :  { %v532_v48 = vpop.permute.xlu1 %531  ;;  %v549_v61 = vperm.slane %v541_v57, %v5043_v20 }
 0x252   :  { %v546_v50 = vperm.slane %v532_v48, %v5043_v20 }
 0x254   :  { %v553_v56 = vsel %vm383_vm5, %v546_v50, %v552_v55 }
 0x255   :  { %v554_v62 = vsel %vm6857_vm6, %v547_v58, %v553_v56 }
 0x259   :  { %v538_v59 = vpop.permute.xlu1 %537 }
 0x25a   :  { %v548_v60 = vperm.slane %v538_v59, %v5043_v20 }
 0x25c   :  { %v555_v63 = vsel %vm6856_vm7, %v548_v60, %v554_v62 }
 0x25d   :  { %v556_v0 = vsel %vm6855_vm8, %v549_v61, %v555_v63 }
 0x25e   :  { %v558_v1 = vsel %vm6854_vm9, %v556_v0, 0.0 }
 0x25f   :  { %559 = vadd.xlane.f32.xlu2 %v558_v1 }
 0x2d2   :  { %v560_v2 = vpop.xlane.xlu2 %559 }
 0x2d3   :  { %v562_v3 = vperm.slane %v560_v2, 0  ;;  %v563_v4 = vperm.slane %v560_v2, 1  ;;  %v5137_v5 = vperm.slane %v560_v2, 2  ;;  %v5139_v8 = vperm.slane %v560_v2, 3 }
 0x2d4   :  { %v5141_v9 = vperm.slane %v560_v2, 4  ;;  %v5143_v11 = vperm.slane %v560_v2, 5  ;;  %v5149_v17 = vperm.slane %v560_v2, 7  ;;  %v5151_v25 = vperm.slane %v560_v2, 6 }
 0x2d5   :  { %4227 = vrcp.f32 %v562_v3  ;;  %v602_v12 = vand.u32 2147483647, %v563_v4  ;;  %v604_v13 = vand.u32 2147483648, %v563_v4  ;;  %v587_v14 = vand.u32 2147483647, %v562_v3 }
 0x2d6   :  { %4229 = vrcp.f32 %v563_v4  ;;  %v589_v19 = vand.u32 2147483648, %v562_v3  ;;  %vm598_vm10 = vweird.f32 %v563_v4  ;;  %vm583_vm12 = vweird.f32 %v562_v3 }
 0x2d7   :  { %4231 = vrcp.f32 %v5137_v5  ;;  %vm5155_vm11 = vcmp.eq.f32.partialorder %v602_v12, 8.507059e+37  ;;  %v605_v36 = vor.u32 1.1754944e-38, %v604_v13  ;;  %vm5161_vm13 = vcmp.eq.f32.partialorder %v587_v14, 8.507059e+37 }
 0x2d8   :  { %4233 = vrcp.f32 %v5139_v8  ;;  %v590_v45 = vor.u32 1.1754944e-38, %v589_v19  ;;  %v634_v57 = vand.u32 2147483648, %v5139_v8  ;;  %v619_v59 = vand.u32 2147483648, %v5137_v5 }
 0x2d9   :  { %4235 = vrcp.f32 %v5141_v9  ;;  %v664_v41 = vand.u32 2147483648, %v5143_v11 }
 0x2da   :  { %4237 = vrcp.f32 %v5143_v11 }
 0x2db   :  { %v4228_v15 = vpop.eup %4227  ;;  %4239 = vrcp.f32 %v5149_v17 }
 0x2dc   :  { %v4230_v22 = vpop.eup %4229  ;;  %v579_v26 = vmul.f32 %v4228_v15, %v562_v3  ;;  %vm584_vm14 = vweird.f32 %v4228_v15  ;;  %4241 = vrcp.f32 %v5151_v25 }
 0x2dd   :  { %v5153_v28 = vpop.eup %4231  ;;  %v594_v29 = vmul.f32 %v4230_v22, %v563_v4  ;;  %vm599_vm15 = vweird.f32 %v4230_v22  ;;  %vm585_vm9 = vmor %vm583_vm12, %vm584_vm14  ;;  %vm643_vm14 = vweird.f32 %v5141_v9 }
 0x2de   :  { %v5159_v34 = vpop.eup %4233  ;;  %v580_v40 = vsub.f32 1.0, %v579_v26  ;;  %v609_v42 = vmul.f32 %v5153_v28, %v5137_v5  ;;  %vm614_vm8 = vweird.f32 %v5153_v28  ;;  %vm600_vm7 = vmor %vm598_vm10, %vm599_vm15  ;;  %vm628_vm10 = vweird.f32 %v5139_v8 }
 0x2df   :  { %v5167_v43 = vpop.eup %4235  ;;  %v595_v44 = vsub.f32 1.0, %v594_v29  ;;  %v624_v46 = vmul.f32 %v5159_v34, %v5139_v8  ;;  %vm629_vm6 = vweird.f32 %v5159_v34  ;;  %vm658_vm15 = vweird.f32 %v5143_v11 }
 0x2e0   :  { %v5172_v47 = vpop.eup %4237  ;;  %v581_v48 = vmul.f32 %v4228_v15, %v580_v40  ;;  %v610_v49 = vsub.f32 1.0, %v609_v42  ;;  %v639_v50 = vmul.f32 %v5167_v43, %v5141_v9  ;;  %vm630_vm12 = vmor %vm628_vm10, %vm629_vm6  ;;  %vm644_vm6 = vweird.f32 %v5167_v43 }
 0x2e1   :  { %v596_v51 = vmul.f32 %v4230_v22, %v595_v44  ;;  %v625_v54 = vsub.f32 1.0, %v624_v46  ;;  %v654_v55 = vmul.f32 %v5172_v47, %v5143_v11  ;;  %v5188_v1 = vpop.eup %4239 }
 0x2e2   :  { %v582_v56 = vadd.f32 %v4228_v15, %v581_v48  ;;  %v611_v58 = vmul.f32 %v5153_v28, %v610_v49  ;;  %v640_v0 = vsub.f32 1.0, %v639_v50  ;;  %v5207_v29 = vpop.eup %4241  ;;  %v647_v49 = vand.u32 2147483647, %v5141_v9 }
 0x2e3   :  { %v597_v60 = vadd.f32 %v4230_v22, %v596_v51  ;;  %v626_v61 = vmul.f32 %v5159_v34, %v625_v54  ;;  %v655_v13 = vsub.f32 1.0, %v654_v55  ;;  %v662_v54 = vand.u32 2147483647, %v5143_v11 }
 0x2e4   :  { %v586_v62 = vsel %vm585_vm9, %v4228_v15, %v582_v56  ;;  %v612_v63 = vadd.f32 %v5153_v28, %v611_v58  ;;  %vm613_vm9 = vweird.f32 %v5137_v5  ;;  %v617_v15 = vand.u32 2147483647, %v5137_v5 }
 0x2e5   :  { %v601_v2 = vsel %vm600_vm7, %v4230_v22, %v597_v60  ;;  %v591_v12 = vsel %vm5161_vm13, %v590_v45, %v586_v62  ;;  %v627_v3 = vadd.f32 %v5159_v34, %v626_v61  ;;  %v632_v22 = vand.u32 2147483647, %v5139_v8  ;;  %vm615_vm7 = vmor %vm613_vm9, %vm614_vm8 }
 0x2e6   :  { %v606_v14 = vsel %vm5155_vm11, %v605_v36, %v601_v2  ;;  %v592_v4 = vmul.f32 %v591_v12, %v5089_v23  ;;  %v616_v26 = vsel %vm615_vm7, %v5153_v28, %v612_v63  ;;  %v641_v23 = vmul.f32 %v5167_v43, %v640_v0  ;;  %vm645_vm9 = vmor %vm643_vm14, %vm644_vm6 }
 0x2e7   :  { %v607_v19 = vmul.f32 %v606_v14, %v5084_v21  ;;  %v631_v21 = vsel %vm630_vm12, %v5159_v34, %v627_v3  ;;  %v620_v5 = vor.u32 1.1754944e-38, %v619_v59  ;;  %v656_v30 = vmul.f32 %v5172_v47, %v655_v13 }
 0x2e8   :  { %700 = vperm.xlu1 %4192, %v592_v4   ;;  %v684_v8 = vmul.f32 %v5188_v1, %v5149_v17  ;;  %v635_v36 = vor.u32 1.1754944e-38, %v634_v57  ;;  %vm618_vm8 = vcmp.eq.f32.partialorder %v617_v15, 8.507059e+37  ;;  %vm633_vm11 = vcmp.eq.f32.partialorder %v632_v22, 8.507059e+37  ;;  %v197_v4 = vld [vmem:[#allocation16 + $0x8] sm:$0xff] }
 0x2e9   :  { %705 = vperm.xlu0 %4193, %v607_v19   ;;  %v621_v40 = vsel %vm618_vm8, %v620_v5, %v616_v26  ;;  %v642_v42 = vadd.f32 %v5167_v43, %v641_v23  ;;  %v669_v34 = vmul.f32 %v5207_v29, %v5151_v25  ;;  %v657_v44 = vadd.f32 %v5172_v47, %v656_v30  ;;  %v5249_v5 = vld [vmem:[#allocation11 + $0xa8] sm:$0xff]  ;;  %v5251_v30 = vld [vmem:[#allocation11 + $0x90] sm:$0xff] }
 0x2ea   :  { %v636_v28 = vsel %vm633_vm11, %v635_v36, %v631_v21  ;;  %vm659_vm13 = vweird.f32 %v5172_v47  ;;  %v649_v45 = vand.u32 2147483648, %v5141_v9  ;;  %v685_v46 = vsub.f32 1.0, %v684_v8  ;;  %v198_v21 = vld [vmem:[#allocation16 + $0x10] sm:$0xff]  ;;  %222 = vmatpush.msra.mxu0 %v5249_v5  ;;  %v5256_v36 = vld [vmem:[#allocation13 + $0x20] sm:$0xff] }
 0x2eb   :  { %v622_v48 = vmul.f32 %v621_v40, %v5081_v16  ;;  %v670_v50 = vsub.f32 1.0, %v669_v34  ;;  %v637_v51 = vmul.f32 %v636_v28, %v5104_v33  ;;  %vm660_vm10 = vmor %vm658_vm15, %vm659_vm13  ;;  %v646_v55 = vsel %vm645_vm9, %v5167_v43, %v642_v42  ;;  %v5254_v8 = vld [vmem:[#allocation13 + $0x30] sm:$0xff] }
 0x2ec   :  { %v661_v16 = vsel %vm660_vm10, %v5172_v47, %v657_v44  ;;  %v650_v57 = vor.u32 1.1754944e-38, %v649_v45  ;;  %v686_v9 = vmul.f32 %v5188_v1, %v685_v46  ;;  %v665_v58 = vor.u32 1.1754944e-38, %v664_v41  ;;  %v5258_v41 = vld [vmem:[#allocation11 + $0x78] sm:$0xff]  ;;  %835 = vmatpush.msra.mxu3 %v5254_v8  ;;  %v5261_v28 = vld [vmem:[#allocation11 + $0xb0] sm:$0xff]  ;;  %223 = vmatpush.msra.mxu0 %v5251_v30 }
 0x2ed   :  { %v671_v56 = vmul.f32 %v5207_v29, %v670_v50  ;;  %vm648_vm7 = vcmp.eq.f32.partialorder %v647_v49, 8.507059e+37  ;;  %vm663_vm12 = vcmp.eq.f32.partialorder %v662_v54, 8.507059e+37  ;;  %vm674_vm8 = vweird.f32 %v5207_v29  ;;  %242 = vmatpush.msra.mxu1 %v5261_v28  ;;  %v5265_v44 = vld [vmem:[#allocation13 + $0x10] sm:$0xff]  ;;  %v5267_v45 = vld [vmem:[#allocation11 + $0x98] sm:$0xff]  ;;  %v5269_v49 = vld [vmem:[#allocation11 + $0x60] sm:$0xff] }
 0x2ee   :  { %v651_v33 = vsel %vm648_vm7, %v650_v57, %v646_v55  ;;  %v666_v59 = vsel %vm663_vm12, %v665_v58, %v661_v16  ;;  %v687_v60 = vadd.f32 %v5188_v1, %v686_v9  ;;  %vm689_vm11 = vweird.f32 %v5188_v1  ;;  %836 = vmatpush.msra.mxu3 %v5256_v36  ;;  %v5272_v50 = vld [vmem:[#allocation11 + $0x80] sm:$0xff]  ;;  %224 = vmatpush.msra.mxu0 %v5258_v41  ;;  %v5280_v57 = vld [vmem:[#allocation11 + $0x48] sm:$0xff]  ;;  %v5283_v9 = vld [vmem:[#allocation13 + $0x38] sm:$0xff] }
 0x2ef   :  { %v672_v11 = vadd.f32 %v5207_v29, %v671_v56  ;;  %v679_v43 = vand.u32 2147483648, %v5151_v25  ;;  %v652_v47 = vmul.f32 %v651_v33, %v5101_v32  ;;  %v694_v61 = vand.u32 2147483648, %v5149_v17  ;;  %243 = vmatpush.msra.mxu1 %v5267_v45  ;;  %v5277_v55 = vld [vmem:[#allocation13] sm:$0xff]  ;;  %v5287_v33 = vld [vmem:[#allocation11 + $0x68] sm:$0xff] }
 0x2f0   :  { %710 = vperm.xlu1 %4192, %v622_v48   ;;  %vm673_vm6 = vweird.f32 %v5151_v25  ;;  %v677_v62 = vand.u32 2147483647, %v5151_v25  ;;  %v667_v63 = vmul.f32 %v666_v59, %v5117_v39  ;;  %vm688_vm13 = vweird.f32 %v5149_v17  ;;  %837 = vmatpush.msra.mxu3 %v5265_v44 }
 0x2f1   :  { %715 = vperm.xlu0 %4193, %v637_v51   ;;  %v692_v0 = vand.u32 2147483647, %v5149_v17  ;;  %vm675_vm14 = vmor %vm673_vm6, %vm674_vm8  ;;  %v680_v12 = vor.u32 1.1754944e-38, %v679_v43  ;;  %v695_v3 = vor.u32 1.1754944e-38, %v694_v61  ;;  %v196_v17 = vld [vmem:[#allocation16] sm:$0xff]  ;;  %225 = vmatpush.msra.mxu0 %v5269_v49  ;;  %v5289_v43 = vld [vmem:[#allocation11 + $0x30] sm:$0xff] }
 0x2f2   :  { %vm690_vm15 = vmor %vm688_vm13, %vm689_vm11  ;;  %v676_v2 = vsel %vm675_vm14, %v5207_v29, %v672_v11  ;;  %vm678_vm9 = vcmp.eq.f32.partialorder %v677_v62, 8.507059e+37  ;;  %244 = vmatpush.msra.mxu1 %v5272_v50  ;;  %838 = vmatpush.msra.mxu3 %v5277_v55  ;;  %vm6906_vm7 = vcmask 1045509   ;;  %vm6907_vm12 = vcmask 1046534  }
 0x2f3   :  { %v691_v32 = vsel %vm690_vm15, %v5188_v1, %v687_v60  ;;  %vm693_vm10 = vcmp.eq.f32.partialorder %v692_v0, 8.507059e+37  ;;  %v681_v13 = vsel %vm678_vm9, %v680_v12, %v676_v2  ;;  %v200_v60 = vld [vmem:[#allocation16 + $0x20] sm:$0xff]  ;;  %226 = vmatpush.msra.mxu0 %v5280_v57  ;;  %v5296_v0 = vld [vmem:[#allocation11 + $0x50] sm:$0xff]  ;;  %v5298_v12 = vld [vmem:[#allocation11 + $0x18] sm:$0xff]  ;;  %vm6908_vm8 = vcmask 1047559  }
 0x2f4   :  { %v696_v25 = vsel %vm693_vm10, %v695_v3, %v691_v32  ;;  %v682_v39 = vmul.f32 %v681_v13, %v5114_v38  ;;  %855 = vmatpush.msrb.mxu3 %v5283_v9  ;;  %245 = vmatpush.msra.mxu1 %v5287_v33  ;;  %v5301_v3 = vld [vmem:[#allocation13 + $0x18] sm:$0xff] }
 0x2f5   :  { %v697_v14 = vmul.f32 %v696_v25, %v5098_v31  ;;  %v199_v31 = vld [vmem:[#allocation16 + $0x18] sm:$0xff]  ;;  %227 = vmatpush.msra.mxu0 %v5289_v43 }
 0x2f6   :  { %246 = vmatpush.msra.mxu1 %v5296_v0 }
 0x2f7   :  { %228 = vmatpush.msra.mxu0 %v5298_v12 }
 0x2f8   :  { %720 = vperm.xlu1 %4192, %v652_v47   ;;  %v5292_v47 = vld [vmem:[#allocation13 + $0x28] sm:$0xff] }
 0x2f9   :  { %725 = vperm.xlu0 %4193, %v667_v63   ;;  %v201_v63 = vld [vmem:[#allocation16 + $0x28] sm:$0xff]  ;;  %856 = vmatpush.msrb.mxu3 %v5292_v47 }
 0x2fb   :  { %857 = vmatpush.msrb.mxu3 %v5301_v3 }
 0x300   :  { %730 = vperm.xlu1 %4192, %v682_v39   ;;  %v5305_v39 = vld [vmem:[#allocation11 + $0x38] sm:$0xff] }
 0x301   :  { %735 = vperm.xlu0 %4193, %v697_v14   ;;  %247 = vmatpush.msra.mxu1 %v5305_v39 }
 0x35a   :  { %v701_v15 = vpop.permute.xlu1 %700 }
 0x35b   :  { %v706_v19 = vpop.permute.xlu0 %705  ;;  %v738_v22 = vmul.f32 %v701_v15, %v196_v17  ;;  %v5310_v15 = vld [vmem:[#allocation13 + $0x8] sm:$0xff] }
 0x35c   :  { %v739_v26 = vmul.f32 %v706_v19, %v197_v4  ;;  %v5307_v4 = vld [vmem:[#allocation11] sm:$0xff]  ;;  %v154_v19 = vld [vmem:[#allocation10] sm:$0xff]  ;;  %858 = vmatpush.msrb.mxu3 %v5310_v15 }
 0x35d   :  { %v746_v1 = vsel %vm325_vm1, %v738_v22, 0.0  ;;  %155 = vst.msk [vmem:[#allocation3] sm:$0xff] %vm152_vm0, %v154_v19  ;;  %229 = vmatpush.msra.mxu0 %v5307_v4 }
 0x35e   :  { %v753_v23 = vsel %vm325_vm1, %v739_v26, 0.0  ;;  %v747_v29 = vrot.slane %v746_v1, 4  ;;  %4126 = vmatmul.msk.f32.vlgmr.msra.gmra.mxu0 %vm152_vm0, %v5021_v10 }
 0x35f   :  { %v754_v38 = vrot.slane %v753_v23, 4  ;;  %932 = vmatpush.msrb.mxu0 %v5249_v5 }
 0x360   :  { %v748_v46 = vadd.f32 %v747_v29, %v746_v1 }
 0x361   :  { %v755_v51 = vadd.f32 %v754_v38, %v753_v23  ;;  %v5315_v23 = vld [vmem:[#allocation11 + $0x20] sm:$0xff]  ;;  %933 = vmatpush.msrb.mxu0 %v5251_v30 }
 0x362   :  { %v711_v40 = vpop.permute.xlu1 %710  ;;  %v749_v59 = vrot.slane %v748_v46, 2  ;;  %248 = vmatpush.msra.mxu1 %v5315_v23 }
 0x363   :  { %v716_v42 = vpop.permute.xlu0 %715  ;;  %v740_v34 = vmul.f32 %v711_v40, %v198_v21  ;;  %v756_v61 = vrot.slane %v755_v51, 2  ;;  %v5322_v40 = vld [vmem:[#allocation11 + $0x8] sm:$0xff]  ;;  %934 = vmatpush.msrb.mxu0 %v5258_v41 }
 0x364   :  { %v741_v48 = vmul.f32 %v716_v42, %v199_v31  ;;  %v750_v14 = vadd.f32 %v749_v59, %v748_v46  ;;  %v202_v46 = vld [vmem:[#allocation16 + $0x30] sm:$0xff]  ;;  %249 = vmatpush.msra.mxu1 %v5322_v40 }
 0x365   :  { %v760_v54 = vsel %vm325_vm1, %v740_v34, 0.0  ;;  %v757_v22 = vadd.f32 %v756_v61, %v755_v51  ;;  %4127 = vmatmul.msk.f32.vlgmr.msra.gmra.mxu1 %vm152_vm0, %v5021_v10  ;;  %935 = vmatpush.msrb.mxu0 %v5269_v49 }
 0x366   :  { %v767_v56 = vsel %vm325_vm1, %v741_v48, 0.0  ;;  %v761_v16 = vrot.slane %v760_v54, 4  ;;  %v751_v42 = vrot.slane %v750_v14, 1  ;;  %952 = vmatpush.msrb.mxu1 %v5261_v28 }
 0x367   :  { %v768_v58 = vrot.slane %v767_v56, 4  ;;  %v758_v48 = vrot.slane %v757_v22, 1  ;;  %936 = vmatpush.msrb.mxu0 %v5280_v57 }
 0x368   :  { %v762_v11 = vadd.f32 %v761_v16, %v760_v54  ;;  %953 = vmatpush.msrb.mxu1 %v5267_v45 }
 0x369   :  { %v769_v62 = vadd.f32 %v768_v58, %v767_v56  ;;  %v203_v56 = vld [vmem:[#allocation16 + $0x38] sm:$0xff]  ;;  %937 = vmatpush.msrb.mxu0 %v5289_v43 }
 0x36a   :  { %v763_v2 = vrot.slane %v762_v11, 2  ;;  %v721_v32 = vpop.permute.xlu1 %720  ;;  %954 = vmatpush.msrb.mxu1 %v5272_v50 }
 0x36b   :  { %v726_v13 = vpop.permute.xlu0 %725  ;;  %v742_v25 = vmul.f32 %v721_v32, %v200_v60  ;;  %v770_v26 = vrot.slane %v769_v62, 2  ;;  %v209_v32 = vld [vmem:[#allocation3] sm:$0xff]  ;;  %938 = vmatpush.msrb.mxu0 %v5298_v12 }
 0x36c   :  { %v743_v17 = vmul.f32 %v726_v13, %v201_v63  ;;  %v764_v29 = vadd.f32 %v763_v2, %v762_v11  ;;  %v752_v63 = vadd.f32 %v751_v42, %v750_v14  ;;  %v759_v13 = vadd.f32 %v758_v48, %v757_v22  ;;  %905 = vrot.lane.b32.xlu1 %v209_v32, %s4921_s7 }
 0x36d   :  { %v774_v1 = vsel %vm325_vm1, %v742_v25, 0.0  ;;  %v771_v51 = vadd.f32 %v770_v26, %v769_v62  ;;  %955 = vmatpush.msrb.mxu1 %v5287_v33  ;;  %939 = vmatpush.msrb.mxu0 %v5307_v4 }
 0x36e   :  { %v781_v21 = vsel %vm325_vm1, %v743_v17, 0.0  ;;  %v775_v38 = vrot.slane %v774_v1, 4  ;;  %v765_v16 = vrot.slane %v764_v29, 1 }
 0x36f   :  { %v782_v31 = vrot.slane %v781_v21, 4  ;;  %v772_v25 = vrot.slane %v771_v51, 1  ;;  %956 = vmatpush.msrb.mxu1 %v5296_v0  ;;  %1560 = vmatpush.msra.mxu0 %v5249_v5 }
 0x370   :  { %v776_v34 = vadd.f32 %v775_v38, %v774_v1  ;;  %v766_v26 = vadd.f32 %v765_v16, %v764_v29  ;;  %v814_v38 = vsel %vm377_vm2, %v759_v13, %v752_v63 }
 0x371   :  { %v783_v54 = vadd.f32 %v782_v31, %v781_v21  ;;  %v773_v31 = vadd.f32 %v772_v25, %v771_v51  ;;  %957 = vmatpush.msrb.mxu1 %v5305_v39  ;;  %1561 = vmatpush.msra.mxu0 %v5251_v30 }
 0x372   :  { %v777_v58 = vrot.slane %v776_v34, 2  ;;  %v731_v59 = vpop.permute.xlu1 %730  ;;  %v815_v48 = vsel %vm379_vm3, %v766_v26, %v814_v38  ;;  %v803_v26 = vld [vmem:[#allocation5 + $0x8] sm:$0xff] }
 0x373   :  { %v784_v11 = vrot.slane %v783_v54, 2  ;;  %v736_v60 = vpop.permute.xlu0 %735  ;;  %v744_v61 = vmul.f32 %v731_v59, %v202_v46  ;;  %v816_v51 = vsel %vm381_vm4, %v773_v31, %v815_v48  ;;  %958 = vmatpush.msrb.mxu1 %v5315_v23  ;;  %1562 = vmatpush.msra.mxu0 %v5258_v41 }
 0x374   :  { %v778_v2 = vadd.f32 %v777_v58, %v776_v34  ;;  %v745_v62 = vmul.f32 %v736_v60, %v203_v56 }
 0x375   :  { %v785_v17 = vadd.f32 %v784_v11, %v783_v54  ;;  %v788_v19 = vsel %vm325_vm1, %v744_v61, 0.0  ;;  %959 = vmatpush.msrb.mxu1 %v5322_v40  ;;  %1563 = vmatpush.msra.mxu0 %v5269_v49 }
 0x376   :  { %v779_v10 = vrot.slane %v778_v2, 1  ;;  %v795_v1 = vsel %vm325_vm1, %v745_v62, 0.0  ;;  %v789_v14 = vrot.slane %v788_v19, 4 }
 0x377   :  { %v796_v21 = vrot.slane %v795_v1, 4  ;;  %v786_v42 = vrot.slane %v785_v17, 1  ;;  %1580 = vmatpush.msra.mxu1 %v5261_v28  ;;  %1564 = vmatpush.msra.mxu0 %v5280_v57 }
 0x378   :  { %v790_v22 = vadd.f32 %v789_v14, %v788_v19  ;;  %v780_v29 = vadd.f32 %v779_v10, %v778_v2 }
 0x379   :  { %v797_v34 = vadd.f32 %v796_v21, %v795_v1  ;;  %v787_v16 = vadd.f32 %v786_v42, %v785_v17  ;;  %1581 = vmatpush.msra.mxu1 %v5267_v45  ;;  %1565 = vmatpush.msra.mxu0 %v5289_v43 }
 0x37a   :  { %v791_v46 = vrot.slane %v790_v22, 2  ;;  %v817_v11 = vsel %vm383_vm5, %v780_v29, %v816_v51 }
 0x37b   :  { %v798_v54 = vrot.slane %v797_v34, 2  ;;  %v818_v2 = vsel %vm6906_vm7, %v787_v16, %v817_v11  ;;  %1582 = vmatpush.msra.mxu1 %v5272_v50  ;;  %1566 = vmatpush.msra.mxu0 %v5298_v12 }
 0x37c   :  { %v792_v56 = vadd.f32 %v791_v46, %v790_v22 }
 0x37d   :  { %v799_v58 = vadd.f32 %v798_v54, %v797_v34  ;;  %1583 = vmatpush.msra.mxu1 %v5287_v33  ;;  %1567 = vmatpush.msra.mxu0 %v5307_v4 }
 0x37e   :  { %v793_v59 = vrot.slane %v792_v56, 1 }
 0x37f   :  { %v800_v60 = vrot.slane %v799_v58, 1  ;;  %1584 = vmatpush.msra.mxu1 %v5296_v0 }
 0x380   :  { %v794_v61 = vadd.f32 %v793_v59, %v792_v56 }
 0x381   :  { %v801_v63 = vadd.f32 %v800_v60, %v799_v58  ;;  %1585 = vmatpush.msra.mxu1 %v5305_v39 }
 0x382   :  { %v819_v62 = vsel %vm6907_vm12, %v794_v61, %v818_v2  ;;  %vm6909_vm12 = vcmask 1045509  }
 0x383   :  { %v820_v32 = vsel %vm6908_vm8, %v801_v63, %v819_v62  ;;  %1586 = vmatpush.msra.mxu1 %v5315_v23  ;;  %vm6910_vm8 = vcmask 1046534  }
 0x384   :  { %4129 = vmatmul.msk.f32.vlgmr.msra.gmra.mxu3 %vm325_vm1, %v820_v32 }
 0x385   :  { %1466 = vmatpush.msra.mxu3 %v5254_v8  ;;  %1587 = vmatpush.msra.mxu1 %v5322_v40 }
 0x387   :  { %1467 = vmatpush.msra.mxu3 %v5256_v36  ;;  %v802_v36 = vld [vmem:[#allocation5] sm:$0xff] }
 0x389   :  { %1468 = vmatpush.msra.mxu3 %v5265_v44 }
 0x38b   :  { %1469 = vmatpush.msra.mxu3 %v5277_v55 }
 0x38c   :  { %4130 = vmatmul.msk.f32.vlgmr.msrb.gmra.mxu3 %vm325_vm1, %v820_v32 }
 0x38d   :  { %1486 = vmatpush.msrb.mxu3 %v5283_v9 }
 0x38f   :  { %1487 = vmatpush.msrb.mxu3 %v5292_v47 }
 0x391   :  { %1488 = vmatpush.msrb.mxu3 %v5301_v3 }
 0x393   :  { %1489 = vmatpush.msrb.mxu3 %v5310_v15 }
 0x3db   :  { %v231_v8 = vpop.f32.mrf.mxu0 }
 0x3dc   :  { %v804_v44 = vadd.f32 %v802_v36, %v231_v8 }
 0x3de   :  { %v906_v11 = vpop.permute.xlu1 %905 }
 0x3e2   :  { %v251_v19 = vpop.f32.mrf.mxu1 }
 0x3e3   :  { %v805_v47 = vadd.f32 %v803_v26, %v251_v19  ;;  %v5398_v19 = vld [vmem:[#allocation11 + $0xa0] sm:$0xff]  ;;  %v5403_v26 = vld [vmem:[#allocation11 + $0x88] sm:$0xff] }
 0x407   :  { %v840_v55 = vpop.f32.mrf.mxu3 }
 0x408   :  { %v863_v13 = vadd.f32 %v840_v55, %v804_v44 }
 0x40a   :  { %v4131_v9 = vmul.f32 -1.442695, %v863_v13 }
 0x40c   :  { %4243 = vpow2.f32 %v4131_v9 }
 0x40f   :  { %v860_v10 = vpop.f32.mrf.mxu3 }
 0x410   :  { %v864_v3 = vadd.f32 %v860_v10, %v805_v47 }
 0x412   :  { %v4244_v25 = vpop.eup %4243  ;;  %v4132_v54 = vmul.f32 -1.442695, %v864_v3 }
 0x413   :  { %v871_v17 = vadd.f32 1.0, %v4244_v25 }
 0x415   :  { %4245 = vrcp.f32 %v871_v17  ;;  %v884_v15 = vand.u32 2147483648, %v871_v17  ;;  %v882_v38 = vand.u32 2147483647, %v871_v17  ;;  %vm878_vm6 = vweird.f32 %v871_v17 }
 0x416   :  { %4247 = vtanh.f32 %v864_v3 }
 0x417   :  { %v885_v42 = vor.u32 1.1754944e-38, %v884_v15  ;;  %vm883_vm14 = vcmp.eq.f32.partialorder %v882_v38, 8.507059e+37  ;;  %4249 = vpow2.f32 %v4132_v54  ;;  %v5446_v38 = vld [vmem:[%s6849_s8] ss:$0 sm:$0xff] }
 0x41b   :  { %v4246_v1 = vpop.eup %4245 }
 0x41c   :  { %v874_v14 = vmul.f32 %v4246_v1, %v871_v17  ;;  %vm879_vm11 = vweird.f32 %v4246_v1  ;;  %v4248_v29 = vpop.eup %4247  ;;  %v5393_v17 = vld [vmem:[#allocation11 + $0xb8] sm:$0xff] }
 0x41d   :  { %vm880_vm13 = vmor %vm878_vm6, %vm879_vm11  ;;  %v4250_v56 = vpop.eup %4249  ;;  %vm6911_vm11 = vcmask 1047559   ;;  %vm6912_vm6 = vcmask 64512  }
 0x41e   :  { %v875_v21 = vsub.f32 1.0, %v874_v14  ;;  %v872_v16 = vadd.f32 1.0, %v4250_v56  ;;  %v5440_v14 = vld [vmem:[#allocation14 + $0x18] sm:$0xff] }
 0x420   :  { %v876_v22 = vmul.f32 %v4246_v1, %v875_v21  ;;  %4251 = vrcp.f32 %v872_v16  ;;  %v899_v32 = vand.u32 2147483648, %v872_v16  ;;  %vm893_vm9 = vweird.f32 %v872_v16 }
 0x421   :  { %v897_v8 = vand.u32 2147483647, %v872_v16 }
 0x422   :  { %v877_v31 = vadd.f32 %v4246_v1, %v876_v22  ;;  %v900_v44 = vor.u32 1.1754944e-38, %v899_v32 }
 0x423   :  { %vm898_vm7 = vcmp.eq.f32.partialorder %v897_v8, 8.507059e+37 }
 0x424   :  { %v881_v34 = vsel %vm880_vm13, %v4246_v1, %v877_v31  ;;  %v5437_v1 = vld [vmem:[#allocation14 + $0x8] sm:$0xff]  ;;  %vm6913_vm13 = vmmov %vm6909_vm12 }
 0x425   :  { %v886_v46 = vsel %vm883_vm14, %v885_v42, %v881_v34  ;;  %v5449_v34 = vld [vmem:[#allocation14 + $0x20] sm:$0xff]  ;;  %vm6914_vm14 = vmmov %vm6910_vm8 }
 0x426   :  { %v909_v48 = vmul.f32 %v4248_v29, %v886_v46  ;;  %v4252_v58 = vpop.eup %4251  ;;  %v908_v61 = vmul.f32 %v906_v11, %v886_v46 }
 0x427   :  { %v889_v51 = vmul.f32 %v4252_v58, %v872_v16  ;;  %vm894_vm15 = vweird.f32 %v4252_v58 }
 0x428   :  { %911 = vrot.lane.b32.xlu0 %v909_v48, %s4921_s7  ;;  %vm895_vm10 = vmor %vm893_vm9, %vm894_vm15 }
 0x429   :  { %v890_v59 = vsub.f32 1.0, %v889_v51  ;;  %vm6915_vm15 = vmmov %vm6911_vm11 }
 0x42a   :  { %vm6916_vm9 = vmmov %vm6912_vm6 }
 0x42b   :  { %v891_v60 = vmul.f32 %v4252_v58, %v890_v59 }
 0x42d   :  { %v892_v62 = vadd.f32 %v4252_v58, %v891_v60 }
 0x42f   :  { %v896_v36 = vsel %vm895_vm10, %v4252_v58, %v892_v62 }
 0x430   :  { %v901_v13 = vsel %vm898_vm7, %v900_v44, %v896_v36 }
 0x49a   :  { %v912_v63 = vpop.permute.xlu0 %911 }
 0x49b   :  { %v5383_v2 = vadd.f32 %v912_v63, %v908_v61  ;;  %v5458_v61 = vld [vmem:[#allocation14 + $0x28] sm:$0xff] }
 0x49d   :  { %4253 = vtanh.f32 %v5383_v2 }
 0x4a3   :  { %v4254_v55 = vpop.eup %4253 }
 0x4a4   :  { %v916_v9 = vmul.f32 %v4254_v55, %v901_v13  ;;  %v5463_v55 = vld [vmem:[#allocation14 + $0x30] sm:$0xff] }
 0x4a6   :  { %918 = vrot.lane.b32.xlu1 %v916_v9, %s4921_s7 }
 0x518   :  { %v919_v25 = vpop.permute.xlu1 %918 }
 0x519   :  { %921 = vst.msk [vmem:[#allocation17] sm:$0xff] %vm152_vm0, %v919_v25  ;;  %4133 = vmatmul.msk.f32.vlgmr.msrb.gmra.mxu0 %vm152_vm0, %v919_v25  ;;  %4134 = vmatmul.msk.f32.vlgmr.msrb.gmra.mxu1 %vm152_vm0, %v919_v25 }
 0x51a   :  { %4135 = vmatmul.msk.f32.vlgmr.msrb.gmra.mxu2 %vm152_vm0, %v919_v25  ;;  %2188 = vmatpush.msrb.mxu0 %v5249_v5  ;;  %v5408_v5 = vld [vmem:[#allocation11 + $0x70] sm:$0xff] }
 0x51b   :  { %2208 = vmatpush.msrb.mxu1 %v5261_v28  ;;  %2228 = vmatpush.msrb.mxu2 %v5393_v17  ;;  %v5423_v28 = vld [vmem:[#allocation11 + $0x28] sm:$0xff] }
 0x51c   :  { %2189 = vmatpush.msrb.mxu0 %v5251_v30  ;;  %v5413_v30 = vld [vmem:[#allocation11 + $0x58] sm:$0xff] }
 0x51d   :  { %2209 = vmatpush.msrb.mxu1 %v5267_v45  ;;  %2229 = vmatpush.msrb.mxu2 %v5398_v19  ;;  %v5428_v45 = vld [vmem:[#allocation11 + $0x10] sm:$0xff] }
 0x51e   :  { %2190 = vmatpush.msrb.mxu0 %v5258_v41  ;;  %v5418_v41 = vld [vmem:[#allocation11 + $0x40] sm:$0xff] }
 0x51f   :  { %2210 = vmatpush.msrb.mxu1 %v5272_v50  ;;  %2230 = vmatpush.msrb.mxu2 %v5403_v26 }
 0x520   :  { %2191 = vmatpush.msrb.mxu0 %v5269_v49 }
 0x521   :  { %2211 = vmatpush.msrb.mxu1 %v5287_v33  ;;  %2231 = vmatpush.msrb.mxu2 %v5408_v5 }
 0x522   :  { %2192 = vmatpush.msrb.mxu0 %v5280_v57 }
 0x523   :  { %2212 = vmatpush.msrb.mxu1 %v5296_v0  ;;  %2232 = vmatpush.msrb.mxu2 %v5413_v30  ;;  %v5431_v0 = vld [vmem:[#allocation14] sm:$0xff] }
 0x524   :  { %2193 = vmatpush.msrb.mxu0 %v5289_v43 }
 0x525   :  { %2213 = vmatpush.msrb.mxu1 %v5305_v39  ;;  %2233 = vmatpush.msrb.mxu2 %v5418_v41 }
 0x526   :  { %2194 = vmatpush.msrb.mxu0 %v5298_v12 }
 0x527   :  { %2214 = vmatpush.msrb.mxu1 %v5315_v23  ;;  %2234 = vmatpush.msrb.mxu2 %v5423_v28 }
 0x528   :  { %2195 = vmatpush.msrb.mxu0 %v5307_v4  ;;  %v5434_v4 = vld [vmem:[#allocation14 + $0x10] sm:$0xff] }
 0x529   :  { %2215 = vmatpush.msrb.mxu1 %v5322_v40  ;;  %2235 = vmatpush.msrb.mxu2 %v5428_v45 }
 0x59d   :  { %v981_v49 = vpop.f32.mrf.mxu2 }
 0x59e   :  { %v992_v50 = vperm.slane %v981_v49, 0  ;;  %v986_v57 = vrot.slane %v981_v49, 2  ;;  %v985_v33 = vrot.slane %v981_v49, 1  ;;  %v987_v43 = vrot.slane %v981_v49, 3 }
 0x59f   :  { %v988_v10 = vrot.slane %v981_v49, 4  ;;  %v989_v46 = vrot.slane %v981_v49, 5  ;;  %v990_v62 = vrot.slane %v981_v49, 6  ;;  %v991_v9 = vrot.slane %v981_v49, 7 }
 0x5a0   :  { %v1008_v12 = vadd.f32 %v5431_v0, %v992_v50  ;;  %v994_v39 = vperm.slane %v986_v57, 0  ;;  %v993_v23 = vperm.slane %v985_v33, 0  ;;  %v995_v47 = vperm.slane %v987_v43, 0  ;;  %v5468_v43 = vld [vmem:[#allocation14 + $0x38] sm:$0xff] }
 0x5a1   :  { %v996_v15 = vperm.slane %v988_v10, 0  ;;  %v997_v11 = vperm.slane %v989_v46, 0  ;;  %v998_v36 = vperm.slane %v990_v62, 0  ;;  %v999_v57 = vperm.slane %v991_v9, 0 }
 0x5a2   :  { %4255 = vtanh.f32 %v1008_v12  ;;  %v1010_v40 = vadd.f32 %v5434_v4, %v994_v39  ;;  %v1009_v3 = vadd.f32 %v5437_v1, %v993_v23  ;;  %v1011_v21 = vadd.f32 %v5440_v14, %v995_v47 }
 0x5a3   :  { %v1012_v29 = vadd.f32 %v5449_v34, %v996_v15  ;;  %v1013_v63 = vadd.f32 %v5458_v61, %v997_v11  ;;  %v1014_v13 = vadd.f32 %v5463_v55, %v998_v36  ;;  %v1015_v12 = vadd.f32 %v5468_v43, %v999_v57 }
 0x5a4   :  { %4257 = vtanh.f32 %v1010_v40 }
 0x5a5   :  { %4259 = vtanh.f32 %v1009_v3 }
 0x5a6   :  { %4261 = vtanh.f32 %v1011_v21 }
 0x5a7   :  { %4263 = vtanh.f32 %v1012_v29 }
 0x5a8   :  { %v4256_v22 = vpop.eup %4255  ;;  %4265 = vtanh.f32 %v1013_v63 }
 0x5a9   :  { %v1024_v31 = vmul.f32 %v5446_v38, %v4256_v22  ;;  %4267 = vtanh.f32 %v1014_v13 }
 0x5aa   :  { %v4258_v42 = vpop.eup %4257  ;;  %4269 = vtanh.f32 %v1015_v12 }
 0x5ab   :  { %v4260_v48 = vpop.eup %4259  ;;  %v1032_v54 = vsel %vm325_vm1, %v1024_v31, 0.0  ;;  %v1026_v56 = vmul.f32 %v5446_v38, %v4258_v42 }
 0x5ac   :  { %v4262_v16 = vpop.eup %4261  ;;  %1033 = vadd.xlane.f32.xlu2 %v1032_v54  ;;  %v1025_v58 = vmul.f32 %v5446_v38, %v4260_v48 }
 0x5ad   :  { %v1038_v51 = vsel %vm325_vm1, %v1026_v56, 0.0  ;;  %v1027_v60 = vmul.f32 %v5446_v38, %v4262_v16  ;;  %v4264_v8 = vpop.eup %4263 }
 0x5ae   :  { %1039 = vadd.xlane.f32.xlu1 %v1038_v51  ;;  %v1035_v59 = vsel %vm325_vm1, %v1025_v58, 0.0  ;;  %v1028_v44 = vmul.f32 %v5446_v38, %v4264_v8  ;;  %v4266_v50 = vpop.eup %4265 }
 0x5af   :  { %1036 = vadd.xlane.f32.xlu0 %v1035_v59  ;;  %v1041_v32 = vsel %vm325_vm1, %v1027_v60, 0.0  ;;  %v1029_v33 = vmul.f32 %v5446_v38, %v4266_v50  ;;  %v4268_v23 = vpop.eup %4267 }
 0x5b0   :  { %v1044_v25 = vsel %vm325_vm1, %v1028_v44, 0.0  ;;  %v1030_v47 = vmul.f32 %v5446_v38, %v4268_v23  ;;  %v4270_v10 = vpop.eup %4269 }
 0x5b1   :  { %v1047_v39 = vsel %vm325_vm1, %v1029_v33, 0.0  ;;  %v1031_v40 = vmul.f32 %v5446_v38, %v4270_v10 }
 0x5b2   :  { %v1050_v49 = vsel %vm325_vm1, %v1030_v47, 0.0 }
 0x5b3   :  { %v1053_v3 = vsel %vm325_vm1, %v1031_v40, 0.0 }
 0x5b4   :  { %1042 = vadd.xlane.f32.xlu2 %v1041_v32 }
 0x5bc   :  { %1045 = vadd.xlane.f32.xlu2 %v1044_v25 }
 0x5c4   :  { %1048 = vadd.xlane.f32.xlu2 %v1047_v39 }
 0x5cc   :  { %1051 = vadd.xlane.f32.xlu2 %v1050_v49 }
 0x5d4   :  { %1054 = vadd.xlane.f32.xlu2 %v1053_v3 }
 0x61f   :  { %v1034_v21 = vpop.xlane.xlu2 %1033 }
 0x620   :  { %v1056_v48 = vadd.f32 %v1034_v21, %v5040_v18 }
 0x621   :  { %v1040_v29 = vpop.xlane.xlu1 %1039 }
 0x622   :  { %v1037_v42 = vpop.xlane.xlu0 %1036  ;;  %v1058_v54 = vadd.f32 %v1040_v29, %v5040_v18  ;;  %v1072_v59 = vperm.slane %v1056_v48, %v5043_v20 }
 0x623   :  { %v1057_v46 = vadd.f32 %v1037_v42, %v5040_v18 }
 0x624   :  { %v1074_v60 = vperm.slane %v1058_v54, %v5043_v20 }
 0x625   :  { %v1073_v16 = vperm.slane %v1057_v46, %v5043_v20 }
 0x627   :  { %v1043_v15 = vpop.xlane.xlu2 %1042  ;;  %v1080_v62 = vsel %vm377_vm2, %v1073_v16, %v1072_v59 }
 0x628   :  { %v1059_v58 = vadd.f32 %v1043_v15, %v5040_v18  ;;  %v1081_v44 = vsel %vm379_vm3, %v1074_v60, %v1080_v62 }
 0x62a   :  { %v1075_v32 = vperm.slane %v1059_v58, %v5043_v20 }
 0x62c   :  { %v1082_v25 = vsel %vm381_vm4, %v1075_v32, %v1081_v44 }
 0x62f   :  { %v1046_v22 = vpop.xlane.xlu2 %1045 }
 0x630   :  { %v1060_v51 = vadd.f32 %v1046_v22, %v5040_v18 }
 0x632   :  { %v1076_v8 = vperm.slane %v1060_v51, %v5043_v20 }
 0x634   :  { %v1083_v57 = vsel %vm383_vm5, %v1076_v8, %v1082_v25 }
 0x637   :  { %v1049_v31 = vpop.xlane.xlu2 %1048 }
 0x638   :  { %v1061_v11 = vadd.f32 %v1049_v31, %v5040_v18 }
 0x63a   :  { %v1077_v36 = vperm.slane %v1061_v11, %v5043_v20 }
 0x63c   :  { %v1084_v12 = vsel %vm6909_vm12, %v1077_v36, %v1083_v57 }
 0x63f   :  { %v1052_v56 = vpop.xlane.xlu2 %1051 }
 0x640   :  { %v1062_v63 = vadd.f32 %v1052_v56, %v5040_v18 }
 0x642   :  { %v1078_v13 = vperm.slane %v1062_v63, %v5043_v20 }
 0x644   :  { %v1085_v39 = vsel %vm6910_vm8, %v1078_v13, %v1084_v12 }
 0x647   :  { %v1055_v9 = vpop.xlane.xlu2 %1054 }
 0x648   :  { %v1063_v50 = vadd.f32 %v1055_v9, %v5040_v18 }
 0x64a   :  { %v1079_v33 = vperm.slane %v1063_v50, %v5043_v20 }
 0x64c   :  { %v1086_v23 = vsel %vm6911_vm11, %v1079_v33, %v1085_v39 }
 0x64d   :  { %v1088_v47 = vsel %vm6912_vm6, %v1086_v23, -inf }
 0x64e   :  { %1089 = vmax.xlane.f32.xlu2 %v1088_v47 }
 0x6c1   :  { %v1090_v49 = vpop.xlane.xlu2 %1089 }
 0x6c2   :  { %v1094_v10 = vperm.slane %v1090_v49, 2  ;;  %v1093_v40 = vperm.slane %v1090_v49, 1  ;;  %v1092_v3 = vperm.slane %v1090_v49, 0  ;;  %v1098_v21 = vperm.slane %v1090_v49, 6 }
 0x6c3   :  { %v1096_v15 = vperm.slane %v1090_v49, 4  ;;  %v1095_v29 = vperm.slane %v1090_v49, 3  ;;  %v1099_v44 = vperm.slane %v1090_v49, 7  ;;  %v1097_v9 = vperm.slane %v1090_v49, 5 }
 0x6c4   :  { %v1110_v22 = vsub.f32 %v1058_v54, %v1094_v10  ;;  %v1109_v31 = vsub.f32 %v1057_v46, %v1093_v40  ;;  %v1108_v42 = vsub.f32 %v1056_v48, %v1092_v3  ;;  %v1114_v60 = vsub.f32 %v1062_v63, %v1098_v21 }
 0x6c5   :  { %v1112_v62 = vsub.f32 %v1060_v51, %v1096_v15  ;;  %v1111_v32 = vsub.f32 %v1059_v58, %v1095_v29  ;;  %v1115_v48 = vsub.f32 %v1063_v50, %v1099_v44  ;;  %v1113_v58 = vsub.f32 %v1061_v11, %v1097_v9 }
 0x6c6   :  { %v1120_v56 = vmul.f32 1.442695, %v1110_v22  ;;  %v1118_v16 = vmul.f32 1.442695, %v1109_v31  ;;  %v1116_v59 = vmul.f32 1.442695, %v1108_v42 }
 0x6c7   :  { %v1128_v8 = vmul.f32 1.442695, %v1114_v60  ;;  %v1124_v36 = vmul.f32 1.442695, %v1112_v62  ;;  %v1122_v13 = vmul.f32 1.442695, %v1111_v32 }
 0x6c8   :  { %4271 = vpow2.f32 %v1120_v56  ;;  %v1130_v33 = vmul.f32 1.442695, %v1115_v48  ;;  %v1126_v39 = vmul.f32 1.442695, %v1113_v58 }
 0x6c9   :  { %4273 = vpow2.f32 %v1118_v16 }
 0x6ca   :  { %4275 = vpow2.f32 %v1116_v59 }
 0x6cb   :  { %4277 = vpow2.f32 %v1128_v8 }
 0x6cc   :  { %4279 = vpow2.f32 %v1124_v36 }
 0x6cd   :  { %4281 = vpow2.f32 %v1122_v13 }
 0x6ce   :  { %v4272_v25 = vpop.eup %4271  ;;  %4283 = vpow2.f32 %v1130_v33 }
 0x6cf   :  { %v4274_v54 = vpop.eup %4273  ;;  %v5501_v46 = vmul.f32 %v4272_v25, %v5072_v52  ;;  %4285 = vpow2.f32 %v1126_v39 }
 0x6d0   :  { %v4276_v57 = vpop.eup %4275  ;;  %v5504_v51 = vmul.f32 %v4274_v54, %v5076_v6 }
 0x6d1   :  { %1155 = vperm.xlu2 %4191, %v5501_v46   ;;  %v5508_v63 = vmul.f32 %v4276_v57, %v5078_v7  ;;  %v4278_v12 = vpop.eup %4277 }
 0x6d2   :  { %1152 = vperm.xlu1 %4192, %v5504_v51   ;;  %v4280_v23 = vpop.eup %4279  ;;  %v5513_v47 = vmul.f32 %v4278_v12, %v5109_v35 }
 0x6d3   :  { %1149 = vperm.xlu0 %4193, %v5508_v63   ;;  %v4282_v50 = vpop.eup %4281  ;;  %v5516_v11 = vmul.f32 %v4280_v23, %v5092_v24 }
 0x6d4   :  { %v5520_v49 = vmul.f32 %v4282_v50, %v5074_v53  ;;  %v4284_v10 = vpop.eup %4283 }
 0x6d5   :  { %v4286_v40 = vpop.eup %4285  ;;  %v5525_v3 = vmul.f32 %v4284_v10, %v5095_v27 }
 0x6d6   :  { %v5528_v21 = vmul.f32 %v4286_v40, %v5111_v37 }
 0x6d9   :  { %1167 = vperm.xlu2 %4191, %v5513_v47  }
 0x6da   :  { %1161 = vperm.xlu1 %4192, %v5516_v11  }
 0x6db   :  { %1158 = vperm.xlu0 %4193, %v5520_v49  }
 0x6e2   :  { %1170 = vperm.xlu1 %4192, %v5525_v3  }
 0x6e3   :  { %1164 = vperm.xlu0 %4193, %v5528_v21  }
 0x72b   :  { %v1156_v31 = vpop.permute.xlu2 %1155 }
 0x72c   :  { %v1174_v62 = vperm.slane %v1156_v31, %v5043_v20 }
 0x733   :  { %v1168_v36 = vpop.permute.xlu2 %1167 }
 0x734   :  { %v1178_v54 = vperm.slane %v1168_v36, %v5043_v20 }
 0x744   :  { %v1153_v15 = vpop.permute.xlu1 %1152 }
 0x745   :  { %v1150_v22 = vpop.permute.xlu0 %1149  ;;  %v1173_v42 = vperm.slane %v1153_v15, %v5043_v20 }
 0x746   :  { %v1172_v29 = vperm.slane %v1150_v22, %v5043_v20 }
 0x748   :  { %v1180_v59 = vsel %vm377_vm2, %v1173_v42, %v1172_v29 }
 0x749   :  { %v1181_v8 = vsel %vm379_vm3, %v1174_v62, %v1180_v59 }
 0x74c   :  { %v1162_v56 = vpop.permute.xlu1 %1161 }
 0x74d   :  { %v1159_v16 = vpop.permute.xlu0 %1158  ;;  %v1176_v32 = vperm.slane %v1162_v56, %v5043_v20 }
 0x74e   :  { %v1175_v60 = vperm.slane %v1159_v16, %v5043_v20 }
 0x750   :  { %v1182_v44 = vsel %vm381_vm4, %v1175_v60, %v1181_v8 }
 0x751   :  { %v1183_v48 = vsel %vm383_vm5, %v1176_v32, %v1182_v44 }
 0x754   :  { %v1171_v13 = vpop.permute.xlu1 %1170 }
 0x755   :  { %v1165_v9 = vpop.permute.xlu0 %1164  ;;  %v1179_v57 = vperm.slane %v1171_v13, %v5043_v20 }
 0x756   :  { %v1177_v25 = vperm.slane %v1165_v9, %v5043_v20 }
 0x758   :  { %v1184_v58 = vsel %vm6913_vm13, %v1177_v25, %v1183_v48 }
 0x759   :  { %v1185_v33 = vsel %vm6914_vm14, %v1178_v54, %v1184_v58 }
 0x75a   :  { %v1186_v12 = vsel %vm6915_vm15, %v1179_v57, %v1185_v33 }
 0x75b   :  { %v1188_v39 = vsel %vm6916_vm9, %v1186_v12, 0.0 }
 0x75c   :  { %1189 = vadd.xlane.f32.xlu0 %v1188_v39 }
 0x7cf   :  { %v1190_v23 = vpop.xlane.xlu0 %1189 }
 0x7d0   :  { %v1192_v50 = vperm.slane %v1190_v23, 0  ;;  %v1193_v10 = vperm.slane %v1190_v23, 1  ;;  %v5548_v40 = vperm.slane %v1190_v23, 2  ;;  %v5550_v15 = vperm.slane %v1190_v23, 3 }
 0x7d1   :  { %v5552_v22 = vperm.slane %v1190_v23, 4  ;;  %v5554_v31 = vperm.slane %v1190_v23, 5  ;;  %v5560_v59 = vperm.slane %v1190_v23, 7  ;;  %v5562_v32 = vperm.slane %v1190_v23, 6 }
 0x7d2   :  { %4287 = vrcp.f32 %v1192_v50  ;;  %v1232_v42 = vand.u32 2147483647, %v1193_v10  ;;  %v1234_v29 = vand.u32 2147483648, %v1193_v10  ;;  %v1217_v56 = vand.u32 2147483647, %v1192_v50 }
 0x7d3   :  { %4289 = vrcp.f32 %v1193_v10  ;;  %v1219_v60 = vand.u32 2147483648, %v1192_v50  ;;  %vm1228_vm10 = vweird.f32 %v1193_v10  ;;  %vm1213_vm12 = vweird.f32 %v1192_v50 }
 0x7d4   :  { %4291 = vrcp.f32 %v5548_v40  ;;  %vm5566_vm7 = vcmp.eq.f32.partialorder %v1232_v42, 8.507059e+37  ;;  %v1235_v25 = vor.u32 1.1754944e-38, %v1234_v29  ;;  %vm5572_vm8 = vcmp.eq.f32.partialorder %v1217_v56, 8.507059e+37 }
 0x7d5   :  { %4293 = vrcp.f32 %v5550_v15  ;;  %v1220_v12 = vor.u32 1.1754944e-38, %v1219_v60  ;;  %v1264_v60 = vand.u32 2147483648, %v5550_v15  ;;  %v1249_v53 = vand.u32 2147483648, %v5548_v40 }
 0x7d6   :  { %4295 = vrcp.f32 %v5552_v22 }
 0x7d7   :  { %4297 = vrcp.f32 %v5554_v31 }
 0x7d8   :  { %v4288_v16 = vpop.eup %4287  ;;  %4299 = vrcp.f32 %v5560_v59 }
 0x7d9   :  { %v4290_v62 = vpop.eup %4289  ;;  %v1209_v8 = vmul.f32 %v4288_v16, %v1192_v50  ;;  %vm1214_vm11 = vweird.f32 %v4288_v16  ;;  %4301 = vrcp.f32 %v5562_v32 }
 0x7da   :  { %v5564_v36 = vpop.eup %4291  ;;  %v1224_v44 = vmul.f32 %v4290_v62, %v1193_v10  ;;  %vm1229_vm6 = vweird.f32 %v4290_v62  ;;  %vm1215_vm13 = vmor %vm1213_vm12, %vm1214_vm11  ;;  %vm1258_vm12 = vweird.f32 %v5550_v15 }
 0x7db   :  { %v5570_v9 = vpop.eup %4293  ;;  %v1210_v54 = vsub.f32 1.0, %v1209_v8  ;;  %v1239_v57 = vmul.f32 %v5564_v36, %v5548_v40  ;;  %vm1244_vm14 = vweird.f32 %v5564_v36  ;;  %vm1230_vm15 = vmor %vm1228_vm10, %vm1229_vm6  ;;  %vm1243_vm10 = vweird.f32 %v5548_v40 }
 0x7dc   :  { %v5578_v58 = vpop.eup %4295  ;;  %v1225_v33 = vsub.f32 1.0, %v1224_v44  ;;  %v1254_v39 = vmul.f32 %v5570_v9, %v5550_v15  ;;  %vm1259_vm9 = vweird.f32 %v5570_v9 }
 0x7dd   :  { %v5583_v23 = vpop.eup %4297  ;;  %v1211_v42 = vmul.f32 %v4288_v16, %v1210_v54  ;;  %v1240_v29 = vsub.f32 1.0, %v1239_v57  ;;  %v1269_v56 = vmul.f32 %v5578_v58, %v5552_v22  ;;  %vm1260_vm11 = vmor %vm1258_vm12, %vm1259_vm9  ;;  %vm1288_vm9 = vweird.f32 %v5554_v31 }
 0x7de   :  { %v1226_v8 = vmul.f32 %v4290_v62, %v1225_v33  ;;  %v1255_v27 = vsub.f32 1.0, %v1254_v39  ;;  %v1284_v35 = vmul.f32 %v5583_v23, %v5554_v31 }
 0x7df   :  { %v1212_v24 = vadd.f32 %v4288_v16, %v1211_v42  ;;  %v1241_v44 = vmul.f32 %v5564_v36, %v1240_v29  ;;  %v1270_v42 = vsub.f32 1.0, %v1269_v56  ;;  %v5599_v29 = vpop.eup %4299 }
 0x7e0   :  { %v1227_v54 = vadd.f32 %v4290_v62, %v1226_v8  ;;  %v1256_v57 = vmul.f32 %v5570_v9, %v1255_v27  ;;  %v1285_v7 = vsub.f32 1.0, %v1284_v35 }
 0x7e1   :  { %v1216_v33 = vsel %vm1215_vm13, %v4288_v16, %v1212_v24  ;;  %v1242_v39 = vadd.f32 %v5564_v36, %v1241_v44  ;;  %v1247_v24 = vand.u32 2147483647, %v5548_v40  ;;  %v1250_v40 = vor.u32 1.1754944e-38, %v1249_v53 }
 0x7e2   :  { %v1231_v37 = vsel %vm1230_vm15, %v4290_v62, %v1227_v54  ;;  %v1221_v8 = vsel %vm5572_vm8, %v1220_v12, %v1216_v33  ;;  %v1257_v50 = vadd.f32 %v5570_v9, %v1256_v57  ;;  %v1262_v62 = vand.u32 2147483647, %v5550_v15  ;;  %vm1245_vm8 = vmor %vm1243_vm10, %vm1244_vm14 }
 0x7e3   :  { %v1236_v27 = vsel %vm5566_vm7, %v1235_v25, %v1231_v37  ;;  %v1222_v10 = vmul.f32 %v1221_v8, %v5508_v63  ;;  %v1246_v35 = vsel %vm1245_vm8, %v5564_v36, %v1242_v39  ;;  %v1271_v37 = vmul.f32 %v5578_v58, %v1270_v42  ;;  %v5618_v63 = vpop.eup %4301 }
 0x7e4   :  { %v1237_v16 = vmul.f32 %v1236_v27, %v5504_v51  ;;  %v1261_v51 = vsel %vm1260_vm11, %v5570_v9, %v1257_v50  ;;  %v1286_v13 = vmul.f32 %v5583_v23, %v1285_v7  ;;  %v1314_v15 = vmul.f32 %v5599_v29, %v5560_v59 }
 0x7e5   :  { %1330 = vperm.xlu2 %4191, %v1222_v10   ;;  %v1265_v25 = vor.u32 1.1754944e-38, %v1264_v60  ;;  %vm1248_vm7 = vcmp.eq.f32.partialorder %v1247_v24, 8.507059e+37  ;;  %vm1263_vm6 = vcmp.eq.f32.partialorder %v1262_v62, 8.507059e+37  ;;  %v1294_v12 = vand.u32 2147483648, %v5554_v31 }
 0x7e6   :  { %1335 = vperm.xlu1 %4192, %v1237_v16   ;;  %v1251_v48 = vsel %vm1248_vm7, %v1250_v40, %v1246_v35  ;;  %v1272_v56 = vadd.f32 %v5578_v58, %v1271_v37  ;;  %vm1274_vm13 = vweird.f32 %v5578_v58  ;;  %v1299_v9 = vmul.f32 %v5618_v63, %v5562_v32 }
 0x7e7   :  { %v1266_v36 = vsel %vm1263_vm6, %v1265_v25, %v1261_v51  ;;  %v1287_v53 = vadd.f32 %v5583_v23, %v1286_v13  ;;  %vm1289_vm14 = vweird.f32 %v5583_v23  ;;  %v1279_v7 = vand.u32 2147483648, %v5552_v22 }
 0x7e8   :  { %v1315_v60 = vsub.f32 1.0, %v1314_v15  ;;  %v1252_v44 = vmul.f32 %v1251_v48, %v5501_v46  ;;  %vm1273_vm15 = vweird.f32 %v5552_v22  ;;  %v1277_v54 = vand.u32 2147483647, %v5552_v22  ;;  %vm1290_vm12 = vmor %vm1288_vm9, %vm1289_vm14 }
 0x7e9   :  { %v1300_v57 = vsub.f32 1.0, %v1299_v9  ;;  %v1267_v33 = vmul.f32 %v1266_v36, %v5520_v49  ;;  %v1292_v39 = vand.u32 2147483647, %v5554_v31  ;;  %vm1275_vm10 = vmor %vm1273_vm15, %vm1274_vm13  ;;  %v1291_v46 = vsel %vm1290_vm12, %v5583_v23, %v1287_v53  ;;  %v5658_v36 = vld [vmem:[#allocation16] sm:$0xff]  ;;  %v5664_v53 = vld [vmem:[#allocation16 + $0x10] sm:$0xff] }
 0x7ea   :  { %v1276_v42 = vsel %vm1275_vm10, %v5578_v58, %v1272_v56  ;;  %v1280_v50 = vor.u32 1.1754944e-38, %v1279_v7  ;;  %v1316_v22 = vmul.f32 %v5599_v29, %v1315_v60  ;;  %v1295_v27 = vor.u32 1.1754944e-38, %v1294_v12  ;;  %v5661_v56 = vld [vmem:[#allocation16 + $0x8] sm:$0xff] }
 0x7eb   :  { %v1301_v8 = vmul.f32 %v5618_v63, %v1300_v57  ;;  %vm1278_vm8 = vcmp.eq.f32.partialorder %v1277_v54, 8.507059e+37  ;;  %vm1293_vm11 = vcmp.eq.f32.partialorder %v1292_v39, 8.507059e+37  ;;  %vm1304_vm7 = vweird.f32 %v5618_v63  ;;  %v4575_v57 = vld [vmem:[#allocation16 + $0x20] sm:$0xff] }
 0x7ec   :  { %v1281_v49 = vsel %vm1278_vm8, %v1280_v50, %v1276_v42  ;;  %v1296_v10 = vsel %vm1293_vm11, %v1295_v27, %v1291_v46  ;;  %v1317_v24 = vadd.f32 %v5599_v29, %v1316_v22  ;;  %vm1319_vm6 = vweird.f32 %v5599_v29  ;;  %v5670_v50 = vld [vmem:[#allocation16 + $0x18] sm:$0xff] }
 0x7ed   :  { %1340 = vperm.xlu2 %4191, %v1252_v44   ;;  %v1302_v31 = vadd.f32 %v5618_v63, %v1301_v8  ;;  %v1309_v58 = vand.u32 2147483648, %v5562_v32  ;;  %v1282_v23 = vmul.f32 %v1281_v49, %v5516_v11  ;;  %v1324_v16 = vand.u32 2147483648, %v5560_v59 }
 0x7ee   :  { %1345 = vperm.xlu1 %4192, %v1267_v33   ;;  %vm1303_vm13 = vweird.f32 %v5562_v32  ;;  %v1307_v62 = vand.u32 2147483647, %v5562_v32  ;;  %v1297_v35 = vmul.f32 %v1296_v10, %v5528_v21  ;;  %vm1318_vm14 = vweird.f32 %v5560_v59  ;;  %v4577_v10 = vld [vmem:[#allocation16 + $0x30] sm:$0xff] }
 0x7ef   :  { %v1322_v37 = vand.u32 2147483647, %v5560_v59  ;;  %vm1305_vm15 = vmor %vm1303_vm13, %vm1304_vm7  ;;  %v1310_v40 = vor.u32 1.1754944e-38, %v1309_v58  ;;  %v1325_v13 = vor.u32 1.1754944e-38, %v1324_v16  ;;  %vm6921_vm8 = vcmask 1045509  }
 0x7f0   :  { %vm1320_vm9 = vmor %vm1318_vm14, %vm1319_vm6  ;;  %v1306_v51 = vsel %vm1305_vm15, %v5618_v63, %v1302_v31  ;;  %vm1308_vm10 = vcmp.eq.f32.partialorder %v1307_v62, 8.507059e+37  ;;  %vm6922_vm11 = vcmask 1046534   ;;  %vm6923_vm7 = vcmask 1047559  }
 0x7f1   :  { %v1321_v11 = vsel %vm1320_vm9, %v5599_v29, %v1317_v24  ;;  %vm1323_vm12 = vcmp.eq.f32.partialorder %v1322_v37, 8.507059e+37  ;;  %v1311_v15 = vsel %vm1308_vm10, %v1310_v40, %v1306_v51 }
 0x7f2   :  { %v1326_v32 = vsel %vm1323_vm12, %v1325_v13, %v1321_v11  ;;  %v1312_v21 = vmul.f32 %v1311_v15, %v5513_v47 }
 0x7f3   :  { %v1327_v25 = vmul.f32 %v1326_v32, %v5525_v3 }
 0x7f5   :  { %1350 = vperm.xlu2 %4191, %v1282_v23  }
 0x7f6   :  { %1355 = vperm.xlu1 %4192, %v1297_v35  }
 0x7fd   :  { %1360 = vperm.xlu2 %4191, %v1312_v21  }
 0x7fe   :  { %1365 = vperm.xlu1 %4192, %v1327_v25   ;;  %v5676_v25 = vld [vmem:[#allocation16 + $0x28] sm:$0xff] }
 0x83f   :  { %v1331_v59 = vpop.permute.xlu2 %1330 }
 0x840   :  { %v1368_v63 = vmul.f32 %v5658_v36, %v1331_v59 }
 0x842   :  { %v1376_v3 = vsel %vm325_vm1, %v1368_v63, 0.0 }
 0x843   :  { %v1377_v44 = vrot.slane %v1376_v3, 4 }
 0x845   :  { %v1378_v27 = vadd.f32 %v1377_v44, %v1376_v3 }
 0x847   :  { %v1341_v48 = vpop.permute.xlu2 %1340  ;;  %v1379_v35 = vrot.slane %v1378_v27, 2 }
 0x848   :  { %v1370_v47 = vmul.f32 %v5664_v53, %v1341_v48 }
 0x849   :  { %v1380_v48 = vadd.f32 %v1379_v35, %v1378_v27 }
 0x84a   :  { %v1390_v54 = vsel %vm325_vm1, %v1370_v47, 0.0 }
 0x84b   :  { %v1391_v46 = vrot.slane %v1390_v54, 4 }
 0x84d   :  { %v1392_v16 = vadd.f32 %v1391_v46, %v1390_v54 }
 0x84f   :  { %v1351_v12 = vpop.permute.xlu2 %1350  ;;  %v1393_v15 = vrot.slane %v1392_v16, 2 }
 0x850   :  { %v1372_v33 = vmul.f32 %v4575_v57, %v1351_v12 }
 0x851   :  { %v1394_v47 = vadd.f32 %v1393_v15, %v1392_v16 }
 0x852   :  { %v1404_v49 = vsel %vm325_vm1, %v1372_v33, 0.0 }
 0x853   :  { %v1405_v62 = vrot.slane %v1404_v49, 4 }
 0x855   :  { %v1406_v32 = vadd.f32 %v1405_v62, %v1404_v49 }
 0x857   :  { %v1361_v39 = vpop.permute.xlu2 %1360  ;;  %v1407_v3 = vrot.slane %v1406_v32, 2 }
 0x858   :  { %v1336_v29 = vpop.permute.xlu1 %1335  ;;  %v1374_v31 = vmul.f32 %v4577_v10, %v1361_v39 }
 0x859   :  { %v1369_v9 = vmul.f32 %v5661_v56, %v1336_v29 }
 0x85a   :  { %v1418_v37 = vsel %vm325_vm1, %v1374_v31, 0.0 }
 0x85b   :  { %v1383_v7 = vsel %vm325_vm1, %v1369_v9, 0.0  ;;  %v1419_v21 = vrot.slane %v1418_v37, 4 }
 0x85c   :  { %v1384_v60 = vrot.slane %v1383_v7, 4 }
 0x85e   :  { %v1385_v42 = vadd.f32 %v1384_v60, %v1383_v7  ;;  %v1420_v7 = vadd.f32 %v1419_v21, %v1418_v37  ;;  %v1381_v60 = vrot.slane %v1380_v48, 1 }
 0x860   :  { %v1346_v8 = vpop.permute.xlu1 %1345  ;;  %v1386_v58 = vrot.slane %v1385_v42, 2  ;;  %v1421_v46 = vrot.slane %v1420_v7, 2  ;;  %v1382_v49 = vadd.f32 %v1381_v60, %v1380_v48  ;;  %v5695_v60 = vld [vmem:[#allocation13 + $0x20] sm:$0xff] }
 0x861   :  { %v1371_v22 = vmul.f32 %v5670_v50, %v1346_v8  ;;  %v1408_v8 = vadd.f32 %v1407_v3, %v1406_v32 }
 0x862   :  { %v1387_v11 = vadd.f32 %v1386_v58, %v1385_v42  ;;  %v1395_v42 = vrot.slane %v1394_v47, 1  ;;  %v1422_v37 = vadd.f32 %v1421_v46, %v1420_v7  ;;  %v5692_v7 = vld [vmem:[#allocation13 + $0x30] sm:$0xff]  ;;  %v1433_v46 = vld [vmem:[#allocation5 + $0x10] sm:$0xff] }
 0x863   :  { %v1397_v24 = vsel %vm325_vm1, %v1371_v22, 0.0  ;;  %v5680_v22 = vld [vmem:[#allocation16 + $0x38] sm:$0xff]  ;;  %v1409_v35 = vrot.slane %v1408_v8, 1 }
 0x864   :  { %v1398_v23 = vrot.slane %v1397_v24, 4  ;;  %v1388_v63 = vrot.slane %v1387_v11, 1  ;;  %v1396_v62 = vadd.f32 %v1395_v42, %v1394_v47  ;;  %v1423_v21 = vrot.slane %v1422_v37, 1  ;;  %v5714_v42 = vld [vmem:[#allocation13 + $0x8] sm:$0xff] }
 0x865   :  { %v1410_v32 = vadd.f32 %v1409_v35, %v1408_v8  ;;  %v941_v8 = vpop.f32.mrf.mxu0 }
 0x866   :  { %v1399_v51 = vadd.f32 %v1398_v23, %v1397_v24  ;;  %v1389_v54 = vadd.f32 %v1388_v63, %v1387_v11 }
 0x868   :  { %v1400_v40 = vrot.slane %v1399_v51, 2  ;;  %v1356_v13 = vpop.permute.xlu1 %1355  ;;  %v1445_v24 = vsel %vm377_vm2, %v1389_v54, %v1382_v49  ;;  %v5701_v54 = vld [vmem:[#allocation13] sm:$0xff] }
 0x869   :  { %v1373_v59 = vmul.f32 %v5676_v25, %v1356_v13  ;;  %v1446_v11 = vsel %vm379_vm3, %v1396_v62, %v1445_v24 }
 0x86a   :  { %v1401_v29 = vadd.f32 %v1400_v40, %v1399_v51 }
 0x86b   :  { %v1411_v12 = vsel %vm325_vm1, %v1373_v59, 0.0 }
 0x86c   :  { %v1412_v9 = vrot.slane %v1411_v12, 4  ;;  %v1402_v57 = vrot.slane %v1401_v29, 1 }
 0x86e   :  { %v1413_v44 = vadd.f32 %v1412_v9, %v1411_v12  ;;  %v1403_v58 = vadd.f32 %v1402_v57, %v1401_v29  ;;  %v1424_v29 = vadd.f32 %v1423_v21, %v1422_v37  ;;  %v5705_v57 = vld [vmem:[#allocation13 + $0x38] sm:$0xff] }
 0x870   :  { %v1414_v33 = vrot.slane %v1413_v44, 2  ;;  %v1366_v39 = vpop.permute.xlu1 %1365  ;;  %v1447_v40 = vsel %vm381_vm4, %v1403_v58, %v1446_v11 }
 0x871   :  { %v1375_v27 = vmul.f32 %v5680_v22, %v1366_v39  ;;  %v1448_v48 = vsel %vm383_vm5, %v1410_v32, %v1447_v40  ;;  %v5711_v39 = vld [vmem:[#allocation13 + $0x18] sm:$0xff] }
 0x872   :  { %v1415_v10 = vadd.f32 %v1414_v33, %v1413_v44  ;;  %v5698_v44 = vld [vmem:[#allocation13 + $0x10] sm:$0xff]  ;;  %v5708_v33 = vld [vmem:[#allocation13 + $0x28] sm:$0xff] }
 0x873   :  { %v1425_v31 = vsel %vm325_vm1, %v1375_v27, 0.0  ;;  %v1435_v27 = vadd.f32 %v1433_v46, %v941_v8 }
 0x874   :  { %v1416_v23 = vrot.slane %v1415_v10, 1  ;;  %v1426_v16 = vrot.slane %v1425_v31, 4 }
 0x876   :  { %v1427_v51 = vadd.f32 %v1426_v16, %v1425_v31  ;;  %v1417_v13 = vadd.f32 %v1416_v23, %v1415_v10  ;;  %v961_v23 = vpop.f32.mrf.mxu1  ;;  %v1434_v16 = vld [vmem:[#allocation5 + $0x18] sm:$0xff] }
 0x877   :  { %v1436_v35 = vadd.f32 %v1434_v16, %v961_v23 }
 0x878   :  { %v1428_v15 = vrot.slane %v1427_v51, 2  ;;  %v1449_v63 = vsel %vm6921_vm8, %v1417_v13, %v1448_v48 }
 0x879   :  { %v1450_v47 = vsel %vm6922_vm11, %v1424_v29, %v1449_v63  ;;  %vm6934_vm11 = vcmask 1045509  }
 0x87a   :  { %v1429_v59 = vadd.f32 %v1428_v15, %v1427_v51 }
 0x87c   :  { %v1430_v12 = vrot.slane %v1429_v59, 1 }
 0x87e   :  { %v1431_v9 = vadd.f32 %v1430_v12, %v1429_v59 }
 0x880   :  { %v1451_v3 = vsel %vm6923_vm7, %v1431_v9, %v1450_v47  ;;  %vm6935_vm7 = vcmask 1046534  }
 0x881   :  { %4136 = vmatmul.msk.f32.vlgmr.msra.gmra.mxu3 %vm325_vm1, %v1451_v3 }
 0x882   :  { %2094 = vmatpush.msra.mxu3 %v5692_v7 }
 0x884   :  { %2095 = vmatpush.msra.mxu3 %v5695_v60 }
 0x886   :  { %2096 = vmatpush.msra.mxu3 %v5698_v44 }
 0x888   :  { %2097 = vmatpush.msra.mxu3 %v5701_v54 }
 0x889   :  { %4137 = vmatmul.msk.f32.vlgmr.msrb.gmra.mxu3 %vm325_vm1, %v1451_v3 }
 0x88a   :  { %2114 = vmatpush.msrb.mxu3 %v5705_v57 }
 0x88c   :  { %2115 = vmatpush.msrb.mxu3 %v5708_v33 }
 0x88e   :  { %2116 = vmatpush.msrb.mxu3 %v5711_v39 }
 0x890   :  { %2117 = vmatpush.msrb.mxu3 %v5714_v42 }
 0x904   :  { %v1471_v49 = vpop.f32.mrf.mxu3 }
 0x905   :  { %v1494_v10 = vadd.f32 %v1471_v49, %v1435_v27 }
 0x907   :  { %v4138_v31 = vmul.f32 -1.442695, %v1494_v10 }
 0x909   :  { %4303 = vpow2.f32 %v4138_v31 }
 0x90c   :  { %v1491_v62 = vpop.f32.mrf.mxu3 }
 0x90d   :  { %v1495_v51 = vadd.f32 %v1491_v62, %v1436_v35 }
 0x90f   :  { %v4304_v24 = vpop.eup %4303  ;;  %v4139_v9 = vmul.f32 -1.442695, %v1495_v51 }
 0x910   :  { %v1502_v58 = vadd.f32 1.0, %v4304_v24 }
 0x912   :  { %4305 = vrcp.f32 %v1502_v58  ;;  %v1515_v13 = vand.u32 2147483648, %v1502_v58  ;;  %v1513_v32 = vand.u32 2147483647, %v1502_v58  ;;  %vm1509_vm13 = vweird.f32 %v1502_v58 }
 0x913   :  { %4307 = vtanh.f32 %v1495_v51 }
 0x914   :  { %v1516_v59 = vor.u32 1.1754944e-38, %v1515_v13  ;;  %vm1514_vm15 = vcmp.eq.f32.partialorder %v1513_v32, 8.507059e+37  ;;  %4309 = vpow2.f32 %v4139_v9  ;;  %v5730_v13 = vld [vmem:[#allocation11 + $0xb0] sm:$0xff]  ;;  %v5737_v32 = vld [vmem:[#allocation11 + $0x98] sm:$0xff]  ;;  %v5779_v9 = vld [vmem:[#allocation11 + $0x8] sm:$0xff] }
 0x915   :  { %6932 = vst [vmem:[#allocation45_spill] sm:$0xff] %v5779_v9 }
 0x918   :  { %v4306_v37 = vpop.eup %4305 }
 0x919   :  { %v1505_v11 = vmul.f32 %v4306_v37, %v1502_v58  ;;  %vm1510_vm6 = vweird.f32 %v4306_v37  ;;  %v4308_v12 = vpop.eup %4307 }
 0x91a   :  { %vm1511_vm14 = vmor %vm1509_vm13, %vm1510_vm6  ;;  %v4310_v47 = vpop.eup %4309  ;;  %vm6936_vm6 = vcmask 1047559   ;;  %vm6937_vm13 = vcmask 64512  }
 0x91b   :  { %v1506_v40 = vsub.f32 1.0, %v1505_v11  ;;  %v1503_v3 = vadd.f32 1.0, %v4310_v47 }
 0x91d   :  { %v1507_v15 = vmul.f32 %v4306_v37, %v1506_v40  ;;  %4311 = vrcp.f32 %v1503_v3  ;;  %v1530_v23 = vand.u32 2147483648, %v1503_v3  ;;  %vm1524_vm10 = vweird.f32 %v1503_v3  ;;  %v5727_v40 = vld [vmem:[#allocation11 + $0xa8] sm:$0xff] }
 0x91e   :  { %v1528_v16 = vand.u32 2147483647, %v1503_v3 }
 0x91f   :  { %v1508_v21 = vadd.f32 %v4306_v37, %v1507_v15  ;;  %v1531_v35 = vor.u32 1.1754944e-38, %v1530_v23  ;;  %v5734_v15 = vld [vmem:[#allocation11 + $0x90] sm:$0xff] }
 0x920   :  { %vm1529_vm8 = vcmp.eq.f32.partialorder %v1528_v16, 8.507059e+37 }
 0x921   :  { %v1512_v48 = vsel %vm1511_vm14, %v4306_v37, %v1508_v21  ;;  %v5741_v21 = vld [vmem:[#allocation11 + $0x78] sm:$0xff]  ;;  %vm6944_vm14 = vmmov %vm6934_vm11 }
 0x922   :  { %v1517_v63 = vsel %vm1514_vm15, %v1516_v59, %v1512_v48  ;;  %v5744_v59 = vld [vmem:[#allocation11 + $0x80] sm:$0xff]  ;;  %v5751_v48 = vld [vmem:[#allocation11 + $0x68] sm:$0xff]  ;;  %vm6945_vm15 = vmmov %vm6935_vm7 }
 0x923   :  { %v1536_v29 = vmul.f32 %v4308_v12, %v1517_v63  ;;  %v4312_v8 = vpop.eup %4311  ;;  %v1535_v10 = vmul.f32 %v1517_v63, %v5383_v2  ;;  %6924 = vst [vmem:[#allocation37_spill] sm:$0xff] %v5751_v48  ;;  %v5758_v12 = vld [vmem:[#allocation11 + $0x50] sm:$0xff]  ;;  %v5765_v63 = vld [vmem:[#allocation11 + $0x38] sm:$0xff] }
 0x924   :  { %v1520_v46 = vmul.f32 %v4312_v8, %v1503_v3  ;;  %vm1525_vm9 = vweird.f32 %v4312_v8  ;;  %6926 = vst [vmem:[#allocation39_spill] sm:$0xff] %v5758_v12 }
 0x925   :  { %1538 = vrot.lane.b32.xlu2 %v1536_v29, %s4921_s7  ;;  %vm1526_vm12 = vmor %vm1524_vm10, %vm1525_vm9  ;;  %6928 = vst [vmem:[#allocation41_spill] sm:$0xff] %v5765_v63  ;;  %v5772_v29 = vld [vmem:[#allocation11 + $0x20] sm:$0xff] }
 0x926   :  { %v1521_v27 = vsub.f32 1.0, %v1520_v46  ;;  %6930 = vst [vmem:[#allocation43_spill] sm:$0xff] %v5772_v29  ;;  %vm6946_vm9 = vmmov %vm6936_vm6 }
 0x927   :  { %vm6947_vm10 = vmmov %vm6937_vm13 }
 0x928   :  { %v1522_v49 = vmul.f32 %v4312_v8, %v1521_v27 }
 0x92a   :  { %v1523_v58 = vadd.f32 %v4312_v8, %v1522_v49 }
 0x92c   :  { %v1527_v62 = vsel %vm1526_vm12, %v4312_v8, %v1523_v58 }
 0x92d   :  { %v1532_v51 = vsel %vm1529_vm8, %v1531_v35, %v1527_v62 }
 0x97f   :  { %v1539_v31 = vpop.permute.xlu2 %1538 }
 0x980   :  { %v5719_v24 = vadd.f32 %v1539_v31, %v1535_v10 }
 0x982   :  { %4313 = vtanh.f32 %v5719_v24 }
 0x988   :  { %v4314_v37 = vpop.eup %4313 }
 0x989   :  { %v1543_v11 = vmul.f32 %v4314_v37, %v1532_v51 }
 0x98b   :  { %1545 = vrot.lane.b32.xlu1 %v1543_v11, %s4921_s7 }
 0x9fd   :  { %v1546_v2 = vpop.permute.xlu1 %1545 }
 0x9fe   :  { %1549 = vst.msk [vmem:[#allocation17 + $0x8] sm:$0xff] %vm152_vm0, %v1546_v2  ;;  %4140 = vmatmul.msk.f32.vlgmr.msra.gmra.mxu0 %vm152_vm0, %v1546_v2  ;;  %4141 = vmatmul.msk.f32.vlgmr.msra.gmra.mxu1 %vm152_vm0, %v1546_v2 }
 0x9ff   :  { %4142 = vmatmul.msk.f32.vlgmr.msra.gmra.mxu2 %vm152_vm0, %v1546_v2  ;;  %2816 = vmatpush.msra.mxu0 %v5727_v40 }
 0xa00   :  { %2836 = vmatpush.msra.mxu1 %v5730_v13  ;;  %2856 = vmatpush.msra.mxu2 %v5393_v17  ;;  %v5748_v17 = vld [vmem:[#allocation11 + $0x60] sm:$0xff] }
 0xa01   :  { %2817 = vmatpush.msra.mxu0 %v5734_v15 }
 0xa02   :  { %2837 = vmatpush.msra.mxu1 %v5737_v32  ;;  %2857 = vmatpush.msra.mxu2 %v5398_v19  ;;  %v5755_v19 = vld [vmem:[#allocation11 + $0x48] sm:$0xff] }
 0xa03   :  { %2818 = vmatpush.msra.mxu0 %v5741_v21  ;;  %6925 = vst [vmem:[#allocation38_spill] sm:$0xff] %v5755_v19 }
 0xa04   :  { %2838 = vmatpush.msra.mxu1 %v5744_v59  ;;  %2858 = vmatpush.msra.mxu2 %v5403_v26  ;;  %v5762_v26 = vld [vmem:[#allocation11 + $0x30] sm:$0xff] }
 0xa05   :  { %2819 = vmatpush.msra.mxu0 %v5748_v17  ;;  %6927 = vst [vmem:[#allocation40_spill] sm:$0xff] %v5762_v26 }
 0xa06   :  { %2839 = vmatpush.msra.mxu1 %v5751_v48  ;;  %2859 = vmatpush.msra.mxu2 %v5408_v5  ;;  %v5769_v5 = vld [vmem:[#allocation11 + $0x18] sm:$0xff] }
 0xa07   :  { %2820 = vmatpush.msra.mxu0 %v5755_v19  ;;  %6929 = vst [vmem:[#allocation42_spill] sm:$0xff] %v5769_v5 }
 0xa08   :  { %2840 = vmatpush.msra.mxu1 %v5758_v12  ;;  %2860 = vmatpush.msra.mxu2 %v5413_v30  ;;  %v5776_v30 = vld [vmem:[#allocation11] sm:$0xff] }
 0xa09   :  { %2821 = vmatpush.msra.mxu0 %v5762_v26  ;;  %6931 = vst [vmem:[#allocation44_spill] sm:$0xff] %v5776_v30 }
 0xa0a   :  { %2841 = vmatpush.msra.mxu1 %v5765_v63  ;;  %2861 = vmatpush.msra.mxu2 %v5418_v41 }
 0xa0b   :  { %2822 = vmatpush.msra.mxu0 %v5769_v5 }
 0xa0c   :  { %2842 = vmatpush.msra.mxu1 %v5772_v29  ;;  %2862 = vmatpush.msra.mxu2 %v5423_v28 }
 0xa0d   :  { %2823 = vmatpush.msra.mxu0 %v5776_v30 }
 0xa0e   :  { %2843 = vmatpush.msra.mxu1 %v5779_v9  ;;  %2863 = vmatpush.msra.mxu2 %v5428_v45 }
 0xa82   :  { %v1609_v41 = vpop.f32.mrf.mxu2 }
 0xa83   :  { %v1620_v47 = vperm.slane %v1609_v41, 0  ;;  %v1614_v3 = vrot.slane %v1609_v41, 2  ;;  %v1613_v8 = vrot.slane %v1609_v41, 1  ;;  %v1615_v46 = vrot.slane %v1609_v41, 3 }
 0xa84   :  { %v1616_v31 = vrot.slane %v1609_v41, 4  ;;  %v1617_v51 = vrot.slane %v1609_v41, 5 }
 0xa85   :  { %v1636_v27 = vadd.f32 %v5431_v0, %v1620_v47  ;;  %v1622_v49 = vperm.slane %v1614_v3, 0  ;;  %v1621_v10 = vperm.slane %v1613_v8, 0  ;;  %v1623_v28 = vperm.slane %v1615_v46, 0 }
 0xa86   :  { %v1624_v45 = vperm.slane %v1616_v31, 0  ;;  %v1625_v8 = vperm.slane %v1617_v51, 0 }
 0xa87   :  { %4315 = vtanh.f32 %v1636_v27  ;;  %v1638_v58 = vadd.f32 %v5434_v4, %v1622_v49  ;;  %v1637_v23 = vadd.f32 %v5437_v1, %v1621_v10  ;;  %v1639_v16 = vadd.f32 %v5440_v14, %v1623_v28 }
 0xa88   :  { %v1640_v0 = vadd.f32 %v5449_v34, %v1624_v45  ;;  %v5797_v34 = vld [vmem:[%s6849_s8] ss:$0 sm:$0xff]  ;;  %v1641_v27 = vadd.f32 %v5458_v61, %v1625_v8  ;;  %v1618_v49 = vrot.slane %v1609_v41, 6 }
 0xa89   :  { %4317 = vtanh.f32 %v1638_v58  ;;  %6933 = vst [vmem:[#allocation46_spill] sm:$0xff] %v5797_v34 }
 0xa8a   :  { %4319 = vtanh.f32 %v1637_v23  ;;  %v1626_v28 = vperm.slane %v1618_v49, 0  ;;  %v1619_v23 = vrot.slane %v1609_v41, 7 }
 0xa8b   :  { %4321 = vtanh.f32 %v1639_v16 }
 0xa8c   :  { %4323 = vtanh.f32 %v1640_v0  ;;  %v1642_v58 = vadd.f32 %v5463_v55, %v1626_v28 }
 0xa8d   :  { %v4316_v62 = vpop.eup %4315  ;;  %4325 = vtanh.f32 %v1641_v27 }
 0xa8e   :  { %v1652_v35 = vmul.f32 %v5446_v38, %v4316_v62  ;;  %4327 = vtanh.f32 %v1642_v58  ;;  %v1627_v62 = vperm.slane %v1619_v23, 0 }
 0xa8f   :  { %v4318_v37 = vpop.eup %4317 }
 0xa90   :  { %v4320_v11 = vpop.eup %4319  ;;  %v1660_v2 = vsel %vm325_vm1, %v1652_v35, 0.0  ;;  %v1654_v4 = vmul.f32 %v5446_v38, %v4318_v37  ;;  %v1643_v35 = vadd.f32 %v5468_v43, %v1627_v62 }
 0xa91   :  { %v4322_v47 = vpop.eup %4321  ;;  %1661 = vadd.xlane.f32.xlu0 %v1660_v2  ;;  %v1653_v1 = vmul.f32 %v5446_v38, %v4320_v11 }
 0xa92   :  { %v1666_v14 = vsel %vm325_vm1, %v1654_v4, 0.0  ;;  %v1655_v46 = vmul.f32 %v5797_v34, %v4322_v47  ;;  %v4324_v10 = vpop.eup %4323  ;;  %4329 = vtanh.f32 %v1643_v35 }
 0xa93   :  { %1667 = vadd.xlane.f32.xlu1 %v1666_v14  ;;  %v1663_v3 = vsel %vm325_vm1, %v1653_v1, 0.0  ;;  %v1656_v31 = vmul.f32 %v5797_v34, %v4324_v10  ;;  %v4326_v45 = vpop.eup %4325 }
 0xa94   :  { %1664 = vadd.xlane.f32.xlu2 %v1663_v3  ;;  %v1669_v38 = vsel %vm325_vm1, %v1655_v46, 0.0  ;;  %v1657_v61 = vmul.f32 %v5797_v34, %v4326_v45  ;;  %v4328_v0 = vpop.eup %4327 }
 0xa95   :  { %v1672_v16 = vsel %vm325_vm1, %v1656_v31, 0.0  ;;  %v1658_v51 = vmul.f32 %v5797_v34, %v4328_v0 }
 0xa96   :  { %v1675_v37 = vsel %vm325_vm1, %v1657_v61, 0.0 }
 0xa97   :  { %v1678_v55 = vsel %vm325_vm1, %v1658_v51, 0.0 }
 0xa98   :  { %v4330_v41 = vpop.eup %4329 }
 0xa99   :  { %1670 = vadd.xlane.f32.xlu0 %v1669_v38  ;;  %v1659_v11 = vmul.f32 %v5797_v34, %v4330_v41 }
 0xa9b   :  { %v1681_v2 = vsel %vm325_vm1, %v1659_v11, 0.0 }
 0xaa1   :  { %1673 = vadd.xlane.f32.xlu0 %v1672_v16 }
 0xaa9   :  { %1676 = vadd.xlane.f32.xlu0 %v1675_v37 }
 0xab1   :  { %1679 = vadd.xlane.f32.xlu0 %v1678_v55 }
 0xab9   :  { %1682 = vadd.xlane.f32.xlu0 %v1681_v2 }
 0xb04   :  { %v1662_v4 = vpop.xlane.xlu0 %1661 }
 0xb05   :  { %v1684_v46 = vadd.f32 %v1662_v4, %v5040_v18 }
 0xb06   :  { %v1668_v3 = vpop.xlane.xlu1 %1667 }
 0xb07   :  { %v1665_v14 = vpop.xlane.xlu2 %1664  ;;  %v1686_v27 = vadd.f32 %v1668_v3, %v5040_v18  ;;  %v1700_v31 = vperm.slane %v1684_v46, %v5043_v20 }
 0xb08   :  { %v1685_v8 = vadd.f32 %v1665_v14, %v5040_v18 }
 0xb09   :  { %v1702_v23 = vperm.slane %v1686_v27, %v5043_v20 }
 0xb0a   :  { %v1701_v38 = vperm.slane %v1685_v8, %v5043_v20 }
 0xb0c   :  { %v1671_v47 = vpop.xlane.xlu0 %1670  ;;  %v1708_v45 = vsel %vm377_vm2, %v1701_v38, %v1700_v31 }
 0xb0d   :  { %v1687_v10 = vadd.f32 %v1671_v47, %v5040_v18  ;;  %v1709_v37 = vsel %vm379_vm3, %v1702_v23, %v1708_v45 }
 0xb0f   :  { %v1703_v62 = vperm.slane %v1687_v10, %v5043_v20 }
 0xb11   :  { %v1710_v55 = vsel %vm381_vm4, %v1703_v62, %v1709_v37 }
 0xb14   :  { %v1674_v1 = vpop.xlane.xlu0 %1673 }
 0xb15   :  { %v1688_v28 = vadd.f32 %v1674_v1, %v5040_v18 }
 0xb17   :  { %v1704_v61 = vperm.slane %v1688_v28, %v5043_v20 }
 0xb19   :  { %v1711_v11 = vsel %vm383_vm5, %v1704_v61, %v1710_v55 }
 0xb1c   :  { %v1677_v43 = vpop.xlane.xlu0 %1676 }
 0xb1d   :  { %v1689_v58 = vadd.f32 %v1677_v43, %v5040_v18 }
 0xb1f   :  { %v1705_v35 = vperm.slane %v1689_v58, %v5043_v20 }
 0xb21   :  { %v1712_v4 = vsel %vm6934_vm11, %v1705_v35, %v1711_v11 }
 0xb24   :  { %v1680_v49 = vpop.xlane.xlu0 %1679 }
 0xb25   :  { %v1690_v16 = vadd.f32 %v1680_v49, %v5040_v18 }
 0xb27   :  { %v1706_v0 = vperm.slane %v1690_v16, %v5043_v20 }
 0xb29   :  { %v1713_v47 = vsel %vm6935_vm7, %v1706_v0, %v1712_v4 }
 0xb2c   :  { %v1683_v51 = vpop.xlane.xlu0 %1682 }
 0xb2d   :  { %v1691_v41 = vadd.f32 %v1683_v51, %v5040_v18 }
 0xb2f   :  { %v1707_v2 = vperm.slane %v1691_v41, %v5043_v20 }
 0xb31   :  { %v1714_v1 = vsel %vm6936_vm6, %v1707_v2, %v1713_v47 }
 0xb32   :  { %v1716_v43 = vsel %vm6937_vm13, %v1714_v1, -inf }
 0xb33   :  { %1717 = vmax.xlane.f32.xlu2 %v1716_v43 }
 0xba6   :  { %v1718_v14 = vpop.xlane.xlu2 %1717 }
 0xba7   :  { %v1722_v3 = vperm.slane %v1718_v14, 2  ;;  %v1721_v49 = vperm.slane %v1718_v14, 1  ;;  %v1720_v38 = vperm.slane %v1718_v14, 0  ;;  %v1725_v31 = vperm.slane %v1718_v14, 5 }
 0xba8   :  { %v1723_v23 = vperm.slane %v1718_v14, 3  ;;  %v1724_v37 = vperm.slane %v1718_v14, 4  ;;  %v1726_v1 = vperm.slane %v1718_v14, 6  ;;  %v1727_v18 = vperm.slane %v1718_v14, 7 }
 0xba9   :  { %v1738_v45 = vsub.f32 %v1686_v27, %v1722_v3  ;;  %v1737_v62 = vsub.f32 %v1685_v8, %v1721_v49  ;;  %v1736_v61 = vsub.f32 %v1684_v46, %v1720_v38  ;;  %v1741_v11 = vsub.f32 %v1689_v58, %v1725_v31  ;;  %v6938_v58 = vld [vmem:[#allocation32_spill] sm:$0xff] }
 0xbaa   :  { %v1739_v0 = vsub.f32 %v1687_v10, %v1723_v23  ;;  %v1740_v2 = vsub.f32 %v1688_v28, %v1724_v37  ;;  %v1742_v46 = vsub.f32 %v1690_v16, %v1726_v1  ;;  %v1743_v28 = vsub.f32 %v1691_v41, %v1727_v18  ;;  %v6939_v23 = vld [vmem:[#allocation36_spill] sm:$0xff]  ;;  %v6941_v41 = vld [vmem:[#allocation33_spill] sm:$0xff] }
 0xbab   :  { %v1748_v51 = vmul.f32 1.442695, %v1738_v45  ;;  %v1746_v55 = vmul.f32 1.442695, %v1737_v62  ;;  %v1744_v35 = vmul.f32 1.442695, %v1736_v61 }
 0xbac   :  { %v1754_v4 = vmul.f32 1.442695, %v1741_v11  ;;  %v1750_v47 = vmul.f32 1.442695, %v1739_v0  ;;  %v1752_v43 = vmul.f32 1.442695, %v1740_v2 }
 0xbad   :  { %4331 = vpow2.f32 %v1748_v51  ;;  %v1756_v14 = vmul.f32 1.442695, %v1742_v46  ;;  %v1758_v38 = vmul.f32 1.442695, %v1743_v28  ;;  %v6940_v62 = vld [vmem:[#allocation30_spill] sm:$0xff] }
 0xbae   :  { %4333 = vpow2.f32 %v1746_v55  ;;  %v6942_v55 = vld [vmem:[#allocation35_spill] sm:$0xff]  ;;  %v6943_v11 = vld [vmem:[#allocation34_spill] sm:$0xff] }
 0xbaf   :  { %4335 = vpow2.f32 %v1744_v35 }
 0xbb0   :  { %4337 = vpow2.f32 %v1754_v4 }
 0xbb1   :  { %4339 = vpow2.f32 %v1750_v47 }
 0xbb2   :  { %4341 = vpow2.f32 %v1752_v43 }
 0xbb3   :  { %v4332_v34 = vpop.eup %4331  ;;  %4343 = vpow2.f32 %v1756_v14 }
 0xbb4   :  { %v4334_v27 = vpop.eup %4333  ;;  %v5837_v8 = vmul.f32 %v4332_v34, %v5072_v52  ;;  %4345 = vpow2.f32 %v1758_v38 }
 0xbb5   :  { %v4336_v3 = vpop.eup %4335  ;;  %v5840_v10 = vmul.f32 %v4334_v27, %v5076_v6 }
 0xbb6   :  { %1783 = vperm.xlu2 %4191, %v5837_v8   ;;  %v5844_v49 = vmul.f32 %v4336_v3, %v6938_v58  ;;  %v4338_v34 = vpop.eup %4337 }
 0xbb7   :  { %1780 = vperm.xlu0 %4193, %v5840_v10   ;;  %v4340_v31 = vpop.eup %4339  ;;  %v5849_v45 = vmul.f32 %v4338_v34, %v6939_v23 }
 0xbb8   :  { %1777 = vperm.xlu1 %4192, %v5844_v49   ;;  %v4342_v16 = vpop.eup %4341  ;;  %v5852_v18 = vmul.f32 %v4340_v31, %v6940_v62 }
 0xbb9   :  { %v5856_v61 = vmul.f32 %v4342_v16, %v6941_v41  ;;  %v4344_v37 = vpop.eup %4343 }
 0xbba   :  { %v4346_v51 = vpop.eup %4345  ;;  %v5861_v35 = vmul.f32 %v4344_v37, %v6942_v55 }
 0xbbb   :  { %v5864_v0 = vmul.f32 %v4346_v51, %v6943_v11 }
 0xbbe   :  { %1792 = vperm.xlu2 %4191, %v5849_v45  }
 0xbbf   :  { %1786 = vperm.xlu0 %4193, %v5852_v18  }
 0xbc0   :  { %1789 = vperm.xlu1 %4192, %v5856_v61  }
 0xbc7   :  { %1795 = vperm.xlu0 %4193, %v5861_v35  }
 0xbc8   :  { %1798 = vperm.xlu1 %4192, %v5864_v0  }
 0xc10   :  { %v1784_v47 = vpop.permute.xlu2 %1783 }
 0xc11   :  { %v1802_v3 = vperm.slane %v1784_v47, %v5043_v20 }
 0xc18   :  { %v1793_v16 = vpop.permute.xlu2 %1792 }
 0xc19   :  { %v1805_v51 = vperm.slane %v1793_v16, %v5043_v20 }
 0xc29   :  { %v1781_v2 = vpop.permute.xlu0 %1780 }
 0xc2a   :  { %v1778_v4 = vpop.permute.xlu1 %1777  ;;  %v1801_v1 = vperm.slane %v1781_v2, %v5043_v20 }
 0xc2b   :  { %v1800_v43 = vperm.slane %v1778_v4, %v5043_v20 }
 0xc2d   :  { %v1808_v27 = vsel %vm377_vm2, %v1801_v1, %v1800_v43 }
 0xc2e   :  { %v1809_v34 = vsel %vm379_vm3, %v1802_v3, %v1808_v27 }
 0xc31   :  { %v1787_v46 = vpop.permute.xlu0 %1786 }
 0xc32   :  { %v1803_v28 = vperm.slane %v1787_v46, %v5043_v20  ;;  %v1790_v14 = vpop.permute.xlu1 %1789 }
 0xc33   :  { %v1804_v38 = vperm.slane %v1790_v14, %v5043_v20 }
 0xc34   :  { %v1810_v31 = vsel %vm381_vm4, %v1803_v28, %v1809_v34 }
 0xc35   :  { %v1811_v37 = vsel %vm383_vm5, %v1804_v38, %v1810_v31 }
 0xc36   :  { %v1812_v43 = vsel %vm6944_vm14, %v1805_v51, %v1811_v37 }
 0xc39   :  { %v1796_v2 = vpop.permute.xlu0 %1795 }
 0xc3a   :  { %v1806_v4 = vperm.slane %v1796_v2, %v5043_v20  ;;  %v1799_v1 = vpop.permute.xlu1 %1798 }
 0xc3b   :  { %v1807_v47 = vperm.slane %v1799_v1, %v5043_v20 }
 0xc3c   :  { %v1813_v46 = vsel %vm6945_vm15, %v1806_v4, %v1812_v43 }
 0xc3d   :  { %v1814_v27 = vsel %vm6946_vm9, %v1807_v47, %v1813_v46 }
 0xc3e   :  { %v1816_v3 = vsel %vm6947_vm10, %v1814_v27, 0.0 }
 0xc3f   :  { %1817 = vadd.xlane.f32.xlu2 %v1816_v3 }
 0xcb2   :  { %v1818_v28 = vpop.xlane.xlu2 %1817 }
 0xcb3   :  { %v1820_v14 = vperm.slane %v1818_v28, 0  ;;  %v1821_v34 = vperm.slane %v1818_v28, 1  ;;  %v5884_v38 = vperm.slane %v1818_v28, 2  ;;  %v5886_v31 = vperm.slane %v1818_v28, 3 }
 0xcb4   :  { %v5888_v16 = vperm.slane %v1818_v28, 4  ;;  %v5890_v2 = vperm.slane %v1818_v28, 5  ;;  %v5896_v47 = vperm.slane %v1818_v28, 7  ;;  %v5898_v27 = vperm.slane %v1818_v28, 6 }
 0xcb5   :  { %4347 = vrcp.f32 %v1820_v14  ;;  %v1860_v37 = vand.u32 2147483647, %v1821_v34  ;;  %v1862_v51 = vand.u32 2147483648, %v1821_v34  ;;  %v1845_v4 = vand.u32 2147483647, %v1820_v14 }
 0xcb6   :  { %4349 = vrcp.f32 %v1821_v34  ;;  %v1847_v43 = vand.u32 2147483648, %v1820_v14  ;;  %vm1856_vm12 = vweird.f32 %v1821_v34  ;;  %vm1841_vm11 = vweird.f32 %v1820_v14 }
 0xcb7   :  { %4351 = vrcp.f32 %v5884_v38  ;;  %vm5902_vm8 = vcmp.eq.f32.partialorder %v1860_v37, 8.507059e+37  ;;  %v1863_v62 = vor.u32 1.1754944e-38, %v1862_v51  ;;  %vm5908_vm7 = vcmp.eq.f32.partialorder %v1845_v4, 8.507059e+37 }
 0xcb8   :  { %4353 = vrcp.f32 %v5886_v31  ;;  %v1848_v20 = vor.u32 1.1754944e-38, %v1847_v43  ;;  %v1877_v12 = vand.u32 2147483648, %v5884_v38 }
 0xcb9   :  { %4355 = vrcp.f32 %v5888_v16 }
 0xcba   :  { %4357 = vrcp.f32 %v5890_v2 }
 0xcbb   :  { %v4348_v1 = vpop.eup %4347  ;;  %4359 = vrcp.f32 %v5896_v47 }
 0xcbc   :  { %v4350_v46 = vpop.eup %4349  ;;  %v1837_v3 = vmul.f32 %v4348_v1, %v1820_v14  ;;  %vm1842_vm6 = vweird.f32 %v4348_v1  ;;  %4361 = vrcp.f32 %v5898_v27 }
 0xcbd   :  { %v5900_v11 = vpop.eup %4351  ;;  %v1852_v55 = vmul.f32 %v4350_v46, %v1821_v34  ;;  %vm1857_vm13 = vweird.f32 %v4350_v46  ;;  %vm1843_vm14 = vmor %vm1841_vm11, %vm1842_vm6  ;;  %vm1886_vm11 = vweird.f32 %v5886_v31 }
 0xcbe   :  { %v5906_v23 = vpop.eup %4353  ;;  %v1838_v58 = vsub.f32 1.0, %v1837_v3  ;;  %v1867_v28 = vmul.f32 %v5900_v11, %v5884_v38  ;;  %vm1872_vm15 = vweird.f32 %v5900_v11  ;;  %vm1858_vm9 = vmor %vm1856_vm12, %vm1857_vm13  ;;  %vm1871_vm12 = vweird.f32 %v5884_v38 }
 0xcbf   :  { %v5914_v52 = vpop.eup %4355  ;;  %v1853_v37 = vsub.f32 1.0, %v1852_v55  ;;  %v1882_v9 = vmul.f32 %v5906_v23, %v5886_v31  ;;  %v1892_v55 = vand.u32 2147483648, %v5886_v31  ;;  %vm1887_vm10 = vweird.f32 %v5906_v23 }
 0xcc0   :  { %v5919_v30 = vpop.eup %4357  ;;  %v1839_v51 = vmul.f32 %v4348_v1, %v1838_v58  ;;  %v1868_v4 = vsub.f32 1.0, %v1867_v28  ;;  %v1897_v3 = vmul.f32 %v5914_v52, %v5888_v16  ;;  %vm1888_vm6 = vmor %vm1886_vm11, %vm1887_vm10  ;;  %vm1916_vm10 = vweird.f32 %v5890_v2 }
 0xcc1   :  { %v1854_v29 = vmul.f32 %v4350_v46, %v1853_v37  ;;  %v1883_v5 = vsub.f32 1.0, %v1882_v9  ;;  %v1912_v63 = vmul.f32 %v5919_v30, %v5890_v2  ;;  %v1893_v41 = vor.u32 1.1754944e-38, %v1892_v55 }
 0xcc2   :  { %v1840_v26 = vadd.f32 %v4348_v1, %v1839_v51  ;;  %v1869_v43 = vmul.f32 %v5900_v11, %v1868_v4  ;;  %v1898_v51 = vsub.f32 1.0, %v1897_v3  ;;  %v5935_v4 = vpop.eup %4359 }
 0xcc3   :  { %v1855_v58 = vadd.f32 %v4350_v46, %v1854_v29  ;;  %v1884_v28 = vmul.f32 %v5906_v23, %v1883_v5  ;;  %v1913_v48 = vsub.f32 1.0, %v1912_v63 }
 0xcc4   :  { %v1844_v9 = vsel %vm1843_vm14, %v4348_v1, %v1840_v26  ;;  %v1870_v37 = vadd.f32 %v5900_v11, %v1869_v43  ;;  %v1875_v26 = vand.u32 2147483647, %v5884_v38  ;;  %v1899_v6 = vmul.f32 %v5914_v52, %v1898_v51 }
 0xcc5   :  { %v1859_v19 = vsel %vm1858_vm9, %v4350_v46, %v1855_v58  ;;  %v1849_v29 = vsel %vm5908_vm7, %v1848_v20, %v1844_v9  ;;  %v1885_v14 = vadd.f32 %v5906_v23, %v1884_v28  ;;  %v1890_v46 = vand.u32 2147483647, %v5886_v31  ;;  %vm1873_vm7 = vmor %vm1871_vm12, %vm1872_vm15 }
 0xcc6   :  { %v1864_v5 = vsel %vm5902_vm8, %v1863_v62, %v1859_v19  ;;  %v1850_v34 = vmul.f32 %v1849_v29, %v5844_v49  ;;  %v1874_v20 = vsel %vm1873_vm7, %v5900_v11, %v1870_v37  ;;  %v5954_v19 = vpop.eup %4361  ;;  %v1914_v49 = vmul.f32 %v5919_v30, %v1913_v48 }
 0xcc7   :  { %v1865_v1 = vmul.f32 %v1864_v5, %v5840_v10  ;;  %v1889_v63 = vsel %vm1888_vm6, %v5906_v23, %v1885_v14  ;;  %v1878_v10 = vor.u32 1.1754944e-38, %v1877_v12  ;;  %v1942_v62 = vmul.f32 %v5935_v4, %v5896_v47 }
 0xcc8   :  { %1958 = vperm.xlu0 %4193, %v1850_v34   ;;  %vm1876_vm8 = vcmp.eq.f32.partialorder %v1875_v26, 8.507059e+37  ;;  %vm1891_vm13 = vcmp.eq.f32.partialorder %v1890_v46, 8.507059e+37  ;;  %v1922_v31 = vand.u32 2147483648, %v5890_v2  ;;  %v1900_v3 = vadd.f32 %v5914_v52, %v1899_v6 }
 0xcc9   :  { %1963 = vperm.xlu1 %4192, %v1865_v1   ;;  %v1879_v38 = vsel %vm1876_vm8, %v1878_v10, %v1874_v20  ;;  %v1894_v11 = vsel %vm1891_vm13, %v1893_v41, %v1889_v63  ;;  %vm1902_vm14 = vweird.f32 %v5914_v52  ;;  %v1927_v23 = vmul.f32 %v5954_v19, %v5898_v27 }
 0xcca   :  { %v1915_v12 = vadd.f32 %v5919_v30, %v1914_v49  ;;  %vm1917_vm15 = vweird.f32 %v5919_v30  ;;  %v1907_v48 = vand.u32 2147483648, %v5888_v16  ;;  %v1943_v55 = vsub.f32 1.0, %v1942_v62 }
 0xccb   :  { %v1880_v43 = vmul.f32 %v1879_v38, %v5837_v8  ;;  %vm1901_vm9 = vweird.f32 %v5888_v16  ;;  %v1905_v58 = vand.u32 2147483647, %v5888_v16  ;;  %v1928_v28 = vsub.f32 1.0, %v1927_v23  ;;  %vm1918_vm11 = vmor %vm1916_vm10, %vm1917_vm15 }
 0xccc   :  { %v1895_v9 = vmul.f32 %v1894_v11, %v5852_v18  ;;  %v1920_v37 = vand.u32 2147483647, %v5890_v2  ;;  %vm1903_vm12 = vmor %vm1901_vm9, %vm1902_vm14  ;;  %v1919_v8 = vsel %vm1918_vm11, %v5919_v30, %v1915_v12  ;;  %v1908_v14 = vor.u32 1.1754944e-38, %v1907_v48 }
 0xccd   :  { %v1904_v51 = vsel %vm1903_vm12, %v5914_v52, %v1900_v3  ;;  %v1929_v29 = vmul.f32 %v5954_v19, %v1928_v28  ;;  %v1944_v16 = vmul.f32 %v5935_v4, %v1943_v55  ;;  %v1923_v5 = vor.u32 1.1754944e-38, %v1922_v31 }
 0xcce   :  { %vm1906_vm7 = vcmp.eq.f32.partialorder %v1905_v58, 8.507059e+37  ;;  %vm1921_vm6 = vcmp.eq.f32.partialorder %v1920_v37, 8.507059e+37  ;;  %vm1932_vm8 = vweird.f32 %v5954_v19  ;;  %vm1947_vm13 = vweird.f32 %v5935_v4 }
 0xccf   :  { %v1909_v18 = vsel %vm1906_vm7, %v1908_v14, %v1904_v51  ;;  %v1924_v34 = vsel %vm1921_vm6, %v1923_v5, %v1919_v8  ;;  %v1930_v2 = vadd.f32 %v5954_v19, %v1929_v29  ;;  %v1945_v26 = vadd.f32 %v5935_v4, %v1944_v16  ;;  %v6002_v5 = vld [vmem:[#allocation16 + $0x20] sm:$0xff] }
 0xcd0   :  { %1968 = vperm.xlu0 %4193, %v1880_v43   ;;  %v1937_v52 = vand.u32 2147483648, %v5898_v27  ;;  %v1910_v30 = vmul.f32 %v1909_v18, %v5856_v61  ;;  %v1952_v1 = vand.u32 2147483648, %v5896_v47  ;;  %vm1931_vm14 = vweird.f32 %v5898_v27 }
 0xcd1   :  { %1973 = vperm.xlu1 %4192, %v1895_v9   ;;  %v1935_v46 = vand.u32 2147483647, %v5898_v27  ;;  %v1925_v20 = vmul.f32 %v1924_v34, %v5849_v45  ;;  %vm1946_vm15 = vweird.f32 %v5896_v47  ;;  %v1950_v6 = vand.u32 2147483647, %v5896_v47  ;;  %vm1933_vm9 = vmor %vm1931_vm14, %vm1932_vm8 }
 0xcd2   :  { %vm1948_vm10 = vmor %vm1946_vm15, %vm1947_vm13  ;;  %v1934_v63 = vsel %vm1933_vm9, %v5954_v19, %v1930_v2  ;;  %v1938_v10 = vor.u32 1.1754944e-38, %v1937_v52  ;;  %v1953_v49 = vor.u32 1.1754944e-38, %v1952_v1  ;;  %vm6952_vm7 = vcmask 1045509  }
 0xcd3   :  { %v1949_v61 = vsel %vm1948_vm10, %v5935_v4, %v1945_v26  ;;  %vm1936_vm12 = vcmp.eq.f32.partialorder %v1935_v46, 8.507059e+37  ;;  %vm1951_vm11 = vcmp.eq.f32.partialorder %v1950_v6, 8.507059e+37  ;;  %vm6953_vm6 = vcmask 1046534  }
 0xcd4   :  { %v1939_v62 = vsel %vm1936_vm12, %v1938_v10, %v1934_v63  ;;  %v1954_v27 = vsel %vm1951_vm11, %v1953_v49, %v1949_v61  ;;  %vm6954_vm8 = vcmask 1047559  }
 0xcd5   :  { %v1940_v45 = vmul.f32 %v1939_v62, %v5861_v35  ;;  %v1955_v41 = vmul.f32 %v1954_v27, %v5864_v0 }
 0xcd8   :  { %1978 = vperm.xlu0 %4193, %v1910_v30  }
 0xcd9   :  { %1983 = vperm.xlu1 %4192, %v1925_v20  }
 0xce0   :  { %1988 = vperm.xlu0 %4193, %v1940_v45  }
 0xce1   :  { %1993 = vperm.xlu1 %4192, %v1955_v41  }
 0xd3a   :  { %v1959_v47 = vpop.permute.xlu0 %1958 }
 0xd3b   :  { %v1964_v38 = vpop.permute.xlu1 %1963  ;;  %v1996_v31 = vmul.f32 %v5658_v36, %v1959_v47 }
 0xd3c   :  { %v1997_v19 = vmul.f32 %v5661_v56, %v1964_v38 }
 0xd3d   :  { %v2004_v4 = vsel %vm325_vm1, %v1996_v31, 0.0 }
 0xd3e   :  { %v2011_v11 = vsel %vm325_vm1, %v1997_v19, 0.0  ;;  %v2005_v3 = vrot.slane %v2004_v4, 4 }
 0xd3f   :  { %v2012_v23 = vrot.slane %v2011_v11, 4 }
 0xd40   :  { %v2006_v55 = vadd.f32 %v2005_v3, %v2004_v4 }
 0xd41   :  { %v2013_v43 = vadd.f32 %v2012_v23, %v2011_v11 }
 0xd42   :  { %v1969_v12 = vpop.permute.xlu0 %1968  ;;  %v2007_v9 = vrot.slane %v2006_v55, 2 }
 0xd43   :  { %v1974_v48 = vpop.permute.xlu1 %1973  ;;  %v1998_v35 = vmul.f32 %v5664_v53, %v1969_v12  ;;  %v2014_v51 = vrot.slane %v2013_v43, 2 }
 0xd44   :  { %v1999_v0 = vmul.f32 %v5670_v50, %v1974_v48  ;;  %v2008_v18 = vadd.f32 %v2007_v9, %v2006_v55 }
 0xd45   :  { %v2018_v58 = vsel %vm325_vm1, %v1998_v35, 0.0  ;;  %v2015_v34 = vadd.f32 %v2014_v51, %v2013_v43 }
 0xd46   :  { %v2025_v36 = vsel %vm325_vm1, %v1999_v0, 0.0  ;;  %v2019_v28 = vrot.slane %v2018_v58, 4  ;;  %v2009_v20 = vrot.slane %v2008_v18, 1 }
 0xd47   :  { %v2026_v56 = vrot.slane %v2025_v36, 4  ;;  %v2016_v63 = vrot.slane %v2015_v34, 1 }
 0xd48   :  { %v2020_v37 = vadd.f32 %v2019_v28, %v2018_v58  ;;  %v2010_v38 = vadd.f32 %v2009_v20, %v2008_v18 }
 0xd49   :  { %v2027_v29 = vadd.f32 %v2026_v56, %v2025_v36  ;;  %v2017_v4 = vadd.f32 %v2016_v63, %v2015_v34 }
 0xd4a   :  { %v2021_v8 = vrot.slane %v2020_v37, 2  ;;  %v1979_v14 = vpop.permute.xlu0 %1978 }
 0xd4b   :  { %v1984_v16 = vpop.permute.xlu1 %1983  ;;  %v2000_v53 = vmul.f32 %v6002_v5, %v1979_v14  ;;  %v2028_v2 = vrot.slane %v2027_v29, 2  ;;  %v2073_v58 = vsel %vm377_vm2, %v2017_v4, %v2010_v38 }
 0xd4c   :  { %v2001_v50 = vmul.f32 %v5676_v25, %v1984_v16  ;;  %v2022_v52 = vadd.f32 %v2021_v8, %v2020_v37  ;;  %v6008_v25 = vld [vmem:[#allocation16 + $0x30] sm:$0xff] }
 0xd4d   :  { %v2032_v26 = vsel %vm325_vm1, %v2000_v53, 0.0  ;;  %v2029_v61 = vadd.f32 %v2028_v2, %v2027_v29 }
 0xd4e   :  { %v2039_v30 = vsel %vm325_vm1, %v2001_v50, 0.0  ;;  %v2033_v1 = vrot.slane %v2032_v26, 4  ;;  %v2023_v49 = vrot.slane %v2022_v52, 1 }
 0xd4f   :  { %v2040_v46 = vrot.slane %v2039_v30, 4  ;;  %v2030_v11 = vrot.slane %v2029_v61, 1 }
 0xd50   :  { %v2034_v6 = vadd.f32 %v2033_v1, %v2032_v26  ;;  %v2024_v12 = vadd.f32 %v2023_v49, %v2022_v52  ;;  %v1569_v1 = vpop.f32.mrf.mxu0 }
 0xd51   :  { %v2041_v10 = vadd.f32 %v2040_v46, %v2039_v30  ;;  %v2031_v36 = vadd.f32 %v2030_v11, %v2029_v61  ;;  %v2061_v46 = vld [vmem:[#allocation5 + $0x20] sm:$0xff]  ;;  %v2062_v61 = vld [vmem:[#allocation5 + $0x28] sm:$0xff] }
 0xd52   :  { %v2035_v62 = vrot.slane %v2034_v6, 2  ;;  %v1989_v27 = vpop.permute.xlu0 %1988  ;;  %v2074_v9 = vsel %vm379_vm3, %v2024_v12, %v2073_v58  ;;  %v2063_v20 = vadd.f32 %v2061_v46, %v1569_v1 }
 0xd53   :  { %v2042_v45 = vrot.slane %v2041_v10, 2  ;;  %v1994_v41 = vpop.permute.xlu1 %1993  ;;  %v2002_v47 = vmul.f32 %v6008_v25, %v1989_v27  ;;  %v2075_v14 = vsel %vm381_vm4, %v2031_v36, %v2074_v9 }
 0xd54   :  { %v2036_v31 = vadd.f32 %v2035_v62, %v2034_v6  ;;  %v2003_v19 = vmul.f32 %v5680_v22, %v1994_v41 }
 0xd55   :  { %v2043_v3 = vadd.f32 %v2042_v45, %v2041_v10  ;;  %v2046_v23 = vsel %vm325_vm1, %v2002_v47, 0.0 }
 0xd56   :  { %v2037_v48 = vrot.slane %v2036_v31, 1  ;;  %v2053_v35 = vsel %vm325_vm1, %v2003_v19, 0.0  ;;  %v2047_v55 = vrot.slane %v2046_v23, 4 }
 0xd57   :  { %v2054_v0 = vrot.slane %v2053_v35, 4  ;;  %v2044_v28 = vrot.slane %v2043_v3, 1 }
 0xd58   :  { %v2048_v43 = vadd.f32 %v2047_v55, %v2046_v23  ;;  %v2038_v22 = vadd.f32 %v2037_v48, %v2036_v31 }
 0xd59   :  { %v2055_v56 = vadd.f32 %v2054_v0, %v2053_v35  ;;  %v2045_v8 = vadd.f32 %v2044_v28, %v2043_v3 }
 0xd5a   :  { %v2049_v37 = vrot.slane %v2048_v43, 2  ;;  %v2076_v53 = vsel %vm383_vm5, %v2038_v22, %v2075_v14  ;;  %v4608_v14 = vld [vmem:[#allocation11 + $0xa0] sm:$0xff] }
 0xd5b   :  { %v2056_v51 = vrot.slane %v2055_v56, 2  ;;  %v2077_v26 = vsel %vm6952_vm7, %v2045_v8, %v2076_v53  ;;  %v4607_v8 = vld [vmem:[#allocation11 + $0xb8] sm:$0xff]  ;;  %v6955_v53 = vld [vmem:[#allocation37_spill] sm:$0xff] }
 0xd5c   :  { %v2050_v29 = vadd.f32 %v2049_v37, %v2048_v43 }
 0xd5d   :  { %v2057_v16 = vadd.f32 %v2056_v51, %v2055_v56 }
 0xd5e   :  { %v2051_v18 = vrot.slane %v2050_v29, 1 }
 0xd5f   :  { %v2058_v50 = vrot.slane %v2057_v16, 1 }
 0xd60   :  { %v2052_v34 = vadd.f32 %v2051_v18, %v2050_v29  ;;  %v6957_v18 = vld [vmem:[#allocation39_spill] sm:$0xff] }
 0xd61   :  { %v2059_v2 = vadd.f32 %v2058_v50, %v2057_v16  ;;  %v4609_v16 = vld [vmem:[#allocation11 + $0x88] sm:$0xff]  ;;  %v6959_v50 = vld [vmem:[#allocation41_spill] sm:$0xff] }
 0xd62   :  { %v2078_v52 = vsel %vm6953_vm6, %v2052_v34, %v2077_v26  ;;  %v6961_v34 = vld [vmem:[#allocation43_spill] sm:$0xff]  ;;  %v6963_v26 = vld [vmem:[#allocation45_spill] sm:$0xff]  ;;  %vm6967_vm6 = vcmask 1045509  }
 0xd63   :  { %v2079_v30 = vsel %vm6954_vm8, %v2059_v2, %v2078_v52  ;;  %v6962_v2 = vld [vmem:[#allocation44_spill] sm:$0xff]  ;;  %v4614_v52 = vld [vmem:[#allocation11 + $0x10] sm:$0xff]  ;;  %vm6968_vm8 = vcmask 1046534  }
 0xd64   :  { %4143 = vmatmul.msk.f32.vlgmr.msra.gmra.mxu3 %vm325_vm1, %v2079_v30 }
 0xd65   :  { %2722 = vmatpush.msra.mxu3 %v5692_v7 }
 0xd67   :  { %2723 = vmatpush.msra.mxu3 %v5695_v60 }
 0xd69   :  { %2724 = vmatpush.msra.mxu3 %v5698_v44 }
 0xd6b   :  { %2725 = vmatpush.msra.mxu3 %v5701_v54  ;;  %v1589_v54 = vpop.f32.mrf.mxu1 }
 0xd6c   :  { %4144 = vmatmul.msk.f32.vlgmr.msrb.gmra.mxu3 %vm325_vm1, %v2079_v30 }
 0xd6d   :  { %2742 = vmatpush.msrb.mxu3 %v5705_v57  ;;  %v2064_v57 = vadd.f32 %v2062_v61, %v1589_v54 }
 0xd6f   :  { %2743 = vmatpush.msrb.mxu3 %v5708_v33 }
 0xd71   :  { %2744 = vmatpush.msrb.mxu3 %v5711_v39 }
 0xd73   :  { %2745 = vmatpush.msrb.mxu3 %v5714_v42 }
 0xde7   :  { %v2099_v7 = vpop.f32.mrf.mxu3 }
 0xde8   :  { %v2122_v6 = vadd.f32 %v2099_v7, %v2063_v20 }
 0xdea   :  { %v4145_v60 = vmul.f32 -1.442695, %v2122_v6  ;;  %v6057_v6 = vld [vmem:[#allocation14] sm:$0xff] }
 0xdec   :  { %4363 = vpow2.f32 %v4145_v60 }
 0xdef   :  { %v2119_v10 = vpop.f32.mrf.mxu3 }
 0xdf0   :  { %v2123_v33 = vadd.f32 %v2119_v10, %v2064_v57  ;;  %v6060_v10 = vld [vmem:[#allocation14 + $0x10] sm:$0xff] }
 0xdf2   :  { %v4364_v44 = vpop.eup %4363  ;;  %v4146_v11 = vmul.f32 -1.442695, %v2123_v33 }
 0xdf3   :  { %v2130_v63 = vadd.f32 1.0, %v4364_v44 }
 0xdf5   :  { %4365 = vrcp.f32 %v2130_v63  ;;  %v2143_v42 = vand.u32 2147483648, %v2130_v63  ;;  %v2141_v45 = vand.u32 2147483647, %v2130_v63  ;;  %vm2137_vm14 = vweird.f32 %v2130_v63 }
 0xdf6   :  { %4367 = vtanh.f32 %v2123_v33 }
 0xdf7   :  { %v2144_v47 = vor.u32 1.1754944e-38, %v2143_v42  ;;  %vm2142_vm9 = vcmp.eq.f32.partialorder %v2141_v45, 8.507059e+37  ;;  %4369 = vpow2.f32 %v4146_v11  ;;  %v6964_v45 = vld [vmem:[#allocation46_spill] sm:$0xff] }
 0xdfb   :  { %v4366_v49 = vpop.eup %4365 }
 0xdfc   :  { %v2133_v62 = vmul.f32 %v4366_v49, %v2130_v63  ;;  %vm2138_vm13 = vweird.f32 %v4366_v49  ;;  %v4368_v31 = vpop.eup %4367 }
 0xdfd   :  { %vm2139_vm15 = vmor %vm2137_vm14, %vm2138_vm13  ;;  %v4370_v3 = vpop.eup %4369  ;;  %vm6969_vm13 = vcmask 1047559   ;;  %vm6970_vm14 = vcmask 64512  }
 0xdfe   :  { %v2134_v39 = vsub.f32 1.0, %v2133_v62  ;;  %v2131_v23 = vadd.f32 1.0, %v4370_v3  ;;  %v6066_v62 = vld [vmem:[#allocation14 + $0x18] sm:$0xff] }
 0xe00   :  { %v2135_v27 = vmul.f32 %v4366_v49, %v2134_v39  ;;  %4371 = vrcp.f32 %v2131_v23  ;;  %v2158_v28 = vand.u32 2147483648, %v2131_v23  ;;  %vm2152_vm12 = vweird.f32 %v2131_v23 }
 0xe01   :  { %v2156_v56 = vand.u32 2147483647, %v2131_v23 }
 0xe02   :  { %v2136_v41 = vadd.f32 %v4366_v49, %v2135_v27  ;;  %v2159_v22 = vor.u32 1.1754944e-38, %v2158_v28 }
 0xe03   :  { %vm2157_vm7 = vcmp.eq.f32.partialorder %v2156_v56, 8.507059e+37 }
 0xe04   :  { %v2140_v38 = vsel %vm2139_vm15, %v4366_v49, %v2136_v41  ;;  %v6063_v49 = vld [vmem:[#allocation14 + $0x8] sm:$0xff]  ;;  %vm6979_vm15 = vmmov %vm6967_vm6 }
 0xe05   :  { %v2145_v19 = vsel %vm2142_vm9, %v2144_v47, %v2140_v38  ;;  %v6070_v38 = vld [vmem:[#allocation14 + $0x20] sm:$0xff]  ;;  %vm6980_vm9 = vmmov %vm6968_vm8 }
 0xe06   :  { %v2164_v4 = vmul.f32 %v4368_v31, %v2145_v19  ;;  %v4372_v12 = vpop.eup %4371  ;;  %v2163_v0 = vmul.f32 %v2145_v19, %v5719_v24 }
 0xe07   :  { %v2148_v48 = vmul.f32 %v4372_v12, %v2131_v23  ;;  %vm2153_vm10 = vweird.f32 %v4372_v12 }
 0xe08   :  { %2166 = vrot.lane.b32.xlu0 %v2164_v4, %s4921_s7  ;;  %vm2154_vm11 = vmor %vm2152_vm12, %vm2153_vm10 }
 0xe09   :  { %v2149_v35 = vsub.f32 1.0, %v2148_v48  ;;  %vm6981_vm10 = vmmov %vm6969_vm13 }
 0xe0a   :  { %vm6982_vm12 = vmmov %vm6970_vm14 }
 0xe0b   :  { %v2150_v55 = vmul.f32 %v4372_v12, %v2149_v35 }
 0xe0d   :  { %v2151_v36 = vadd.f32 %v4372_v12, %v2150_v55 }
 0xe0f   :  { %v2155_v9 = vsel %vm2154_vm11, %v4372_v12, %v2151_v36 }
 0xe10   :  { %v2160_v51 = vsel %vm2157_vm7, %v2159_v22, %v2155_v9 }
 0xe7a   :  { %v2167_v43 = vpop.permute.xlu0 %2166 }
 0xe7b   :  { %v6033_v58 = vadd.f32 %v2167_v43, %v2163_v0  ;;  %v6079_v43 = vld [vmem:[#allocation14 + $0x28] sm:$0xff] }
 0xe7d   :  { %4373 = vtanh.f32 %v6033_v58 }
 0xe83   :  { %v4374_v37 = vpop.eup %4373 }
 0xe84   :  { %v2171_v29 = vmul.f32 %v4374_v37, %v2160_v51  ;;  %v6084_v51 = vld [vmem:[#allocation14 + $0x30] sm:$0xff] }
 0xe86   :  { %2173 = vrot.lane.b32.xlu1 %v2171_v29, %s4921_s7 }
 0xef8   :  { %v2174_v24 = vpop.permute.xlu1 %2173 }
 0xef9   :  { %2177 = vst.msk [vmem:[#allocation17 + $0x10] sm:$0xff] %vm152_vm0, %v2174_v24  ;;  %4147 = vmatmul.msk.f32.vlgmr.msrb.gmra.mxu0 %vm152_vm0, %v2174_v24  ;;  %4148 = vmatmul.msk.f32.vlgmr.msrb.gmra.mxu1 %vm152_vm0, %v2174_v24 }
 0xefa   :  { %4149 = vmatmul.msk.f32.vlgmr.msrb.gmra.mxu2 %vm152_vm0, %v2174_v24  ;;  %3444 = vmatpush.msrb.mxu0 %v5727_v40  ;;  %v4610_v40 = vld [vmem:[#allocation11 + $0x70] sm:$0xff] }
 0xefb   :  { %3464 = vmatpush.msrb.mxu1 %v5730_v13  ;;  %3484 = vmatpush.msrb.mxu2 %v4607_v8  ;;  %v6956_v13 = vld [vmem:[#allocation38_spill] sm:$0xff] }
 0xefc   :  { %3445 = vmatpush.msrb.mxu0 %v5734_v15  ;;  %v4611_v15 = vld [vmem:[#allocation11 + $0x58] sm:$0xff] }
 0xefd   :  { %3465 = vmatpush.msrb.mxu1 %v5737_v32  ;;  %3485 = vmatpush.msrb.mxu2 %v4608_v14  ;;  %v6958_v32 = vld [vmem:[#allocation40_spill] sm:$0xff] }
 0xefe   :  { %3446 = vmatpush.msrb.mxu0 %v5741_v21  ;;  %v4612_v21 = vld [vmem:[#allocation11 + $0x40] sm:$0xff] }
 0xeff   :  { %3466 = vmatpush.msrb.mxu1 %v5744_v59  ;;  %3486 = vmatpush.msrb.mxu2 %v4609_v16  ;;  %v6960_v59 = vld [vmem:[#allocation42_spill] sm:$0xff] }
 0xf00   :  { %3447 = vmatpush.msrb.mxu0 %v5748_v17  ;;  %v4613_v17 = vld [vmem:[#allocation11 + $0x28] sm:$0xff] }
 0xf01   :  { %3467 = vmatpush.msrb.mxu1 %v6955_v53  ;;  %3487 = vmatpush.msrb.mxu2 %v4610_v40  ;;  %v6091_v53 = vld [vmem:[%s6849_s8] ss:$0 sm:$0xff] }
 0xf02   :  { %3448 = vmatpush.msrb.mxu0 %v6956_v13  ;;  %v6094_v13 = vld [vmem:[#allocation14 + $0x38] sm:$0xff] }
 0xf03   :  { %3468 = vmatpush.msrb.mxu1 %v6957_v18  ;;  %3488 = vmatpush.msrb.mxu2 %v4611_v15 }
 0xf04   :  { %3449 = vmatpush.msrb.mxu0 %v6958_v32 }
 0xf05   :  { %3469 = vmatpush.msrb.mxu1 %v6959_v50  ;;  %3489 = vmatpush.msrb.mxu2 %v4612_v21 }
 0xf06   :  { %3450 = vmatpush.msrb.mxu0 %v6960_v59 }
 0xf07   :  { %3470 = vmatpush.msrb.mxu1 %v6961_v34  ;;  %3490 = vmatpush.msrb.mxu2 %v4613_v17 }
 0xf08   :  { %3451 = vmatpush.msrb.mxu0 %v6962_v2 }
 0xf09   :  { %3471 = vmatpush.msrb.mxu1 %v6963_v26  ;;  %3491 = vmatpush.msrb.mxu2 %v4614_v52 }
 0xf7d   :  { %v2237_v30 = vpop.f32.mrf.mxu2 }
 0xf7e   :  { %v2248_v1 = vperm.slane %v2237_v30, 0  ;;  %v2242_v46 = vrot.slane %v2237_v30, 2  ;;  %v2241_v20 = vrot.slane %v2237_v30, 1  ;;  %v2243_v7 = vrot.slane %v2237_v30, 3 }
 0xf7f   :  { %v2244_v61 = vrot.slane %v2237_v30, 4  ;;  %v2245_v19 = vrot.slane %v2237_v30, 5  ;;  %v2246_v28 = vrot.slane %v2237_v30, 6  ;;  %v2247_v24 = vrot.slane %v2237_v30, 7 }
 0xf80   :  { %v2264_v60 = vadd.f32 %v6057_v6, %v2248_v1  ;;  %v2250_v44 = vperm.slane %v2242_v46, 0  ;;  %v2249_v63 = vperm.slane %v2241_v20, 0  ;;  %v2251_v54 = vperm.slane %v2243_v7, 0  ;;  %v6965_v20 = vld [vmem:[#allocation27_spill] sm:$0xff] }
 0xf81   :  { %v2252_v42 = vperm.slane %v2244_v61, 0  ;;  %v2253_v55 = vperm.slane %v2245_v19, 0  ;;  %v2254_v22 = vperm.slane %v2246_v28, 0  ;;  %v2255_v16 = vperm.slane %v2247_v24, 0 }
 0xf82   :  { %4375 = vtanh.f32 %v2264_v60  ;;  %v2266_v57 = vadd.f32 %v6060_v10, %v2250_v44  ;;  %v2265_v33 = vadd.f32 %v6063_v49, %v2249_v63  ;;  %v2267_v39 = vadd.f32 %v6066_v62, %v2251_v54  ;;  %v6966_v54 = vld [vmem:[#allocation28_spill] sm:$0xff] }
 0xf83   :  { %v2268_v31 = vadd.f32 %v6070_v38, %v2252_v42  ;;  %v2269_v36 = vadd.f32 %v6079_v43, %v2253_v55  ;;  %v2270_v29 = vadd.f32 %v6084_v51, %v2254_v22  ;;  %v2271_v18 = vadd.f32 %v6094_v13, %v2255_v16 }
 0xf84   :  { %4377 = vtanh.f32 %v2266_v57 }
 0xf85   :  { %4379 = vtanh.f32 %v2265_v33 }
 0xf86   :  { %4381 = vtanh.f32 %v2267_v39 }
 0xf87   :  { %4383 = vtanh.f32 %v2268_v31 }
 0xf88   :  { %v4376_v27 = vpop.eup %4375  ;;  %4385 = vtanh.f32 %v2269_v36 }
 0xf89   :  { %v2280_v41 = vmul.f32 %v6964_v45, %v4376_v27  ;;  %4387 = vtanh.f32 %v2270_v29 }
 0xf8a   :  { %v4378_v47 = vpop.eup %4377  ;;  %4389 = vtanh.f32 %v2271_v18 }
 0xf8b   :  { %v4380_v4 = vpop.eup %4379  ;;  %v2288_v11 = vsel %vm325_vm1, %v2280_v41, 0.0  ;;  %v2282_v3 = vmul.f32 %v6964_v45, %v4378_v47 }
 0xf8c   :  { %v4382_v23 = vpop.eup %4381  ;;  %2289 = vadd.xlane.f32.xlu2 %v2288_v11  ;;  %v2281_v12 = vmul.f32 %v6964_v45, %v4380_v4 }
 0xf8d   :  { %v2294_v48 = vsel %vm325_vm1, %v2282_v3, 0.0  ;;  %v2283_v0 = vmul.f32 %v6964_v45, %v4382_v23  ;;  %v4384_v9 = vpop.eup %4383 }
 0xf8e   :  { %2295 = vadd.xlane.f32.xlu1 %v2294_v48  ;;  %v2291_v35 = vsel %vm325_vm1, %v2281_v12, 0.0  ;;  %v2284_v37 = vmul.f32 %v6964_v45, %v4384_v9  ;;  %v4386_v14 = vpop.eup %4385 }
 0xf8f   :  { %2292 = vadd.xlane.f32.xlu0 %v2291_v35  ;;  %v2297_v56 = vsel %vm325_vm1, %v2283_v0, 0.0  ;;  %v2285_v40 = vmul.f32 %v6091_v53, %v4386_v14  ;;  %v4388_v32 = vpop.eup %4387 }
 0xf90   :  { %v2300_v8 = vsel %vm325_vm1, %v2284_v37, 0.0  ;;  %v2286_v50 = vmul.f32 %v6091_v53, %v4388_v32  ;;  %v4390_v59 = vpop.eup %4389 }
 0xf91   :  { %v2303_v15 = vsel %vm325_vm1, %v2285_v40, 0.0  ;;  %v2287_v34 = vmul.f32 %v6091_v53, %v4390_v59 }
 0xf92   :  { %v2306_v21 = vsel %vm325_vm1, %v2286_v50, 0.0 }
 0xf93   :  { %v2309_v17 = vsel %vm325_vm1, %v2287_v34, 0.0 }
 0xf94   :  { %2298 = vadd.xlane.f32.xlu2 %v2297_v56 }
 0xf9c   :  { %2301 = vadd.xlane.f32.xlu2 %v2300_v8 }
 0xfa4   :  { %2304 = vadd.xlane.f32.xlu2 %v2303_v15 }
 0xfac   :  { %2307 = vadd.xlane.f32.xlu2 %v2306_v21 }
 0xfb4   :  { %2310 = vadd.xlane.f32.xlu2 %v2309_v17 }
 0xfff   :  { %v2290_v2 = vpop.xlane.xlu2 %2289 }
0x1000   :  { %v2312_v60 = vadd.f32 %v2290_v2, %v6965_v20 }
0x1001   :  { %v2296_v46 = vpop.xlane.xlu1 %2295 }
0x1002   :  { %v2293_v1 = vpop.xlane.xlu0 %2292  ;;  %v2314_v44 = vadd.f32 %v2296_v46, %v6965_v20  ;;  %v2328_v39 = vperm.slane %v2312_v60, %v6966_v54 }
0x1003   :  { %v2313_v7 = vadd.f32 %v2293_v1, %v6965_v20 }
0x1004   :  { %v2330_v27 = vperm.slane %v2314_v44, %v6966_v54 }
0x1005   :  { %v2329_v61 = vperm.slane %v2313_v7, %v6966_v54 }
0x1007   :  { %v2299_v26 = vpop.xlane.xlu2 %2298  ;;  %v2336_v41 = vsel %vm377_vm2, %v2329_v61, %v2328_v39 }
0x1008   :  { %v2315_v57 = vadd.f32 %v2299_v26, %v6965_v20  ;;  %v2337_v4 = vsel %vm379_vm3, %v2330_v27, %v2336_v41 }
0x100a   :  { %v2331_v47 = vperm.slane %v2315_v57, %v6966_v54 }
0x100c   :  { %v2338_v23 = vsel %vm381_vm4, %v2331_v47, %v2337_v4  ;;  %v6975_v4 = vld [vmem:[#allocation36_spill] sm:$0xff] }
0x100f   :  { %v2302_v52 = vpop.xlane.xlu2 %2301 }
0x1010   :  { %v2316_v33 = vadd.f32 %v2302_v52, %v6965_v20 }
0x1012   :  { %v2332_v31 = vperm.slane %v2316_v33, %v6966_v54 }
0x1014   :  { %v2339_v48 = vsel %vm383_vm5, %v2332_v31, %v2338_v23  ;;  %v6974_v31 = vld [vmem:[#allocation30_spill] sm:$0xff] }
0x1017   :  { %v2305_v30 = vpop.xlane.xlu2 %2304 }
0x1018   :  { %v2317_v42 = vadd.f32 %v2305_v30, %v6965_v20 }
0x101a   :  { %v2333_v19 = vperm.slane %v2317_v42, %v6966_v54 }
0x101c   :  { %v2340_v55 = vsel %vm6967_vm6, %v2333_v19, %v2339_v48 }
0x101f   :  { %v2308_v63 = vpop.xlane.xlu2 %2307 }
0x1020   :  { %v2318_v45 = vadd.f32 %v2308_v63, %v6965_v20  ;;  %v6972_v63 = vld [vmem:[#allocation31_spill] sm:$0xff] }
0x1022   :  { %v2334_v11 = vperm.slane %v2318_v45, %v6966_v54 }
0x1024   :  { %v2341_v0 = vsel %vm6968_vm8, %v2334_v11, %v2340_v55 }
0x1027   :  { %v2311_v3 = vpop.xlane.xlu2 %2310 }
0x1028   :  { %v2319_v12 = vadd.f32 %v2311_v3, %v6965_v20  ;;  %v6976_v3 = vld [vmem:[#allocation33_spill] sm:$0xff] }
0x102a   :  { %v2335_v35 = vperm.slane %v2319_v12, %v6966_v54 }
0x102c   :  { %v2342_v36 = vsel %vm6969_vm13, %v2335_v35, %v2341_v0  ;;  %v6977_v35 = vld [vmem:[#allocation35_spill] sm:$0xff]  ;;  %v6978_v0 = vld [vmem:[#allocation34_spill] sm:$0xff] }
0x102d   :  { %v2344_v28 = vsel %vm6970_vm14, %v2342_v36, -inf }
0x102e   :  { %2345 = vmax.xlane.f32.xlu0 %v2344_v28 }
0x10a1   :  { %v2346_v56 = vpop.xlane.xlu0 %2345 }
0x10a2   :  { %v2350_v9 = vperm.slane %v2346_v56, 2  ;;  %v2349_v22 = vperm.slane %v2346_v56, 1  ;;  %v2348_v37 = vperm.slane %v2346_v56, 0  ;;  %v2351_v29 = vperm.slane %v2346_v56, 3 }
0x10a3   :  { %v2353_v24 = vperm.slane %v2346_v56, 5  ;;  %v2352_v40 = vperm.slane %v2346_v56, 4  ;;  %v2354_v17 = vperm.slane %v2346_v56, 6  ;;  %v2355_v52 = vperm.slane %v2346_v56, 7 }
0x10a4   :  { %v2366_v8 = vsub.f32 %v2314_v44, %v2350_v9  ;;  %v2365_v14 = vsub.f32 %v2313_v7, %v2349_v22  ;;  %v2364_v16 = vsub.f32 %v2312_v60, %v2348_v37  ;;  %v2367_v50 = vsub.f32 %v2315_v57, %v2351_v29  ;;  %v6971_v7 = vld [vmem:[#allocation29_spill] sm:$0xff] }
0x10a5   :  { %v2369_v21 = vsub.f32 %v2317_v42, %v2353_v24  ;;  %v2368_v59 = vsub.f32 %v2316_v33, %v2352_v40  ;;  %v2370_v1 = vsub.f32 %v2318_v45, %v2354_v17  ;;  %v2371_v57 = vsub.f32 %v2319_v12, %v2355_v52  ;;  %v6973_v33 = vld [vmem:[#allocation32_spill] sm:$0xff] }
0x10a6   :  { %v2376_v18 = vmul.f32 1.442695, %v2366_v8  ;;  %v2374_v15 = vmul.f32 1.442695, %v2365_v14  ;;  %v2372_v32 = vmul.f32 1.442695, %v2364_v16 }
0x10a7   :  { %v2378_v34 = vmul.f32 1.442695, %v2367_v50  ;;  %v2382_v2 = vmul.f32 1.442695, %v2369_v21  ;;  %v2380_v26 = vmul.f32 1.442695, %v2368_v59 }
0x10a8   :  { %4391 = vpow2.f32 %v2376_v18  ;;  %v2384_v42 = vmul.f32 1.442695, %v2370_v1  ;;  %v2386_v45 = vmul.f32 1.442695, %v2371_v57 }
0x10a9   :  { %4393 = vpow2.f32 %v2374_v15 }
0x10aa   :  { %4395 = vpow2.f32 %v2372_v32 }
0x10ab   :  { %4397 = vpow2.f32 %v2378_v34 }
0x10ac   :  { %4399 = vpow2.f32 %v2382_v2 }
0x10ad   :  { %4401 = vpow2.f32 %v2380_v26 }
0x10ae   :  { %v4392_v30 = vpop.eup %4391  ;;  %4403 = vpow2.f32 %v2384_v42 }
0x10af   :  { %v4394_v46 = vpop.eup %4393  ;;  %v6127_v60 = vmul.f32 %v4392_v30, %v6971_v7  ;;  %4405 = vpow2.f32 %v2386_v45 }
0x10b0   :  { %v4396_v44 = vpop.eup %4395  ;;  %v6130_v61 = vmul.f32 %v4394_v46, %v6972_v63 }
0x10b1   :  { %2411 = vperm.xlu0 %4193, %v6127_v60   ;;  %v6134_v39 = vmul.f32 %v4396_v44, %v6973_v33  ;;  %v4398_v27 = vpop.eup %4397 }
0x10b2   :  { %2408 = vperm.xlu2 %4191, %v6130_v61   ;;  %v4400_v41 = vpop.eup %4399  ;;  %v6139_v19 = vmul.f32 %v4398_v27, %v6974_v31 }
0x10b3   :  { %2405 = vperm.xlu1 %4192, %v6134_v39   ;;  %v4402_v47 = vpop.eup %4401  ;;  %v6142_v11 = vmul.f32 %v4400_v41, %v6975_v4 }
0x10b4   :  { %v6146_v23 = vmul.f32 %v4402_v47, %v6976_v3  ;;  %v4404_v12 = vpop.eup %4403 }
0x10b5   :  { %v4406_v48 = vpop.eup %4405  ;;  %v6151_v55 = vmul.f32 %v4404_v12, %v6977_v35 }
0x10b6   :  { %v6155_v36 = vmul.f32 %v4406_v48, %v6978_v0 }
0x10b9   :  { %2414 = vperm.xlu0 %4193, %v6139_v19  }
0x10ba   :  { %2420 = vperm.xlu2 %4191, %v6142_v11  }
0x10bb   :  { %2417 = vperm.xlu1 %4192, %v6146_v23  }
0x10c1   :  { %2423 = vperm.xlu0 %4193, %v6151_v55  }
0x10c3   :  { %2426 = vperm.xlu1 %4192, %v6155_v36  }
0x110c   :  { %v2409_v9 = vpop.permute.xlu2 %2408 }
0x110d   :  { %v2429_v37 = vperm.slane %v2409_v9, %v6966_v54 }
0x1114   :  { %v2421_v32 = vpop.permute.xlu2 %2420 }
0x1115   :  { %v2433_v21 = vperm.slane %v2421_v32, %v6966_v54 }
0x1123   :  { %v2412_v28 = vpop.permute.xlu0 %2411 }
0x1124   :  { %v2430_v29 = vperm.slane %v2412_v28, %v6966_v54 }
0x1125   :  { %v2406_v56 = vpop.permute.xlu1 %2405 }
0x1126   :  { %v2428_v22 = vperm.slane %v2406_v56, %v6966_v54 }
0x1128   :  { %v2436_v24 = vsel %vm377_vm2, %v2429_v37, %v2428_v22 }
0x1129   :  { %v2437_v40 = vsel %vm379_vm3, %v2430_v29, %v2436_v24 }
0x112b   :  { %v2415_v8 = vpop.permute.xlu0 %2414 }
0x112c   :  { %v2431_v14 = vperm.slane %v2415_v8, %v6966_v54 }
0x112d   :  { %v2418_v16 = vpop.permute.xlu1 %2417 }
0x112e   :  { %v2432_v18 = vperm.slane %v2418_v16, %v6966_v54  ;;  %v2438_v15 = vsel %vm381_vm4, %v2431_v14, %v2437_v40 }
0x1130   :  { %v2439_v50 = vsel %vm383_vm5, %v2432_v18, %v2438_v15 }
0x1131   :  { %v2440_v2 = vsel %vm6979_vm15, %v2433_v21, %v2439_v50 }
0x1133   :  { %v2424_v59 = vpop.permute.xlu0 %2423 }
0x1134   :  { %v2434_v34 = vperm.slane %v2424_v59, %v6966_v54 }
0x1135   :  { %v2427_v17 = vpop.permute.xlu1 %2426 }
0x1136   :  { %v2435_v26 = vperm.slane %v2427_v17, %v6966_v54  ;;  %v2441_v52 = vsel %vm6980_vm9, %v2434_v34, %v2440_v2 }
0x1138   :  { %v2442_v30 = vsel %vm6981_vm10, %v2435_v26, %v2441_v52 }
0x1139   :  { %v2444_v1 = vsel %vm6982_vm12, %v2442_v30, 0.0 }
0x113a   :  { %2445 = vadd.xlane.f32.xlu2 %v2444_v1 }
0x11ad   :  { %v2446_v46 = vpop.xlane.xlu2 %2445 }
0x11ae   :  { %v2448_v44 = vperm.slane %v2446_v46, 0  ;;  %v2449_v57 = vperm.slane %v2446_v46, 1  ;;  %v6174_v42 = vperm.slane %v2446_v46, 2  ;;  %v6176_v27 = vperm.slane %v2446_v46, 3 }
0x11af   :  { %v6178_v45 = vperm.slane %v2446_v46, 4  ;;  %v6180_v41 = vperm.slane %v2446_v46, 5  ;;  %v6186_v56 = vperm.slane %v2446_v46, 7  ;;  %v6188_v37 = vperm.slane %v2446_v46, 6 }
0x11b0   :  { %4407 = vrcp.f32 %v2448_v44  ;;  %v2488_v47 = vand.u32 2147483647, %v2449_v57  ;;  %v2490_v12 = vand.u32 2147483648, %v2449_v57  ;;  %v2473_v48 = vand.u32 2147483647, %v2448_v44 }
0x11b1   :  { %4409 = vrcp.f32 %v2449_v57  ;;  %v2475_v9 = vand.u32 2147483648, %v2448_v44  ;;  %vm2484_vm11 = vweird.f32 %v2449_v57  ;;  %vm2469_vm6 = vweird.f32 %v2448_v44 }
0x11b2   :  { %4411 = vrcp.f32 %v6174_v42  ;;  %vm6192_vm7 = vcmp.eq.f32.partialorder %v2488_v47, 8.507059e+37  ;;  %v2491_v40 = vor.u32 1.1754944e-38, %v2490_v12  ;;  %vm6198_vm8 = vcmp.eq.f32.partialorder %v2473_v48, 8.507059e+37 }
0x11b3   :  { %4413 = vrcp.f32 %v6176_v27  ;;  %v2476_v59 = vor.u32 1.1754944e-38, %v2475_v9  ;;  %v2520_v12 = vand.u32 2147483648, %v6176_v27  ;;  %v2505_v9 = vand.u32 2147483648, %v6174_v42 }
0x11b4   :  { %4415 = vrcp.f32 %v6178_v45 }
0x11b5   :  { %4417 = vrcp.f32 %v6180_v41 }
0x11b6   :  { %v4408_v28 = vpop.eup %4407  ;;  %4419 = vrcp.f32 %v6186_v56 }
0x11b7   :  { %v4410_v22 = vpop.eup %4409  ;;  %v2465_v29 = vmul.f32 %v4408_v28, %v2448_v44  ;;  %vm2470_vm13 = vweird.f32 %v4408_v28  ;;  %4421 = vrcp.f32 %v6188_v37 }
0x11b8   :  { %v6190_v24 = vpop.eup %4411  ;;  %v2480_v8 = vmul.f32 %v4410_v22, %v2449_v57  ;;  %vm2485_vm14 = vweird.f32 %v4410_v22  ;;  %vm2471_vm15 = vmor %vm2469_vm6, %vm2470_vm13  ;;  %vm2514_vm6 = vweird.f32 %v6176_v27 }
0x11b9   :  { %v6196_v16 = vpop.eup %4413  ;;  %v2466_v18 = vsub.f32 1.0, %v2465_v29  ;;  %v2495_v32 = vmul.f32 %v6190_v24, %v6174_v42  ;;  %vm2500_vm9 = vweird.f32 %v6190_v24  ;;  %vm2486_vm10 = vmor %vm2484_vm11, %vm2485_vm14  ;;  %vm2499_vm11 = vweird.f32 %v6174_v42 }
0x11ba   :  { %v6204_v50 = vpop.eup %4415  ;;  %v2481_v21 = vsub.f32 1.0, %v2480_v8  ;;  %v2510_v34 = vmul.f32 %v6196_v16, %v6176_v27  ;;  %vm2515_vm12 = vweird.f32 %v6196_v16 }
0x11bb   :  { %v6209_v17 = vpop.eup %4417  ;;  %v2467_v2 = vmul.f32 %v4408_v28, %v2466_v18  ;;  %v2496_v26 = vsub.f32 1.0, %v2495_v32  ;;  %v2525_v52 = vmul.f32 %v6204_v50, %v6178_v45  ;;  %vm2516_vm13 = vmor %vm2514_vm6, %vm2515_vm12  ;;  %vm2544_vm12 = vweird.f32 %v6180_v41 }
0x11bc   :  { %v2482_v30 = vmul.f32 %v4410_v22, %v2481_v21  ;;  %v2511_v1 = vsub.f32 1.0, %v2510_v34  ;;  %v2540_v46 = vmul.f32 %v6209_v17, %v6180_v41  ;;  %v6225_v34 = vpop.eup %4419 }
0x11bd   :  { %v2468_v47 = vadd.f32 %v4408_v28, %v2467_v2  ;;  %v2497_v48 = vmul.f32 %v6190_v24, %v2496_v26  ;;  %v2526_v21 = vsub.f32 1.0, %v2525_v52 }
0x11be   :  { %v2483_v29 = vadd.f32 %v4410_v22, %v2482_v30  ;;  %v2512_v8 = vmul.f32 %v6196_v16, %v2511_v1  ;;  %v2541_v30 = vsub.f32 1.0, %v2540_v46 }
0x11bf   :  { %v2472_v18 = vsel %vm2471_vm15, %v4408_v28, %v2468_v47  ;;  %v2498_v32 = vadd.f32 %v6190_v24, %v2497_v48  ;;  %v2503_v28 = vand.u32 2147483647, %v6174_v42  ;;  %v2506_v42 = vor.u32 1.1754944e-38, %v2505_v9 }
0x11c0   :  { %v2487_v2 = vsel %vm2486_vm10, %v4410_v22, %v2483_v29  ;;  %v2477_v26 = vsel %vm6198_vm8, %v2476_v59, %v2472_v18  ;;  %v2513_v44 = vadd.f32 %v6196_v16, %v2512_v8  ;;  %v2518_v22 = vand.u32 2147483647, %v6176_v27  ;;  %vm2501_vm8 = vmor %vm2499_vm11, %vm2500_vm9 }
0x11c1   :  { %v2492_v1 = vsel %vm6192_vm7, %v2491_v40, %v2487_v2  ;;  %v2478_v57 = vmul.f32 %v2477_v26, %v6134_v39  ;;  %v2502_v14 = vsel %vm2501_vm8, %v6190_v24, %v2498_v32  ;;  %v2527_v39 = vmul.f32 %v6204_v50, %v2526_v21  ;;  %v6244_v40 = vpop.eup %4421 }
0x11c2   :  { %v2493_v52 = vmul.f32 %v2492_v1, %v6130_v61  ;;  %v2517_v61 = vsel %vm2516_vm13, %v6196_v16, %v2513_v44  ;;  %v2542_v15 = vmul.f32 %v6209_v17, %v2541_v30  ;;  %v2570_v27 = vmul.f32 %v6225_v34, %v6186_v56 }
0x11c3   :  { %2586 = vperm.xlu0 %4193, %v2478_v57   ;;  %v2521_v59 = vor.u32 1.1754944e-38, %v2520_v12  ;;  %vm2504_vm7 = vcmp.eq.f32.partialorder %v2503_v28, 8.507059e+37  ;;  %vm2519_vm14 = vcmp.eq.f32.partialorder %v2518_v22, 8.507059e+37  ;;  %v2550_v47 = vand.u32 2147483648, %v6180_v41 }
0x11c4   :  { %2591 = vperm.xlu1 %4192, %v2493_v52   ;;  %v2507_v46 = vsel %vm2504_vm7, %v2506_v42, %v2502_v14  ;;  %v2528_v48 = vadd.f32 %v6204_v50, %v2527_v39  ;;  %vm2530_vm15 = vweird.f32 %v6204_v50  ;;  %v2555_v16 = vmul.f32 %v6244_v40, %v6188_v37 }
0x11c5   :  { %v2522_v24 = vsel %vm2519_vm14, %v2521_v59, %v2517_v61  ;;  %v2543_v9 = vadd.f32 %v6209_v17, %v2542_v15  ;;  %vm2545_vm9 = vweird.f32 %v6209_v17  ;;  %v2535_v29 = vand.u32 2147483648, %v6178_v45 }
0x11c6   :  { %v2571_v12 = vsub.f32 1.0, %v2570_v27  ;;  %v2508_v8 = vmul.f32 %v2507_v46, %v6127_v60  ;;  %vm2529_vm10 = vweird.f32 %v6178_v45  ;;  %v2533_v18 = vand.u32 2147483647, %v6178_v45  ;;  %vm2546_vm6 = vmor %vm2544_vm12, %vm2545_vm9 }
0x11c7   :  { %v2556_v32 = vsub.f32 1.0, %v2555_v16  ;;  %v2523_v21 = vmul.f32 %v2522_v24, %v6139_v19  ;;  %v2548_v2 = vand.u32 2147483647, %v6180_v41  ;;  %vm2531_vm11 = vmor %vm2529_vm10, %vm2530_vm15  ;;  %v2547_v60 = vsel %vm2546_vm6, %v6209_v17, %v2543_v9  ;;  %v6287_v24 = vld [vmem:[#allocation16 + $0x8] sm:$0xff] }
0x11c8   :  { %v2532_v26 = vsel %vm2531_vm11, %v6204_v50, %v2528_v48  ;;  %v2536_v30 = vor.u32 1.1754944e-38, %v2535_v29  ;;  %v2572_v45 = vmul.f32 %v6225_v34, %v2571_v12  ;;  %v2551_v1 = vor.u32 1.1754944e-38, %v2550_v47  ;;  %v6284_v47 = vld [vmem:[#allocation16] sm:$0xff]  ;;  %v6292_v12 = vld [vmem:[#allocation16 + $0x10] sm:$0xff] }
0x11c9   :  { %v2557_v44 = vmul.f32 %v6244_v40, %v2556_v32  ;;  %vm2534_vm8 = vcmp.eq.f32.partialorder %v2533_v18, 8.507059e+37  ;;  %vm2549_vm13 = vcmp.eq.f32.partialorder %v2548_v2, 8.507059e+37  ;;  %vm2560_vm7 = vweird.f32 %v6244_v40  ;;  %v6295_v32 = vld [vmem:[#allocation16 + $0x18] sm:$0xff] }
0x11ca   :  { %v2537_v19 = vsel %vm2534_vm8, %v2536_v30, %v2532_v26  ;;  %v2552_v57 = vsel %vm2549_vm13, %v2551_v1, %v2547_v60  ;;  %v2573_v28 = vadd.f32 %v6225_v34, %v2572_v45  ;;  %vm2575_vm14 = vweird.f32 %v6225_v34 }
0x11cb   :  { %2596 = vperm.xlu0 %4193, %v2508_v8   ;;  %v2558_v41 = vadd.f32 %v6244_v40, %v2557_v44  ;;  %v2565_v50 = vand.u32 2147483648, %v6188_v37  ;;  %v2538_v17 = vmul.f32 %v2537_v19, %v6146_v23  ;;  %v2580_v52 = vand.u32 2147483648, %v6186_v56 }
0x11cc   :  { %2601 = vperm.xlu1 %4192, %v2523_v21   ;;  %vm2559_vm15 = vweird.f32 %v6188_v37  ;;  %v2563_v22 = vand.u32 2147483647, %v6188_v37  ;;  %v2553_v14 = vmul.f32 %v2552_v57, %v6142_v11  ;;  %vm2574_vm9 = vweird.f32 %v6186_v56 }
0x11cd   :  { %v2578_v39 = vand.u32 2147483647, %v6186_v56  ;;  %vm2561_vm10 = vmor %vm2559_vm15, %vm2560_vm7  ;;  %v2566_v42 = vor.u32 1.1754944e-38, %v2565_v50  ;;  %v2581_v15 = vor.u32 1.1754944e-38, %v2580_v52  ;;  %vm6987_vm8 = vcmask 1045509  }
0x11ce   :  { %vm2576_vm12 = vmor %vm2574_vm9, %vm2575_vm14  ;;  %v2562_v61 = vsel %vm2561_vm10, %v6244_v40, %v2558_v41  ;;  %vm2564_vm11 = vcmp.eq.f32.partialorder %v2563_v22, 8.507059e+37  ;;  %v6301_v22 = vld [vmem:[#allocation16 + $0x28] sm:$0xff]  ;;  %vm6988_vm13 = vcmask 1046534   ;;  %vm6989_vm7 = vcmask 1047559  }
0x11cf   :  { %v2577_v23 = vsel %vm2576_vm12, %v6225_v34, %v2573_v28  ;;  %vm2579_vm6 = vcmp.eq.f32.partialorder %v2578_v39, 8.507059e+37  ;;  %v2567_v27 = vsel %vm2564_vm11, %v2566_v42, %v2562_v61 }
0x11d0   :  { %v2582_v37 = vsel %vm2579_vm6, %v2581_v15, %v2577_v23  ;;  %v2568_v11 = vmul.f32 %v2567_v27, %v6151_v55 }
0x11d1   :  { %v2583_v59 = vmul.f32 %v2582_v37, %v6155_v36 }
0x11d3   :  { %2606 = vperm.xlu0 %4193, %v2538_v17  }
0x11d4   :  { %2611 = vperm.xlu1 %4192, %v2553_v14  }
0x11db   :  { %2616 = vperm.xlu0 %4193, %v2568_v11  }
0x11dc   :  { %2621 = vperm.xlu1 %4192, %v2583_v59  }
0x1235   :  { %v2587_v56 = vpop.permute.xlu0 %2586 }
0x1236   :  { %v2592_v46 = vpop.permute.xlu1 %2591  ;;  %v2624_v40 = vmul.f32 %v6284_v47, %v2587_v56 }
0x1237   :  { %v2625_v34 = vmul.f32 %v6287_v24, %v2592_v46 }
0x1238   :  { %v2632_v48 = vsel %vm325_vm1, %v2624_v40, 0.0 }
0x1239   :  { %v2639_v16 = vsel %vm325_vm1, %v2625_v34, 0.0  ;;  %v2633_v9 = vrot.slane %v2632_v48, 4 }
0x123a   :  { %v2640_v55 = vrot.slane %v2639_v16, 4 }
0x123b   :  { %v2634_v18 = vadd.f32 %v2633_v9, %v2632_v48 }
0x123c   :  { %v2641_v2 = vadd.f32 %v2640_v55, %v2639_v16 }
0x123d   :  { %v2597_v29 = vpop.permute.xlu0 %2596  ;;  %v2635_v45 = vrot.slane %v2634_v18, 2 }
0x123e   :  { %v2602_v36 = vpop.permute.xlu1 %2601  ;;  %v2626_v8 = vmul.f32 %v6292_v12, %v2597_v29  ;;  %v2642_v19 = vrot.slane %v2641_v2, 2 }
0x123f   :  { %v2627_v21 = vmul.f32 %v6295_v32, %v2602_v36  ;;  %v2636_v52 = vadd.f32 %v2635_v45, %v2634_v18 }
0x1240   :  { %v2646_v26 = vsel %vm325_vm1, %v2626_v8, 0.0  ;;  %v2643_v39 = vadd.f32 %v2642_v19, %v2641_v2  ;;  %v6307_v8 = vld [vmem:[#allocation16 + $0x38] sm:$0xff] }
0x1241   :  { %v2653_v44 = vsel %vm325_vm1, %v2627_v21, 0.0  ;;  %v2647_v60 = vrot.slane %v2646_v26, 4  ;;  %v2637_v11 = vrot.slane %v2636_v52, 1 }
0x1242   :  { %v2654_v30 = vrot.slane %v2653_v44, 4  ;;  %v2644_v56 = vrot.slane %v2643_v39, 1 }
0x1243   :  { %v2648_v1 = vadd.f32 %v2647_v60, %v2646_v26  ;;  %v2638_v29 = vadd.f32 %v2637_v11, %v2636_v52 }
0x1244   :  { %v2655_v57 = vadd.f32 %v2654_v30, %v2653_v44  ;;  %v2645_v21 = vadd.f32 %v2644_v56, %v2643_v39 }
0x1245   :  { %v2649_v41 = vrot.slane %v2648_v1, 2  ;;  %v2607_v28 = vpop.permute.xlu0 %2606 }
0x1246   :  { %v2612_v50 = vpop.permute.xlu1 %2611  ;;  %v2628_v17 = vmul.f32 %v6002_v5, %v2607_v28  ;;  %v2656_v61 = vrot.slane %v2655_v57, 2 }
0x1247   :  { %v2629_v14 = vmul.f32 %v6301_v22, %v2612_v50  ;;  %v2650_v42 = vadd.f32 %v2649_v41, %v2648_v1 }
0x1248   :  { %v2660_v23 = vsel %vm325_vm1, %v2628_v17, 0.0  ;;  %v2657_v46 = vadd.f32 %v2656_v61, %v2655_v57 }
0x1249   :  { %v2667_v15 = vsel %vm325_vm1, %v2629_v14, 0.0  ;;  %v2661_v27 = vrot.slane %v2660_v23, 4  ;;  %v2651_v5 = vrot.slane %v2650_v42, 1 }
0x124a   :  { %v2668_v37 = vrot.slane %v2667_v15, 4  ;;  %v2658_v2 = vrot.slane %v2657_v46, 1 }
0x124b   :  { %v2662_v59 = vadd.f32 %v2661_v27, %v2660_v23  ;;  %v2652_v60 = vadd.f32 %v2651_v5, %v2650_v42 }
0x124c   :  { %v2669_v40 = vadd.f32 %v2668_v37, %v2667_v15  ;;  %v2659_v41 = vadd.f32 %v2658_v2, %v2657_v46  ;;  %v2689_v2 = vld [vmem:[#allocation5 + $0x30] sm:$0xff] }
0x124d   :  { %v2663_v34 = vrot.slane %v2662_v59, 2  ;;  %v2617_v48 = vpop.permute.xlu0 %2616 }
0x124e   :  { %v2670_v16 = vrot.slane %v2669_v40, 2  ;;  %v2622_v9 = vpop.permute.xlu1 %2621  ;;  %v2630_v55 = vmul.f32 %v6008_v25, %v2617_v48  ;;  %v2701_v25 = vsel %vm377_vm2, %v2645_v21, %v2638_v29  ;;  %v6323_v48 = vld [vmem:[#allocation13 + $0x20] sm:$0xff]  ;;  %v6336_v29 = vld [vmem:[#allocation13 + $0x28] sm:$0xff]  ;;  %v2197_v21 = vpop.f32.mrf.mxu0 }
0x124f   :  { %v2664_v36 = vadd.f32 %v2663_v34, %v2662_v59  ;;  %v2631_v18 = vmul.f32 %v6307_v8, %v2622_v9  ;;  %v2702_v17 = vsel %vm379_vm3, %v2652_v60, %v2701_v25  ;;  %v6320_v34 = vld [vmem:[#allocation13 + $0x30] sm:$0xff]  ;;  %v6329_v9 = vld [vmem:[#allocation13] sm:$0xff] }
0x1250   :  { %v2671_v26 = vadd.f32 %v2670_v16, %v2669_v40  ;;  %v2674_v44 = vsel %vm325_vm1, %v2630_v55, 0.0  ;;  %v2703_v42 = vsel %vm381_vm4, %v2659_v41, %v2702_v17  ;;  %v6326_v16 = vld [vmem:[#allocation13 + $0x10] sm:$0xff]  ;;  %v6333_v55 = vld [vmem:[#allocation13 + $0x38] sm:$0xff] }
0x1251   :  { %v2665_v30 = vrot.slane %v2664_v36, 1  ;;  %v2681_v45 = vsel %vm325_vm1, %v2631_v18, 0.0  ;;  %v2675_v1 = vrot.slane %v2674_v44, 4  ;;  %v6342_v18 = vld [vmem:[#allocation13 + $0x8] sm:$0xff] }
0x1252   :  { %v2682_v19 = vrot.slane %v2681_v45, 4  ;;  %v2672_v28 = vrot.slane %v2671_v26, 1 }
0x1253   :  { %v2676_v57 = vadd.f32 %v2675_v1, %v2674_v44  ;;  %v2666_v52 = vadd.f32 %v2665_v30, %v2664_v36  ;;  %v6339_v36 = vld [vmem:[#allocation13 + $0x18] sm:$0xff] }
0x1254   :  { %v2683_v50 = vadd.f32 %v2682_v19, %v2681_v45  ;;  %v2673_v23 = vadd.f32 %v2672_v28, %v2671_v26  ;;  %v2691_v26 = vadd.f32 %v2689_v2, %v2197_v21  ;;  %v2217_v19 = vpop.f32.mrf.mxu1 }
0x1255   :  { %v2677_v14 = vrot.slane %v2676_v57, 2  ;;  %v2704_v27 = vsel %vm383_vm5, %v2666_v52, %v2703_v42 }
0x1256   :  { %v2684_v39 = vrot.slane %v2683_v50, 2  ;;  %v2705_v46 = vsel %vm6987_vm8, %v2673_v23, %v2704_v27 }
0x1257   :  { %v2678_v61 = vadd.f32 %v2677_v14, %v2676_v57  ;;  %v2690_v57 = vld [vmem:[#allocation5 + $0x38] sm:$0xff] }
0x1258   :  { %v2685_v15 = vadd.f32 %v2684_v39, %v2683_v50  ;;  %v2692_v41 = vadd.f32 %v2690_v57, %v2217_v19 }
0x1259   :  { %v2679_v37 = vrot.slane %v2678_v61, 1 }
0x125a   :  { %v2686_v11 = vrot.slane %v2685_v15, 1 }
0x125b   :  { %v2680_v59 = vadd.f32 %v2679_v37, %v2678_v61 }
0x125c   :  { %v2687_v56 = vadd.f32 %v2686_v11, %v2685_v15 }
0x125d   :  { %v2706_v40 = vsel %vm6988_vm13, %v2680_v59, %v2705_v46  ;;  %vm6990_vm13 = vcmask 1045509  }
0x125e   :  { %v2707_v5 = vsel %vm6989_vm7, %v2687_v56, %v2706_v40  ;;  %vm6991_vm7 = vcmask 1046534  }
0x125f   :  { %4150 = vmatmul.msk.f32.vlgmr.msra.gmra.mxu3 %vm325_vm1, %v2707_v5 }
0x1260   :  { %3350 = vmatpush.msra.mxu3 %v6320_v34 }
0x1262   :  { %3351 = vmatpush.msra.mxu3 %v6323_v48 }
0x1264   :  { %3352 = vmatpush.msra.mxu3 %v6326_v16 }
0x1266   :  { %3353 = vmatpush.msra.mxu3 %v6329_v9 }
0x1267   :  { %4151 = vmatmul.msk.f32.vlgmr.msrb.gmra.mxu3 %vm325_vm1, %v2707_v5 }
0x1268   :  { %3370 = vmatpush.msrb.mxu3 %v6333_v55 }
0x126a   :  { %3371 = vmatpush.msrb.mxu3 %v6336_v29 }
0x126c   :  { %3372 = vmatpush.msrb.mxu3 %v6339_v36 }
0x126e   :  { %3373 = vmatpush.msrb.mxu3 %v6342_v18 }
0x12e2   :  { %v2727_v44 = vpop.f32.mrf.mxu3 }
0x12e3   :  { %v2750_v60 = vadd.f32 %v2727_v44, %v2691_v26 }
0x12e5   :  { %v4152_v30 = vmul.f32 -1.442695, %v2750_v60 }
0x12e7   :  { %4423 = vpow2.f32 %v4152_v30 }
0x12ea   :  { %v2747_v25 = vpop.f32.mrf.mxu3 }
0x12eb   :  { %v2751_v50 = vadd.f32 %v2747_v25, %v2692_v41 }
0x12ed   :  { %v4424_v45 = vpop.eup %4423  ;;  %v4153_v59 = vmul.f32 -1.442695, %v2751_v50 }
0x12ee   :  { %v2758_v1 = vadd.f32 1.0, %v4424_v45 }
0x12f0   :  { %4425 = vrcp.f32 %v2758_v1  ;;  %v2771_v14 = vand.u32 2147483648, %v2758_v1  ;;  %v2769_v61 = vand.u32 2147483647, %v2758_v1  ;;  %vm2765_vm15 = vweird.f32 %v2758_v1 }
0x12f1   :  { %4427 = vtanh.f32 %v2751_v50 }
0x12f2   :  { %v2772_v42 = vor.u32 1.1754944e-38, %v2771_v14  ;;  %vm2770_vm10 = vcmp.eq.f32.partialorder %v2769_v61, 8.507059e+37  ;;  %4429 = vpow2.f32 %v4153_v59 }
0x12f6   :  { %v4426_v28 = vpop.eup %4425 }
0x12f7   :  { %v2761_v17 = vmul.f32 %v4426_v28, %v2758_v1  ;;  %vm2766_vm14 = vweird.f32 %v4426_v28  ;;  %v4428_v27 = vpop.eup %4427 }
0x12f8   :  { %vm2767_vm9 = vmor %vm2765_vm15, %vm2766_vm14  ;;  %v4430_v56 = vpop.eup %4429  ;;  %vm6992_vm14 = vcmask 1047559   ;;  %vm6993_vm15 = vcmask 64512  }
0x12f9   :  { %v2762_v52 = vsub.f32 1.0, %v2761_v17  ;;  %v2759_v46 = vadd.f32 1.0, %v4430_v56 }
0x12fb   :  { %v2763_v39 = vmul.f32 %v4426_v28, %v2762_v52  ;;  %4431 = vrcp.f32 %v2759_v46  ;;  %v2786_v45 = vand.u32 2147483648, %v2759_v46  ;;  %vm2780_vm11 = vweird.f32 %v2759_v46 }
0x12fc   :  { %v2784_v1 = vand.u32 2147483647, %v2759_v46 }
0x12fd   :  { %v2764_v23 = vadd.f32 %v4426_v28, %v2763_v39  ;;  %v2787_v57 = vor.u32 1.1754944e-38, %v2786_v45 }
0x12fe   :  { %vm2785_vm8 = vcmp.eq.f32.partialorder %v2784_v1, 8.507059e+37 }
0x12ff   :  { %v2768_v15 = vsel %vm2767_vm9, %v4426_v28, %v2764_v23  ;;  %vm6994_vm9 = vmmov %vm6990_vm13 }
0x1300   :  { %v2773_v37 = vsel %vm2770_vm10, %v2772_v42, %v2768_v15  ;;  %vm6995_vm10 = vmmov %vm6991_vm7 }
0x1301   :  { %v2792_v11 = vmul.f32 %v4428_v27, %v2773_v37  ;;  %v4432_v40 = vpop.eup %4431  ;;  %v2791_v26 = vmul.f32 %v2773_v37, %v6033_v58 }
0x1302   :  { %v2776_v5 = vmul.f32 %v4432_v40, %v2759_v46  ;;  %vm2781_vm12 = vweird.f32 %v4432_v40 }
0x1303   :  { %2794 = vrot.lane.b32.xlu0 %v2792_v11, %s4921_s7  ;;  %vm2782_vm6 = vmor %vm2780_vm11, %vm2781_vm12 }
0x1304   :  { %v2777_v21 = vsub.f32 1.0, %v2776_v5  ;;  %vm6996_vm12 = vmmov %vm6992_vm14 }
0x1305   :  { %vm6997_vm11 = vmmov %vm6993_vm15 }
0x1306   :  { %v2778_v2 = vmul.f32 %v4432_v40, %v2777_v21 }
0x1308   :  { %v2779_v30 = vadd.f32 %v4432_v40, %v2778_v2 }
0x130a   :  { %v2783_v19 = vsel %vm2782_vm6, %v4432_v40, %v2779_v30 }
0x130b   :  { %v2788_v41 = vsel %vm2785_vm8, %v2787_v57, %v2783_v19 }
0x1375   :  { %v2795_v44 = vpop.permute.xlu0 %2794 }
0x1376   :  { %v6347_v60 = vadd.f32 %v2795_v44, %v2791_v26 }
0x1378   :  { %4433 = vtanh.f32 %v6347_v60 }
0x137e   :  { %v4434_v25 = vpop.eup %4433 }
0x137f   :  { %v2799_v28 = vmul.f32 %v4434_v25, %v2788_v41 }
0x1381   :  { %2801 = vrot.lane.b32.xlu1 %v2799_v28, %s4921_s7 }
0x13f3   :  { %v2802_v58 = vpop.permute.xlu1 %2801 }
0x13f4   :  { %2805 = vst.msk [vmem:[#allocation17 + $0x18] sm:$0xff] %vm152_vm0, %v2802_v58  ;;  %4154 = vmatmul.msk.f32.vlgmr.msra.gmra.mxu0 %vm152_vm0, %v2802_v58  ;;  %4155 = vmatmul.msk.f32.vlgmr.msra.gmra.mxu1 %vm152_vm0, %v2802_v58 }
0x13f5   :  { %4156 = vmatmul.msk.f32.vlgmr.msra.gmra.mxu2 %vm152_vm0, %v2802_v58 }
0x1478   :  { %v2865_v50 = vpop.f32.mrf.mxu2 }
0x1479   :  { %v2876_v17 = vperm.slane %v2865_v50, 0  ;;  %v2870_v52 = vrot.slane %v2865_v50, 2  ;;  %v2869_v14 = vrot.slane %v2865_v50, 1  ;;  %v2871_v39 = vrot.slane %v2865_v50, 3 }
0x147a   :  { %v2872_v27 = vrot.slane %v2865_v50, 4  ;;  %v2873_v21 = vrot.slane %v2865_v50, 5  ;;  %v2874_v19 = vrot.slane %v2865_v50, 6 }
0x147b   :  { %v2892_v61 = vadd.f32 %v6057_v6, %v2876_v17  ;;  %v2878_v23 = vperm.slane %v2870_v52, 0  ;;  %v2877_v42 = vperm.slane %v2869_v14, 0  ;;  %v2879_v15 = vperm.slane %v2871_v39, 0 }
0x147c   :  { %v2880_v56 = vperm.slane %v2872_v27, 0  ;;  %v2881_v45 = vperm.slane %v2873_v21, 0  ;;  %v2882_v41 = vperm.slane %v2874_v19, 0  ;;  %v2875_v17 = vrot.slane %v2865_v50, 7 }
0x147d   :  { %4435 = vtanh.f32 %v2892_v61  ;;  %v2894_v37 = vadd.f32 %v6060_v10, %v2878_v23  ;;  %v2893_v11 = vadd.f32 %v6063_v49, %v2877_v42  ;;  %v2895_v59 = vadd.f32 %v6066_v62, %v2879_v15 }
0x147e   :  { %v2896_v6 = vadd.f32 %v6070_v38, %v2880_v56  ;;  %v2897_v1 = vadd.f32 %v6079_v43, %v2881_v45  ;;  %v2898_v58 = vadd.f32 %v6084_v51, %v2882_v41  ;;  %v2883_v39 = vperm.slane %v2875_v17, 0 }
0x147f   :  { %4437 = vtanh.f32 %v2894_v37 }
0x1480   :  { %4439 = vtanh.f32 %v2893_v11  ;;  %v2899_v61 = vadd.f32 %v6094_v13, %v2883_v39 }
0x1481   :  { %4441 = vtanh.f32 %v2895_v59 }
0x1482   :  { %4443 = vtanh.f32 %v2896_v6 }
0x1483   :  { %v4436_v46 = vpop.eup %4435  ;;  %4445 = vtanh.f32 %v2897_v1 }
0x1484   :  { %v2908_v40 = vmul.f32 %v6091_v53, %v4436_v46  ;;  %4447 = vtanh.f32 %v2898_v58 }
0x1485   :  { %v4438_v5 = vpop.eup %4437  ;;  %4449 = vtanh.f32 %v2899_v61 }
0x1486   :  { %v4440_v2 = vpop.eup %4439  ;;  %v2916_v26 = vsel %vm325_vm1, %v2908_v40, 0.0  ;;  %v2910_v10 = vmul.f32 %v6091_v53, %v4438_v5 }
0x1487   :  { %v4442_v44 = vpop.eup %4441  ;;  %2917 = vadd.xlane.f32.xlu2 %v2916_v26  ;;  %v2909_v49 = vmul.f32 %v6091_v53, %v4440_v2 }
0x1488   :  { %v2922_v62 = vsel %vm325_vm1, %v2910_v10, 0.0  ;;  %v2911_v38 = vmul.f32 %v6091_v53, %v4442_v44  ;;  %v4444_v25 = vpop.eup %4443 }
0x1489   :  { %2923 = vadd.xlane.f32.xlu1 %v2922_v62  ;;  %v2919_v30 = vsel %vm325_vm1, %v2909_v49, 0.0  ;;  %v2912_v28 = vmul.f32 %v6091_v53, %v4444_v25  ;;  %v4446_v14 = vpop.eup %4445 }
0x148a   :  { %2920 = vadd.xlane.f32.xlu0 %v2919_v30  ;;  %v2925_v57 = vsel %vm325_vm1, %v2911_v38, 0.0  ;;  %v2913_v43 = vmul.f32 %v6091_v53, %v4446_v14  ;;  %v4448_v42 = vpop.eup %4447 }
0x148b   :  { %v2928_v52 = vsel %vm325_vm1, %v2912_v28, 0.0  ;;  %v2914_v15 = vmul.f32 %v6091_v53, %v4448_v42  ;;  %v4450_v50 = vpop.eup %4449 }
0x148c   :  { %v2931_v23 = vsel %vm325_vm1, %v2913_v43, 0.0  ;;  %v2915_v27 = vmul.f32 %v6091_v53, %v4450_v50 }
0x148d   :  { %v2934_v51 = vsel %vm325_vm1, %v2914_v15, 0.0 }
0x148e   :  { %v2937_v37 = vsel %vm325_vm1, %v2915_v27, 0.0 }
0x148f   :  { %2926 = vadd.xlane.f32.xlu2 %v2925_v57 }
0x1497   :  { %2929 = vadd.xlane.f32.xlu2 %v2928_v52 }
0x149f   :  { %2932 = vadd.xlane.f32.xlu2 %v2931_v23 }
0x14a7   :  { %2935 = vadd.xlane.f32.xlu2 %v2934_v51 }
0x14af   :  { %2938 = vadd.xlane.f32.xlu2 %v2937_v37 }
0x14fa   :  { %v2918_v11 = vpop.xlane.xlu2 %2917 }
0x14fb   :  { %v2940_v6 = vadd.f32 %v2918_v11, %v6965_v20 }
0x14fc   :  { %v2924_v40 = vpop.xlane.xlu1 %2923 }
0x14fd   :  { %v2921_v46 = vpop.xlane.xlu0 %2920  ;;  %v2942_v21 = vadd.f32 %v2924_v40, %v6965_v20  ;;  %v2956_v44 = vperm.slane %v2940_v6, %v6966_v54 }
0x14fe   :  { %v2941_v5 = vadd.f32 %v2921_v46, %v6965_v20 }
0x14ff   :  { %v2958_v62 = vperm.slane %v2942_v21, %v6966_v54 }
0x1500   :  { %v2957_v26 = vperm.slane %v2941_v5, %v6966_v54 }
0x1502   :  { %v2927_v59 = vpop.xlane.xlu2 %2926  ;;  %v2964_v45 = vsel %vm377_vm2, %v2957_v26, %v2956_v44 }
0x1503   :  { %v2943_v53 = vadd.f32 %v2927_v59, %v6965_v20  ;;  %v2965_v57 = vsel %vm379_vm3, %v2958_v62, %v2964_v45 }
0x1505   :  { %v2959_v38 = vperm.slane %v2943_v53, %v6966_v54 }
0x1507   :  { %v2966_v28 = vsel %vm381_vm4, %v2959_v38, %v2965_v57 }
0x150a   :  { %v2930_v56 = vpop.xlane.xlu2 %2929 }
0x150b   :  { %v2944_v10 = vadd.f32 %v2930_v56, %v6965_v20 }
0x150d   :  { %v2960_v1 = vperm.slane %v2944_v10, %v6966_v54 }
0x150f   :  { %v2967_v17 = vsel %vm383_vm5, %v2960_v1, %v2966_v28 }
0x1512   :  { %v2933_v13 = vpop.xlane.xlu2 %2932 }
0x1513   :  { %v2945_v49 = vadd.f32 %v2933_v13, %v6965_v20 }
0x1515   :  { %v2961_v19 = vperm.slane %v2945_v49, %v6966_v54 }
0x1517   :  { %v2968_v14 = vsel %vm6990_vm13, %v2961_v19, %v2967_v17 }
0x151a   :  { %v2936_v2 = vpop.xlane.xlu2 %2935 }
0x151b   :  { %v2946_v30 = vadd.f32 %v2936_v2, %v6965_v20 }
0x151d   :  { %v2962_v25 = vperm.slane %v2946_v30, %v6966_v54 }
0x151f   :  { %v2969_v39 = vsel %vm6991_vm7, %v2962_v25, %v2968_v14 }
0x1522   :  { %v2939_v41 = vpop.xlane.xlu2 %2938 }
0x1523   :  { %v2947_v58 = vadd.f32 %v2939_v41, %v6965_v20 }
0x1525   :  { %v2963_v52 = vperm.slane %v2947_v58, %v6966_v54 }
0x1527   :  { %v2970_v43 = vsel %vm6992_vm14, %v2963_v52, %v2969_v39 }
0x1528   :  { %v2972_v61 = vsel %vm6993_vm15, %v2970_v43, -inf }
0x1529   :  { %2973 = vmax.xlane.f32.xlu0 %v2972_v61 }
0x159c   :  { %v2974_v23 = vpop.xlane.xlu0 %2973 }
0x159d   :  { %v2978_v42 = vperm.slane %v2974_v23, 2  ;;  %v2977_v15 = vperm.slane %v2974_v23, 1  ;;  %v2976_v51 = vperm.slane %v2974_v23, 0  ;;  %v2981_v50 = vperm.slane %v2974_v23, 5 }
0x159e   :  { %v2979_v27 = vperm.slane %v2974_v23, 3  ;;  %v2980_v56 = vperm.slane %v2974_v23, 4  ;;  %v2982_v38 = vperm.slane %v2974_v23, 6  ;;  %v2983_v19 = vperm.slane %v2974_v23, 7 }
0x159f   :  { %v2994_v37 = vsub.f32 %v2942_v21, %v2978_v42  ;;  %v2993_v11 = vsub.f32 %v2941_v5, %v2977_v15  ;;  %v2992_v59 = vsub.f32 %v2940_v6, %v2976_v51  ;;  %v2997_v2 = vsub.f32 %v2945_v49, %v2981_v50 }
0x15a0   :  { %v2995_v26 = vsub.f32 %v2943_v53, %v2979_v27  ;;  %v2996_v44 = vsub.f32 %v2944_v10, %v2980_v56  ;;  %v2998_v6 = vsub.f32 %v2946_v30, %v2982_v38  ;;  %v2999_v10 = vsub.f32 %v2947_v58, %v2983_v19 }
0x15a1   :  { %v3004_v13 = vmul.f32 1.442695, %v2994_v37  ;;  %v3002_v46 = vmul.f32 1.442695, %v2993_v11  ;;  %v3000_v40 = vmul.f32 1.442695, %v2992_v59 }
0x15a2   :  { %v3010_v62 = vmul.f32 1.442695, %v2997_v2  ;;  %v3006_v45 = vmul.f32 1.442695, %v2995_v26  ;;  %v3008_v1 = vmul.f32 1.442695, %v2996_v44 }
0x15a3   :  { %4451 = vpow2.f32 %v3004_v13  ;;  %v3012_v41 = vmul.f32 1.442695, %v2998_v6  ;;  %v3014_v17 = vmul.f32 1.442695, %v2999_v10 }
0x15a4   :  { %4453 = vpow2.f32 %v3002_v46 }
0x15a5   :  { %4455 = vpow2.f32 %v3000_v40 }
0x15a6   :  { %4457 = vpow2.f32 %v3010_v62 }
0x15a7   :  { %4459 = vpow2.f32 %v3006_v45 }
0x15a8   :  { %4461 = vpow2.f32 %v3008_v1 }
0x15a9   :  { %v4452_v57 = vpop.eup %4451  ;;  %4463 = vpow2.f32 %v3012_v41 }
0x15aa   :  { %v4454_v21 = vpop.eup %4453  ;;  %v6404_v5 = vmul.f32 %v4452_v57, %v6971_v7  ;;  %4465 = vpow2.f32 %v3014_v17 }
0x15ab   :  { %v4456_v25 = vpop.eup %4455  ;;  %v6407_v53 = vmul.f32 %v4454_v21, %v6972_v63 }
0x15ac   :  { %3039 = vperm.xlu0 %4193, %v6404_v5   ;;  %v6411_v49 = vmul.f32 %v4456_v25, %v6973_v33  ;;  %v4458_v28 = vpop.eup %4457 }
0x15ad   :  { %3036 = vperm.xlu2 %4191, %v6407_v53   ;;  %v4460_v52 = vpop.eup %4459  ;;  %v6416_v14 = vmul.f32 %v4458_v28, %v6975_v4 }
0x15ae   :  { %3033 = vperm.xlu1 %4192, %v6411_v49   ;;  %v4462_v30 = vpop.eup %4461  ;;  %v6419_v58 = vmul.f32 %v4460_v52, %v6974_v31 }
0x15af   :  { %v6423_v39 = vmul.f32 %v4462_v30, %v6976_v3  ;;  %v4464_v43 = vpop.eup %4463 }
0x15b0   :  { %v4466_v61 = vpop.eup %4465  ;;  %v6428_v23 = vmul.f32 %v4464_v43, %v6977_v35 }
0x15b1   :  { %v6431_v42 = vmul.f32 %v4466_v61, %v6978_v0 }
0x15b4   :  { %3048 = vperm.xlu0 %4193, %v6416_v14  }
0x15b5   :  { %3042 = vperm.xlu2 %4191, %v6419_v58  }
0x15b6   :  { %3045 = vperm.xlu1 %4192, %v6423_v39  }
0x15bd   :  { %3051 = vperm.xlu2 %4191, %v6428_v23  }
0x15be   :  { %3054 = vperm.xlu1 %4192, %v6431_v42  }
0x1607   :  { %v3037_v15 = vpop.permute.xlu2 %3036 }
0x1608   :  { %v3057_v37 = vperm.slane %v3037_v15, %v6966_v54 }
0x160f   :  { %v3043_v11 = vpop.permute.xlu2 %3042 }
0x1610   :  { %v3059_v2 = vperm.slane %v3043_v11, %v6966_v54 }
0x1617   :  { %v3052_v38 = vpop.permute.xlu2 %3051 }
0x1618   :  { %v3062_v19 = vperm.slane %v3052_v38, %v6966_v54 }
0x161e   :  { %v3040_v51 = vpop.permute.xlu0 %3039 }
0x161f   :  { %v3058_v59 = vperm.slane %v3040_v51, %v6966_v54 }
0x1620   :  { %v3034_v50 = vpop.permute.xlu1 %3033 }
0x1621   :  { %v3056_v27 = vperm.slane %v3034_v50, %v6966_v54 }
0x1623   :  { %v3064_v56 = vsel %vm377_vm2, %v3057_v37, %v3056_v27 }
0x1624   :  { %v3065_v13 = vsel %vm379_vm3, %v3058_v59, %v3064_v56 }
0x1625   :  { %v3066_v62 = vsel %vm381_vm4, %v3059_v2, %v3065_v13 }
0x1626   :  { %v3049_v46 = vpop.permute.xlu0 %3048 }
0x1627   :  { %v3061_v44 = vperm.slane %v3049_v46, %v6966_v54 }
0x1628   :  { %v3046_v40 = vpop.permute.xlu1 %3045 }
0x1629   :  { %v3060_v26 = vperm.slane %v3046_v40, %v6966_v54 }
0x162b   :  { %v3067_v45 = vsel %vm383_vm5, %v3060_v26, %v3066_v62 }
0x162c   :  { %v3068_v1 = vsel %vm6994_vm9, %v3061_v44, %v3067_v45 }
0x162d   :  { %v3069_v6 = vsel %vm6995_vm10, %v3062_v19, %v3068_v1 }
0x1630   :  { %v3055_v57 = vpop.permute.xlu1 %3054 }
0x1631   :  { %v3063_v21 = vperm.slane %v3055_v57, %v6966_v54 }
0x1633   :  { %v3070_v25 = vsel %vm6996_vm12, %v3063_v21, %v3069_v6 }
0x1634   :  { %v3072_v10 = vsel %vm6997_vm11, %v3070_v25, 0.0 }
0x1635   :  { %3073 = vadd.xlane.f32.xlu0 %v3072_v10 }
0x16a8   :  { %v3074_v41 = vpop.xlane.xlu0 %3073 }
0x16a9   :  { %v3076_v28 = vperm.slane %v3074_v41, 0  ;;  %v3077_v17 = vperm.slane %v3074_v41, 1  ;;  %v6451_v52 = vperm.slane %v3074_v41, 2  ;;  %v6453_v30 = vperm.slane %v3074_v41, 3 }
0x16aa   :  { %v6455_v43 = vperm.slane %v3074_v41, 4  ;;  %v6457_v61 = vperm.slane %v3074_v41, 5  ;;  %v6463_v37 = vperm.slane %v3074_v41, 7  ;;  %v6465_v56 = vperm.slane %v3074_v41, 6 }
0x16ab   :  { %4467 = vrcp.f32 %v3076_v28  ;;  %v3116_v15 = vand.u32 2147483647, %v3077_v17  ;;  %v3118_v51 = vand.u32 2147483648, %v3077_v17  ;;  %v3101_v50 = vand.u32 2147483647, %v3076_v28 }
0x16ac   :  { %4469 = vrcp.f32 %v3077_v17  ;;  %v3103_v11 = vand.u32 2147483648, %v3076_v28  ;;  %vm3112_vm6 = vweird.f32 %v3077_v17  ;;  %vm3097_vm13 = vweird.f32 %v3076_v28 }
0x16ad   :  { %4471 = vrcp.f32 %v6451_v52  ;;  %vm6469_vm8 = vcmp.eq.f32.partialorder %v3116_v15, 8.507059e+37  ;;  %v3119_v44 = vor.u32 1.1754944e-38, %v3118_v51  ;;  %vm6475_vm7 = vcmp.eq.f32.partialorder %v3101_v50, 8.507059e+37 }
0x16ae   :  { %4473 = vrcp.f32 %v6453_v30  ;;  %v3104_v57 = vor.u32 1.1754944e-38, %v3103_v11  ;;  %v3148_v11 = vand.u32 2147483648, %v6453_v30  ;;  %v3133_v0 = vand.u32 2147483648, %v6451_v52 }
0x16af   :  { %4475 = vrcp.f32 %v6455_v43 }
0x16b0   :  { %4477 = vrcp.f32 %v6457_v61  ;;  %v3149_v45 = vor.u32 1.1754944e-38, %v3148_v11 }
0x16b1   :  { %v4468_v27 = vpop.eup %4467  ;;  %4479 = vrcp.f32 %v6463_v37 }
0x16b2   :  { %v4470_v59 = vpop.eup %4469  ;;  %v3093_v13 = vmul.f32 %v4468_v27, %v3076_v28  ;;  %vm3098_vm14 = vweird.f32 %v4468_v27  ;;  %4481 = vrcp.f32 %v6465_v56 }
0x16b3   :  { %v6467_v46 = vpop.eup %4471  ;;  %v3108_v40 = vmul.f32 %v4470_v59, %v3077_v17  ;;  %vm3113_vm15 = vweird.f32 %v4470_v59  ;;  %vm3099_vm9 = vmor %vm3097_vm13, %vm3098_vm14  ;;  %vm3142_vm13 = vweird.f32 %v6453_v30 }
0x16b4   :  { %v6473_v26 = vpop.eup %4473  ;;  %v3094_v62 = vsub.f32 1.0, %v3093_v13  ;;  %v3123_v38 = vmul.f32 %v6467_v46, %v6451_v52  ;;  %vm3128_vm10 = vweird.f32 %v6467_v46  ;;  %vm3114_vm12 = vmor %vm3112_vm6, %vm3113_vm15  ;;  %vm3127_vm6 = vweird.f32 %v6451_v52 }
0x16b5   :  { %v6481_v1 = vpop.eup %4475  ;;  %v3109_v19 = vsub.f32 1.0, %v3108_v40  ;;  %v3138_v21 = vmul.f32 %v6473_v26, %v6453_v30  ;;  %vm3143_vm11 = vweird.f32 %v6473_v26 }
0x16b6   :  { %v6486_v6 = vpop.eup %4477  ;;  %v3095_v25 = vmul.f32 %v4468_v27, %v3094_v62  ;;  %v3124_v10 = vsub.f32 1.0, %v3123_v38  ;;  %v3153_v41 = vmul.f32 %v6481_v1, %v6455_v43  ;;  %vm3144_vm14 = vmor %vm3142_vm13, %vm3143_vm11  ;;  %vm3172_vm11 = vweird.f32 %v6457_v61 }
0x16b7   :  { %v3110_v15 = vmul.f32 %v4470_v59, %v3109_v19  ;;  %v3139_v51 = vsub.f32 1.0, %v3138_v21  ;;  %v3168_v50 = vmul.f32 %v6486_v6, %v6457_v61 }
0x16b8   :  { %v3096_v13 = vadd.f32 %v4468_v27, %v3095_v25  ;;  %v3125_v40 = vmul.f32 %v6467_v46, %v3124_v10  ;;  %v3154_v25 = vsub.f32 1.0, %v3153_v41  ;;  %v6502_v10 = vpop.eup %4479 }
0x16b9   :  { %v3111_v62 = vadd.f32 %v4470_v59, %v3110_v15  ;;  %v3140_v38 = vmul.f32 %v6473_v26, %v3139_v51  ;;  %v3169_v3 = vsub.f32 1.0, %v3168_v50  ;;  %v6521_v2 = vpop.eup %4481  ;;  %v3178_v50 = vand.u32 2147483648, %v6457_v61 }
0x16ba   :  { %v3100_v19 = vsel %vm3099_vm9, %v4468_v27, %v3096_v13  ;;  %v3126_v21 = vadd.f32 %v6467_v46, %v3125_v40  ;;  %v3131_v27 = vand.u32 2147483647, %v6451_v52  ;;  %v3134_v52 = vor.u32 1.1754944e-38, %v3133_v0 }
0x16bb   :  { %v3115_v35 = vsel %vm3114_vm12, %v4470_v59, %v3111_v62  ;;  %v3105_v15 = vsel %vm6475_vm7, %v3104_v57, %v3100_v19  ;;  %v3141_v28 = vadd.f32 %v6473_v26, %v3140_v38  ;;  %v3146_v59 = vand.u32 2147483647, %v6453_v30  ;;  %vm3129_vm7 = vmor %vm3127_vm6, %vm3128_vm10 }
0x16bc   :  { %v3120_v51 = vsel %vm6469_vm8, %v3119_v44, %v3115_v35  ;;  %v3106_v17 = vmul.f32 %v3105_v15, %v6411_v49  ;;  %v3130_v35 = vsel %vm3129_vm7, %v6467_v46, %v3126_v21  ;;  %v3155_v49 = vmul.f32 %v6481_v1, %v3154_v25 }
0x16bd   :  { %v3121_v41 = vmul.f32 %v3120_v51, %v6407_v53  ;;  %v3145_v53 = vsel %vm3144_vm14, %v6473_v26, %v3141_v28  ;;  %v3170_v44 = vmul.f32 %v6486_v6, %v3169_v3  ;;  %v3198_v30 = vmul.f32 %v6502_v10, %v6463_v37 }
0x16be   :  { %3214 = vperm.xlu2 %4191, %v3106_v17   ;;  %vm3132_vm8 = vcmp.eq.f32.partialorder %v3131_v27, 8.507059e+37  ;;  %vm3147_vm15 = vcmp.eq.f32.partialorder %v3146_v59, 8.507059e+37  ;;  %v3156_v13 = vadd.f32 %v6481_v1, %v3155_v49  ;;  %vm3158_vm9 = vweird.f32 %v6481_v1 }
0x16bf   :  { %3219 = vperm.xlu1 %4192, %v3121_v41   ;;  %v3135_v57 = vsel %vm3132_vm8, %v3134_v52, %v3130_v35  ;;  %v3150_v46 = vsel %vm3147_vm15, %v3149_v45, %v3145_v53  ;;  %v3183_v26 = vmul.f32 %v6521_v2, %v6465_v56  ;;  %v3171_v0 = vadd.f32 %v6486_v6, %v3170_v44 }
0x16c0   :  { %vm3173_vm10 = vweird.f32 %v6486_v6  ;;  %v3163_v3 = vand.u32 2147483648, %v6455_v43  ;;  %v3199_v11 = vsub.f32 1.0, %v3198_v30  ;;  %v3136_v40 = vmul.f32 %v3135_v57, %v6404_v5 }
0x16c1   :  { %vm3157_vm12 = vweird.f32 %v6455_v43  ;;  %v3161_v62 = vand.u32 2147483647, %v6455_v43  ;;  %v3184_v38 = vsub.f32 1.0, %v3183_v26  ;;  %v3151_v19 = vmul.f32 %v3150_v46, %v6419_v58  ;;  %vm3174_vm13 = vmor %vm3172_vm11, %vm3173_vm10 }
0x16c2   :  { %v3176_v21 = vand.u32 2147483647, %v6457_v61  ;;  %vm3159_vm6 = vmor %vm3157_vm12, %vm3158_vm9  ;;  %v3175_v5 = vsel %vm3174_vm13, %v6486_v6, %v3171_v0  ;;  %v3164_v28 = vor.u32 1.1754944e-38, %v3163_v3  ;;  %v3200_v43 = vmul.f32 %v6502_v10, %v3199_v11  ;;  %v6567_v11 = vld [vmem:[#allocation16 + $0x20] sm:$0xff] }
0x16c3   :  { %v3160_v25 = vsel %vm3159_vm6, %v6481_v1, %v3156_v13  ;;  %v3185_v15 = vmul.f32 %v6521_v2, %v3184_v38  ;;  %v3179_v51 = vor.u32 1.1754944e-38, %v3178_v50  ;;  %vm3162_vm7 = vcmp.eq.f32.partialorder %v3161_v62, 8.507059e+37 }
0x16c4   :  { %vm3177_vm14 = vcmp.eq.f32.partialorder %v3176_v21, 8.507059e+37  ;;  %v3165_v58 = vsel %vm3162_vm7, %v3164_v28, %v3160_v25  ;;  %vm3188_vm8 = vweird.f32 %v6521_v2  ;;  %v3201_v27 = vadd.f32 %v6502_v10, %v3200_v43  ;;  %v6572_v25 = vld [vmem:[#allocation16 + $0x30] sm:$0xff] }
0x16c5   :  { %v3180_v17 = vsel %vm3177_vm14, %v3179_v51, %v3175_v5  ;;  %v3186_v61 = vadd.f32 %v6521_v2, %v3185_v15  ;;  %vm3203_vm15 = vweird.f32 %v6502_v10  ;;  %v3193_v1 = vand.u32 2147483648, %v6465_v56 }
0x16c6   :  { %3224 = vperm.xlu2 %4191, %v3136_v40   ;;  %v3166_v6 = vmul.f32 %v3165_v58, %v6423_v39  ;;  %v3208_v41 = vand.u32 2147483648, %v6463_v37  ;;  %vm3187_vm9 = vweird.f32 %v6465_v56  ;;  %v3191_v59 = vand.u32 2147483647, %v6465_v56 }
0x16c7   :  { %3229 = vperm.xlu1 %4192, %v3151_v19   ;;  %v3181_v35 = vmul.f32 %v3180_v17, %v6416_v14  ;;  %vm3202_vm10 = vweird.f32 %v6463_v37  ;;  %v3206_v49 = vand.u32 2147483647, %v6463_v37  ;;  %vm3189_vm12 = vmor %vm3187_vm9, %vm3188_vm8  ;;  %v3194_v52 = vor.u32 1.1754944e-38, %v3193_v1 }
0x16c8   :  { %vm3204_vm11 = vmor %vm3202_vm10, %vm3203_vm15  ;;  %v3190_v53 = vsel %vm3189_vm12, %v6521_v2, %v3186_v61  ;;  %v3209_v44 = vor.u32 1.1754944e-38, %v3208_v41  ;;  %vm3192_vm6 = vcmp.eq.f32.partialorder %v3191_v59, 8.507059e+37  ;;  %vm7002_vm7 = vcmask 1045509  }
0x16c9   :  { %v3205_v39 = vsel %vm3204_vm11, %v6502_v10, %v3201_v27  ;;  %vm3207_vm13 = vcmp.eq.f32.partialorder %v3206_v49, 8.507059e+37  ;;  %v3195_v30 = vsel %vm3192_vm6, %v3194_v52, %v3190_v53  ;;  %vm7003_vm14 = vcmask 1046534  }
0x16ca   :  { %v3210_v56 = vsel %vm3207_vm13, %v3209_v44, %v3205_v39  ;;  %v3196_v14 = vmul.f32 %v3195_v30, %v6428_v23  ;;  %vm7004_vm8 = vcmask 1047559  }
0x16cb   :  { %v3211_v45 = vmul.f32 %v3210_v56, %v6431_v42 }
0x16ce   :  { %3234 = vperm.xlu2 %4191, %v3166_v6  }
0x16cf   :  { %3239 = vperm.xlu1 %4192, %v3181_v35  }
0x16d6   :  { %3244 = vperm.xlu2 %4191, %v3196_v14  }
0x16d7   :  { %3249 = vperm.xlu1 %4192, %v3211_v45  }
0x1718   :  { %v3215_v37 = vpop.permute.xlu2 %3214 }
0x1719   :  { %v3252_v2 = vmul.f32 %v6284_v47, %v3215_v37 }
0x171b   :  { %v3260_v26 = vsel %vm325_vm1, %v3252_v2, 0.0 }
0x171c   :  { %v3261_v23 = vrot.slane %v3260_v26, 4 }
0x171e   :  { %v3262_v21 = vadd.f32 %v3261_v23, %v3260_v26 }
0x1720   :  { %v3225_v57 = vpop.permute.xlu2 %3224  ;;  %v3263_v17 = vrot.slane %v3262_v21, 2 }
0x1721   :  { %v3254_v13 = vmul.f32 %v6292_v12, %v3225_v57 }
0x1722   :  { %v3264_v53 = vadd.f32 %v3263_v17, %v3262_v21 }
0x1723   :  { %v3274_v42 = vsel %vm325_vm1, %v3254_v13, 0.0 }
0x1724   :  { %v3275_v19 = vrot.slane %v3274_v42, 4  ;;  %v3265_v37 = vrot.slane %v3264_v53, 1 }
0x1726   :  { %v3276_v51 = vadd.f32 %v3275_v19, %v3274_v42 }
0x1728   :  { %v3235_v50 = vpop.permute.xlu2 %3234  ;;  %v3277_v41 = vrot.slane %v3276_v51, 2 }
0x1729   :  { %v3256_v40 = vmul.f32 %v6567_v11, %v3235_v50 }
0x172a   :  { %v3278_v56 = vadd.f32 %v3277_v41, %v3276_v51 }
0x172b   :  { %v3288_v12 = vsel %vm325_vm1, %v3256_v40, 0.0 }
0x172c   :  { %v3289_v58 = vrot.slane %v3288_v12, 4  ;;  %v3279_v13 = vrot.slane %v3278_v56, 1 }
0x172e   :  { %v3290_v59 = vadd.f32 %v3289_v58, %v3288_v12  ;;  %v3280_v19 = vadd.f32 %v3279_v13, %v3278_v56 }
0x1730   :  { %v3245_v62 = vpop.permute.xlu2 %3244  ;;  %v3291_v14 = vrot.slane %v3290_v59, 2 }
0x1731   :  { %v3220_v46 = vpop.permute.xlu1 %3219  ;;  %v3258_v15 = vmul.f32 %v6572_v25, %v3245_v62 }
0x1732   :  { %v3253_v10 = vmul.f32 %v6287_v24, %v3220_v46  ;;  %v3292_v26 = vadd.f32 %v3291_v14, %v3290_v59  ;;  %v2825_v59 = vpop.f32.mrf.mxu0 }
0x1733   :  { %v3302_v61 = vsel %vm325_vm1, %v3258_v15, 0.0 }
0x1734   :  { %v3267_v0 = vsel %vm325_vm1, %v3253_v10, 0.0  ;;  %v3303_v35 = vrot.slane %v3302_v61, 4 }
0x1735   :  { %v3268_v3 = vrot.slane %v3267_v0, 4 }
0x1736   :  { %v3304_v45 = vadd.f32 %v3303_v35, %v3302_v61  ;;  %v3317_v35 = vld [vmem:[#allocation5 + $0x40] sm:$0xff] }
0x1737   :  { %v3269_v38 = vadd.f32 %v3268_v3, %v3267_v0  ;;  %v3266_v3 = vadd.f32 %v3265_v37, %v3264_v53 }
0x1738   :  { %v3305_v0 = vrot.slane %v3304_v45, 2 }
0x1739   :  { %v3230_v47 = vpop.permute.xlu1 %3229  ;;  %v3270_v28 = vrot.slane %v3269_v38, 2 }
0x173a   :  { %v3255_v24 = vmul.f32 %v6295_v32, %v3230_v47  ;;  %v3306_v21 = vadd.f32 %v3305_v0, %v3304_v45 }
0x173b   :  { %v3271_v1 = vadd.f32 %v3270_v28, %v3269_v38 }
0x173c   :  { %v3281_v5 = vsel %vm325_vm1, %v3255_v24, 0.0  ;;  %v3293_v24 = vrot.slane %v3292_v26, 1  ;;  %v3307_v51 = vrot.slane %v3306_v21, 1 }
0x173d   :  { %v3282_v43 = vrot.slane %v3281_v5, 4  ;;  %v3272_v52 = vrot.slane %v3271_v1, 1 }
0x173f   :  { %v3283_v27 = vadd.f32 %v3282_v43, %v3281_v5  ;;  %v3273_v50 = vadd.f32 %v3272_v52, %v3271_v1  ;;  %v3308_v1 = vadd.f32 %v3307_v51, %v3306_v21  ;;  %v3318_v52 = vld [vmem:[#allocation5 + $0x48] sm:$0xff] }
0x1741   :  { %v3284_v6 = vrot.slane %v3283_v27, 2  ;;  %v3240_v32 = vpop.permute.xlu1 %3239  ;;  %v3329_v40 = vsel %vm377_vm2, %v3273_v50, %v3266_v3 }
0x1742   :  { %v3257_v49 = vmul.f32 %v6301_v22, %v3240_v32  ;;  %v3330_v15 = vsel %vm379_vm3, %v3280_v19, %v3329_v40 }
0x1743   :  { %v3285_v44 = vadd.f32 %v3284_v6, %v3283_v27 }
0x1744   :  { %v3295_v39 = vsel %vm325_vm1, %v3257_v49, 0.0  ;;  %v3319_v49 = vadd.f32 %v3317_v35, %v2825_v59  ;;  %v4641_v59 = vld [vmem:[#allocation14 + $0x10] sm:$0xff] }
0x1745   :  { %v3296_v30 = vrot.slane %v3295_v39, 4  ;;  %v3286_v2 = vrot.slane %v3285_v44, 1 }
0x1747   :  { %v3297_v57 = vadd.f32 %v3296_v30, %v3295_v39  ;;  %v3287_v62 = vadd.f32 %v3286_v2, %v3285_v44 }
0x1749   :  { %v3298_v46 = vrot.slane %v3297_v57, 2  ;;  %v3250_v10 = vpop.permute.xlu1 %3249  ;;  %v3331_v5 = vsel %vm381_vm4, %v3287_v62, %v3330_v15 }
0x174a   :  { %v3259_v22 = vmul.f32 %v6307_v8, %v3250_v10  ;;  %v3294_v8 = vadd.f32 %v3293_v24, %v3292_v26 }
0x174b   :  { %v3299_v23 = vadd.f32 %v3298_v46, %v3297_v57 }
0x174c   :  { %v3309_v42 = vsel %vm325_vm1, %v3259_v22, 0.0  ;;  %v3332_v17 = vsel %vm383_vm5, %v3294_v8, %v3331_v5 }
0x174d   :  { %v3300_v38 = vrot.slane %v3299_v23, 1  ;;  %v3310_v47 = vrot.slane %v3309_v42, 4 }
0x174f   :  { %v3311_v12 = vadd.f32 %v3310_v47, %v3309_v42  ;;  %v3301_v28 = vadd.f32 %v3300_v38, %v3299_v23 }
0x1751   :  { %v3312_v43 = vrot.slane %v3311_v12, 2  ;;  %v3333_v27 = vsel %vm7002_vm7, %v3301_v28, %v3332_v17 }
0x1752   :  { %v3334_v32 = vsel %vm7003_vm14, %v3308_v1, %v3333_v27  ;;  %vm7005_vm14 = vcmask 1045509  }
0x1753   :  { %v3313_v58 = vadd.f32 %v3312_v43, %v3311_v12 }
0x1755   :  { %v3314_v61 = vrot.slane %v3313_v58, 1 }
0x1757   :  { %v3315_v6 = vadd.f32 %v3314_v61, %v3313_v58  ;;  %v4640_v61 = vld [vmem:[#allocation14] sm:$0xff] }
0x1759   :  { %v3335_v41 = vsel %vm7004_vm8, %v3315_v6, %v3334_v32  ;;  %vm7006_vm8 = vcmask 1046534  }
0x175a   :  { %4157 = vmatmul.msk.f32.vlgmr.msra.gmra.mxu3 %vm325_vm1, %v3335_v41 }
0x175b   :  { %3978 = vmatpush.msra.mxu3 %v6320_v34 }
0x175d   :  { %3979 = vmatpush.msra.mxu3 %v6323_v48 }
0x175f   :  { %3980 = vmatpush.msra.mxu3 %v6326_v16 }
0x1761   :  { %3981 = vmatpush.msra.mxu3 %v6329_v9  ;;  %v2845_v9 = vpop.f32.mrf.mxu1 }
0x1762   :  { %4158 = vmatmul.msk.f32.vlgmr.msrb.gmra.mxu3 %vm325_vm1, %v3335_v41 }
0x1763   :  { %3998 = vmatpush.msrb.mxu3 %v6333_v55  ;;  %v3320_v55 = vadd.f32 %v3318_v52, %v2845_v9  ;;  %v4644_v9 = vld [vmem:[%s6849_s8] ss:$0 sm:$0xff]  ;;  %s4922_s8 = smov [#allocation17]  }
0x1764   :  { %s4077_s0 = sshll.u32 %s4922_s8, 4  ;;  %s4078_s0 = int_to_ptr.vmem [resolvable:$true] %s4077_s0 }
0x1765   :  { %3999 = vmatpush.msrb.mxu3 %v6336_v29 }
0x1767   :  { %4000 = vmatpush.msrb.mxu3 %v6339_v36 }
0x1769   :  { %4001 = vmatpush.msrb.mxu3 %v6342_v18 }
0x17dd   :  { %v3355_v34 = vpop.f32.mrf.mxu3 }
0x17de   :  { %v3378_v53 = vadd.f32 %v3355_v34, %v3319_v49  ;;  %v4642_v49 = vld [vmem:[#allocation14 + $0x8] sm:$0xff] }
0x17e0   :  { %v4159_v48 = vmul.f32 -1.442695, %v3378_v53  ;;  %v4643_v53 = vld [vmem:[#allocation14 + $0x18] sm:$0xff] }
0x17e2   :  { %4483 = vpow2.f32 %v4159_v48 }
0x17e5   :  { %v3375_v44 = vpop.f32.mrf.mxu3 }
0x17e6   :  { %v3379_v29 = vadd.f32 %v3375_v44, %v3320_v55  ;;  %v4645_v55 = vld [vmem:[#allocation14 + $0x20] sm:$0xff] }
0x17e8   :  { %v4484_v16 = vpop.eup %4483  ;;  %v4160_v13 = vmul.f32 -1.442695, %v3379_v29 }
0x17e9   :  { %v3386_v39 = vadd.f32 1.0, %v4484_v16 }
0x17eb   :  { %4485 = vrcp.f32 %v3386_v39  ;;  %v3399_v18 = vand.u32 2147483648, %v3386_v39  ;;  %v3397_v45 = vand.u32 2147483647, %v3386_v39  ;;  %vm3393_vm9 = vweird.f32 %v3386_v39 }
0x17ec   :  { %4487 = vtanh.f32 %v3379_v29 }
0x17ed   :  { %v3400_v57 = vor.u32 1.1754944e-38, %v3399_v18  ;;  %vm3398_vm12 = vcmp.eq.f32.partialorder %v3397_v45, 8.507059e+37  ;;  %4489 = vpow2.f32 %v4160_v13 }
0x17f1   :  { %v4486_v30 = vpop.eup %4485 }
0x17f2   :  { %v3389_v56 = vmul.f32 %v4486_v30, %v3386_v39  ;;  %vm3394_vm15 = vweird.f32 %v4486_v30  ;;  %v4488_v2 = vpop.eup %4487 }
0x17f3   :  { %vm3395_vm10 = vmor %vm3393_vm9, %vm3394_vm15  ;;  %v4490_v26 = vpop.eup %4489  ;;  %vm7007_vm15 = vcmask 1047559   ;;  %vm7008_vm9 = vcmask 64512  }
0x17f4   :  { %v3390_v36 = vsub.f32 1.0, %v3389_v56  ;;  %v3387_v0 = vadd.f32 1.0, %v4490_v26 }
0x17f6   :  { %v3391_v14 = vmul.f32 %v4486_v30, %v3390_v36  ;;  %4491 = vrcp.f32 %v3387_v0  ;;  %v3414_v19 = vand.u32 2147483648, %v3387_v0  ;;  %vm3408_vm6 = vweird.f32 %v3387_v0 }
0x17f7   :  { %v3412_v24 = vand.u32 2147483647, %v3387_v0 }
0x17f8   :  { %v3392_v37 = vadd.f32 %v4486_v30, %v3391_v14  ;;  %v3415_v12 = vor.u32 1.1754944e-38, %v3414_v19 }
0x17f9   :  { %vm3413_vm7 = vcmp.eq.f32.partialorder %v3412_v24, 8.507059e+37 }
0x17fa   :  { %v3396_v50 = vsel %vm3395_vm10, %v4486_v30, %v3392_v37  ;;  %vm7012_vm10 = vmmov %vm7005_vm14 }
0x17fb   :  { %v3401_v46 = vsel %vm3398_vm12, %v3400_v57, %v3396_v50  ;;  %vm7013_vm12 = vmmov %vm7006_vm8 }
0x17fc   :  { %v3420_v10 = vmul.f32 %v4488_v2, %v3401_v46  ;;  %v4492_v22 = vpop.eup %4491  ;;  %v3419_v40 = vmul.f32 %v3401_v46, %v6347_v60  ;;  %v4646_v46 = vld [vmem:[#allocation14 + $0x28] sm:$0xff] }
0x17fd   :  { %v3404_v3 = vmul.f32 %v4492_v22, %v3387_v0  ;;  %vm3409_vm11 = vweird.f32 %v4492_v22 }
0x17fe   :  { %3422 = vrot.lane.b32.xlu2 %v3420_v10, %s4921_s7  ;;  %vm3410_vm13 = vmor %vm3408_vm6, %vm3409_vm11 }
0x17ff   :  { %v3405_v23 = vsub.f32 1.0, %v3404_v3  ;;  %vm7014_vm11 = vmmov %vm7007_vm15 }
0x1800   :  { %vm7015_vm6 = vmmov %vm7008_vm9 }
0x1801   :  { %v3406_v42 = vmul.f32 %v4492_v22, %v3405_v23  ;;  %v4647_v23 = vld [vmem:[#allocation14 + $0x30] sm:$0xff] }
0x1803   :  { %v3407_v47 = vadd.f32 %v4492_v22, %v3406_v42 }
0x1805   :  { %v3411_v21 = vsel %vm3410_vm13, %v4492_v22, %v3407_v47 }
0x1806   :  { %v3416_v5 = vsel %vm3413_vm7, %v3415_v12, %v3411_v21  ;;  %v4648_v21 = vld [vmem:[#allocation14 + $0x38] sm:$0xff] }
0x1858   :  { %v3423_v62 = vpop.permute.xlu2 %3422 }
0x1859   :  { %v6600_v38 = vadd.f32 %v3423_v62, %v3419_v40 }
0x185b   :  { %4493 = vtanh.f32 %v6600_v38 }
0x1861   :  { %v4494_v15 = vpop.eup %4493 }
0x1862   :  { %v3427_v28 = vmul.f32 %v4494_v15, %v3416_v5 }
0x1864   :  { %3429 = vrot.lane.b32.xlu1 %v3427_v28, %s4921_s7 }
0x18d6   :  { %v3430_v60 = vpop.permute.xlu1 %3429 }
0x18d7   :  { %3433 = vst.msk [vmem:[#allocation17 + $0x20] sm:$0xff] %vm152_vm0, %v3430_v60  ;;  %4161 = vmatmul.msk.f32.vlgmr.msrb.gmra.mxu0 %vm152_vm0, %v3430_v60  ;;  %4162 = vmatmul.msk.f32.vlgmr.msrb.gmra.mxu1 %vm152_vm0, %v3430_v60 }
0x18d8   :  { %4163 = vmatmul.msk.f32.vlgmr.msrb.gmra.mxu2 %vm152_vm0, %v3430_v60 }
0x195b   :  { %v3493_v43 = vpop.f32.mrf.mxu2 }
0x195c   :  { %v3504_v8 = vperm.slane %v3493_v43, 0  ;;  %v3498_v51 = vrot.slane %v3493_v43, 2  ;;  %v3497_v58 = vrot.slane %v3493_v43, 1  ;;  %v3499_v17 = vrot.slane %v3493_v43, 3 }
0x195d   :  { %v3500_v41 = vrot.slane %v3493_v43, 4  ;;  %v3501_v29 = vrot.slane %v3493_v43, 5  ;;  %v3502_v13 = vrot.slane %v3493_v43, 6  ;;  %v3503_v40 = vrot.slane %v3493_v43, 7 }
0x195e   :  { %v3520_v27 = vadd.f32 %v4640_v61, %v3504_v8  ;;  %v3506_v1 = vperm.slane %v3498_v51, 0  ;;  %v3505_v6 = vperm.slane %v3497_v58, 0  ;;  %v3507_v32 = vperm.slane %v3499_v17, 0 }
0x195f   :  { %v3508_v16 = vperm.slane %v3500_v41, 0  ;;  %v3509_v50 = vperm.slane %v3501_v29, 0  ;;  %v3510_v22 = vperm.slane %v3502_v13, 0  ;;  %v3511_v19 = vperm.slane %v3503_v40, 0 }
0x1960   :  { %4495 = vtanh.f32 %v3520_v27  ;;  %v3522_v35 = vadd.f32 %v4641_v59, %v3506_v1  ;;  %v3521_v34 = vadd.f32 %v4642_v49, %v3505_v6  ;;  %v3523_v48 = vadd.f32 %v4643_v53, %v3507_v32 }
0x1961   :  { %v3524_v30 = vadd.f32 %v4645_v55, %v3508_v16  ;;  %v3525_v10 = vadd.f32 %v4646_v46, %v3509_v50  ;;  %v3526_v42 = vadd.f32 %v4647_v23, %v3510_v22  ;;  %v3527_v12 = vadd.f32 %v4648_v21, %v3511_v19 }
0x1962   :  { %4497 = vtanh.f32 %v3522_v35 }
0x1963   :  { %4499 = vtanh.f32 %v3521_v34 }
0x1964   :  { %4501 = vtanh.f32 %v3523_v48 }
0x1965   :  { %4503 = vtanh.f32 %v3524_v30 }
0x1966   :  { %v4496_v39 = vpop.eup %4495  ;;  %4505 = vtanh.f32 %v3525_v10 }
0x1967   :  { %v3536_v52 = vmul.f32 %v4644_v9, %v4496_v39  ;;  %4507 = vtanh.f32 %v3526_v42 }
0x1968   :  { %v4498_v44 = vpop.eup %4497  ;;  %4509 = vtanh.f32 %v3527_v12 }
0x1969   :  { %v4500_v56 = vpop.eup %4499  ;;  %v3544_v36 = vsel %vm325_vm1, %v3536_v52, 0.0  ;;  %v3538_v18 = vmul.f32 %v4644_v9, %v4498_v44 }
0x196a   :  { %v4502_v14 = vpop.eup %4501  ;;  %3545 = vadd.xlane.f32.xlu0 %v3544_v36  ;;  %v3537_v45 = vmul.f32 %v4644_v9, %v4500_v56 }
0x196b   :  { %v3550_v37 = vsel %vm325_vm1, %v3538_v18, 0.0  ;;  %v3539_v2 = vmul.f32 %v4644_v9, %v4502_v14  ;;  %v4504_v0 = vpop.eup %4503 }
0x196c   :  { %3551 = vadd.xlane.f32.xlu1 %v3550_v37  ;;  %v3547_v57 = vsel %vm325_vm1, %v3537_v45, 0.0  ;;  %v3540_v3 = vmul.f32 %v4644_v9, %v4504_v0  ;;  %v4506_v47 = vpop.eup %4505 }
0x196d   :  { %3548 = vadd.xlane.f32.xlu2 %v3547_v57  ;;  %v3553_v26 = vsel %vm325_vm1, %v3539_v2, 0.0  ;;  %v3541_v24 = vmul.f32 %v4644_v9, %v4506_v47  ;;  %v4508_v5 = vpop.eup %4507 }
0x196e   :  { %v3556_v62 = vsel %vm325_vm1, %v3540_v3, 0.0  ;;  %v3542_v28 = vmul.f32 %v4644_v9, %v4508_v5  ;;  %v4510_v8 = vpop.eup %4509 }
0x196f   :  { %v3559_v15 = vsel %vm325_vm1, %v3541_v24, 0.0  ;;  %v3543_v43 = vmul.f32 %v4644_v9, %v4510_v8 }
0x1970   :  { %v3562_v60 = vsel %vm325_vm1, %v3542_v28, 0.0 }
0x1971   :  { %v3565_v51 = vsel %vm325_vm1, %v3543_v43, 0.0 }
0x1972   :  { %3554 = vadd.xlane.f32.xlu0 %v3553_v26 }
0x197a   :  { %3557 = vadd.xlane.f32.xlu0 %v3556_v62 }
0x1982   :  { %3560 = vadd.xlane.f32.xlu0 %v3559_v15 }
0x198a   :  { %3563 = vadd.xlane.f32.xlu0 %v3562_v60 }
0x1992   :  { %3566 = vadd.xlane.f32.xlu0 %v3565_v51 }
0x19dd   :  { %v3546_v58 = vpop.xlane.xlu0 %3545 }
0x19de   :  { %v3568_v41 = vadd.f32 %v3546_v58, %v6965_v20 }
0x19df   :  { %v3552_v6 = vpop.xlane.xlu1 %3551 }
0x19e0   :  { %v3549_v1 = vpop.xlane.xlu2 %3548  ;;  %v3570_v59 = vadd.f32 %v3552_v6, %v6965_v20  ;;  %v3584_v48 = vperm.slane %v3568_v41, %v6966_v54 }
0x19e1   :  { %v3569_v32 = vadd.f32 %v3549_v1, %v6965_v20 }
0x19e2   :  { %v3586_v39 = vperm.slane %v3570_v59, %v6966_v54 }
0x19e3   :  { %v3585_v49 = vperm.slane %v3569_v32, %v6966_v54 }
0x19e5   :  { %v3555_v17 = vpop.xlane.xlu0 %3554  ;;  %v3592_v52 = vsel %vm377_vm2, %v3585_v49, %v3584_v48 }
0x19e6   :  { %v3571_v34 = vadd.f32 %v3555_v17, %v6965_v20  ;;  %v3593_v29 = vsel %vm379_vm3, %v3586_v39, %v3592_v52 }
0x19e8   :  { %v3587_v44 = vperm.slane %v3571_v34, %v6966_v54 }
0x19ea   :  { %v3594_v18 = vsel %vm381_vm4, %v3587_v44, %v3593_v29 }
0x19ed   :  { %v3558_v61 = vpop.xlane.xlu0 %3557 }
0x19ee   :  { %v3572_v53 = vadd.f32 %v3558_v61, %v6965_v20 }
0x19f0   :  { %v3588_v55 = vperm.slane %v3572_v53, %v6966_v54 }
0x19f2   :  { %v3595_v45 = vsel %vm383_vm5, %v3588_v55, %v3594_v18 }
0x19f5   :  { %v3561_v27 = vpop.xlane.xlu0 %3560 }
0x19f6   :  { %v3573_v16 = vadd.f32 %v3561_v27, %v6965_v20 }
0x19f8   :  { %v3589_v30 = vperm.slane %v3573_v16, %v6966_v54 }
0x19fa   :  { %v3596_v37 = vsel %vm7005_vm14, %v3589_v30, %v3595_v45 }
0x19fd   :  { %v3564_v35 = vpop.xlane.xlu0 %3563 }
0x19fe   :  { %v3574_v9 = vadd.f32 %v3564_v35, %v6965_v20 }
0x1a00   :  { %v3590_v56 = vperm.slane %v3574_v9, %v6966_v54 }
0x1a02   :  { %v3597_v50 = vsel %vm7006_vm8, %v3590_v56, %v3596_v37 }
0x1a05   :  { %v3567_v36 = vpop.xlane.xlu0 %3566 }
0x1a06   :  { %v3575_v14 = vadd.f32 %v3567_v36, %v6965_v20 }
0x1a08   :  { %v3591_v57 = vperm.slane %v3575_v14, %v6966_v54 }
0x1a0a   :  { %v3598_v2 = vsel %vm7007_vm15, %v3591_v57, %v3597_v50 }
0x1a0b   :  { %v3600_v46 = vsel %vm7008_vm9, %v3598_v2, -inf }
0x1a0c   :  { %3601 = vmax.xlane.f32.xlu2 %v3600_v46 }
0x1a7f   :  { %v3602_v10 = vpop.xlane.xlu2 %3601 }
0x1a80   :  { %v3606_v13 = vperm.slane %v3602_v10, 2  ;;  %v3605_v26 = vperm.slane %v3602_v10, 1  ;;  %v3604_v0 = vperm.slane %v3602_v10, 0  ;;  %v3609_v22 = vperm.slane %v3602_v10, 5 }
0x1a81   :  { %v3607_v3 = vperm.slane %v3602_v10, 3  ;;  %v3608_v40 = vperm.slane %v3602_v10, 4  ;;  %v3610_v28 = vperm.slane %v3602_v10, 6  ;;  %v3611_v8 = vperm.slane %v3602_v10, 7 }
0x1a82   :  { %v3622_v20 = vsub.f32 %v3570_v59, %v3606_v13  ;;  %v3621_v23 = vsub.f32 %v3569_v32, %v3605_v26  ;;  %v3620_v42 = vsub.f32 %v3568_v41, %v3604_v0  ;;  %v3625_v24 = vsub.f32 %v3573_v16, %v3609_v22  ;;  %v7010_v16 = vld [vmem:[#allocation35_spill] sm:$0xff] }
0x1a83   :  { %v3623_v21 = vsub.f32 %v3571_v34, %v3607_v3  ;;  %v3624_v12 = vsub.f32 %v3572_v53, %v3608_v40  ;;  %v3626_v17 = vsub.f32 %v3574_v9, %v3610_v28  ;;  %v3627_v1 = vsub.f32 %v3575_v14, %v3611_v8 }
0x1a84   :  { %v3632_v62 = vmul.f32 1.442695, %v3622_v20  ;;  %v3630_v47 = vmul.f32 1.442695, %v3621_v23  ;;  %v3628_v19 = vmul.f32 1.442695, %v3620_v42 }
0x1a85   :  { %v3638_v15 = vmul.f32 1.442695, %v3625_v24  ;;  %v3634_v5 = vmul.f32 1.442695, %v3623_v21  ;;  %v3636_v60 = vmul.f32 1.442695, %v3624_v12 }
0x1a86   :  { %4511 = vpow2.f32 %v3632_v62  ;;  %v3640_v32 = vmul.f32 1.442695, %v3626_v17  ;;  %v3642_v41 = vmul.f32 1.442695, %v3627_v1 }
0x1a87   :  { %4513 = vpow2.f32 %v3630_v47 }
0x1a88   :  { %4515 = vpow2.f32 %v3628_v19 }
0x1a89   :  { %4517 = vpow2.f32 %v3638_v15 }
0x1a8a   :  { %4519 = vpow2.f32 %v3634_v5 }
0x1a8b   :  { %4521 = vpow2.f32 %v3636_v60 }
0x1a8c   :  { %v4512_v43 = vpop.eup %4511  ;;  %4523 = vpow2.f32 %v3640_v32 }
0x1a8d   :  { %v4514_v51 = vpop.eup %4513  ;;  %v6644_v58 = vmul.f32 %v4512_v43, %v6971_v7  ;;  %4525 = vpow2.f32 %v3642_v41 }
0x1a8e   :  { %v4516_v61 = vpop.eup %4515  ;;  %v6647_v27 = vmul.f32 %v4514_v51, %v6972_v63 }
0x1a8f   :  { %3667 = vperm.xlu2 %4191, %v6644_v58   ;;  %v6651_v6 = vmul.f32 %v4516_v61, %v6973_v33  ;;  %v4518_v7 = vpop.eup %4517  ;;  %v7009_v33 = vld [vmem:[#allocation33_spill] sm:$0xff] }
0x1a90   :  { %3664 = vperm.xlu0 %4193, %v6647_v27   ;;  %v4520_v59 = vpop.eup %4519  ;;  %v6656_v49 = vmul.f32 %v4518_v7, %v6975_v4  ;;  %v7011_v4 = vld [vmem:[#allocation34_spill] sm:$0xff] }
0x1a91   :  { %3661 = vperm.xlu1 %4192, %v6651_v6   ;;  %v4522_v35 = vpop.eup %4521  ;;  %v6659_v63 = vmul.f32 %v4520_v59, %v6974_v31 }
0x1a92   :  { %v6663_v34 = vmul.f32 %v4522_v35, %v7009_v33  ;;  %v4524_v53 = vpop.eup %4523 }
0x1a93   :  { %v4526_v48 = vpop.eup %4525  ;;  %v6668_v39 = vmul.f32 %v4524_v53, %v7010_v16 }
0x1a94   :  { %v6671_v9 = vmul.f32 %v4526_v48, %v7011_v4 }
0x1a97   :  { %3676 = vperm.xlu2 %4191, %v6656_v49  }
0x1a98   :  { %3670 = vperm.xlu0 %4193, %v6659_v63  }
0x1a99   :  { %3673 = vperm.xlu1 %4192, %v6663_v34  }
0x1aa0   :  { %3679 = vperm.xlu0 %4193, %v6668_v39  }
0x1aa1   :  { %3682 = vperm.xlu1 %4192, %v6671_v9  }
0x1ae9   :  { %v3668_v44 = vpop.permute.xlu2 %3667 }
0x1aea   :  { %v3686_v36 = vperm.slane %v3668_v44, %v6966_v54 }
0x1af1   :  { %v3677_v50 = vpop.permute.xlu2 %3676 }
0x1af2   :  { %v3689_v46 = vperm.slane %v3677_v50, %v6966_v54 }
0x1b02   :  { %v3665_v31 = vpop.permute.xlu0 %3664 }
0x1b03   :  { %v3662_v52 = vpop.permute.xlu1 %3661  ;;  %v3685_v55 = vperm.slane %v3665_v31, %v6966_v54 }
0x1b04   :  { %v3684_v30 = vperm.slane %v3662_v52, %v6966_v54 }
0x1b06   :  { %v3692_v29 = vsel %vm377_vm2, %v3685_v55, %v3684_v30 }
0x1b07   :  { %v3693_v45 = vsel %vm379_vm3, %v3686_v36, %v3692_v29 }
0x1b0a   :  { %v3671_v56 = vpop.permute.xlu0 %3670 }
0x1b0b   :  { %v3687_v18 = vperm.slane %v3671_v56, %v6966_v54  ;;  %v3674_v14 = vpop.permute.xlu1 %3673 }
0x1b0c   :  { %v3688_v37 = vperm.slane %v3674_v14, %v6966_v54 }
0x1b0d   :  { %v3694_v57 = vsel %vm381_vm4, %v3687_v18, %v3693_v45 }
0x1b0e   :  { %v3695_v2 = vsel %vm383_vm5, %v3688_v37, %v3694_v57 }
0x1b0f   :  { %v3696_v22 = vsel %vm7012_vm10, %v3689_v46, %v3695_v2 }
0x1b12   :  { %v3680_v10 = vpop.permute.xlu0 %3679 }
0x1b13   :  { %v3690_v13 = vperm.slane %v3680_v10, %v6966_v54  ;;  %v3683_v26 = vpop.permute.xlu1 %3682 }
0x1b14   :  { %v3691_v0 = vperm.slane %v3683_v26, %v6966_v54 }
0x1b15   :  { %v3697_v3 = vsel %vm7013_vm12, %v3690_v13, %v3696_v22 }
0x1b16   :  { %v3698_v20 = vsel %vm7014_vm11, %v3691_v0, %v3697_v3 }
0x1b17   :  { %v3700_v23 = vsel %vm7015_vm6, %v3698_v20, 0.0 }
0x1b18   :  { %3701 = vadd.xlane.f32.xlu2 %v3700_v23 }
0x1b8b   :  { %v3702_v42 = vpop.xlane.xlu2 %3701 }
0x1b8c   :  { %v3704_v40 = vperm.slane %v3702_v42, 0  ;;  %v3705_v62 = vperm.slane %v3702_v42, 1  ;;  %v6691_v47 = vperm.slane %v3702_v42, 2  ;;  %v6693_v19 = vperm.slane %v3702_v42, 3 }
0x1b8d   :  { %v6695_v24 = vperm.slane %v3702_v42, 4  ;;  %v6697_v54 = vperm.slane %v3702_v42, 5  ;;  %v6703_v28 = vperm.slane %v3702_v42, 7  ;;  %v6705_v43 = vperm.slane %v3702_v42, 6 }
0x1b8e   :  { %4527 = vrcp.f32 %v3704_v40  ;;  %v3744_v21 = vand.u32 2147483647, %v3705_v62  ;;  %v3746_v12 = vand.u32 2147483648, %v3705_v62  ;;  %v3729_v15 = vand.u32 2147483647, %v3704_v40 }
0x1b8f   :  { %4529 = vrcp.f32 %v3705_v62  ;;  %v3731_v60 = vand.u32 2147483648, %v3704_v40  ;;  %vm3740_vm13 = vweird.f32 %v3705_v62  ;;  %vm3725_vm14 = vweird.f32 %v3704_v40 }
0x1b90   :  { %4531 = vrcp.f32 %v6691_v47  ;;  %vm6709_vm7 = vcmp.eq.f32.partialorder %v3744_v21, 8.507059e+37  ;;  %v3747_v7 = vor.u32 1.1754944e-38, %v3746_v12  ;;  %vm6715_vm8 = vcmp.eq.f32.partialorder %v3729_v15, 8.507059e+37 }
0x1b91   :  { %4533 = vrcp.f32 %v6693_v19  ;;  %v3732_v48 = vor.u32 1.1754944e-38, %v3731_v60  ;;  %v3776_v36 = vand.u32 2147483648, %v6693_v19  ;;  %v3761_v14 = vand.u32 2147483648, %v6691_v47 }
0x1b92   :  { %4535 = vrcp.f32 %v6695_v24  ;;  %v3759_v20 = vand.u32 2147483647, %v6691_v47  ;;  %v3774_v42 = vand.u32 2147483647, %v6693_v19 }
0x1b93   :  { %4537 = vrcp.f32 %v6697_v54  ;;  %v3777_v12 = vor.u32 1.1754944e-38, %v3776_v36 }
0x1b94   :  { %v4528_v5 = vpop.eup %4527  ;;  %4539 = vrcp.f32 %v6703_v28 }
0x1b95   :  { %v4530_v8 = vpop.eup %4529  ;;  %v3721_v51 = vmul.f32 %v4528_v5, %v3704_v40  ;;  %vm3726_vm15 = vweird.f32 %v4528_v5  ;;  %4541 = vrcp.f32 %v6705_v43 }
0x1b96   :  { %v6707_v17 = vpop.eup %4531  ;;  %v3736_v61 = vmul.f32 %v4530_v8, %v3705_v62  ;;  %vm3741_vm9 = vweird.f32 %v4530_v8  ;;  %vm3727_vm10 = vmor %vm3725_vm14, %vm3726_vm15  ;;  %vm3770_vm14 = vweird.f32 %v6693_v19 }
0x1b97   :  { %v6713_v32 = vpop.eup %4533  ;;  %v3722_v41 = vsub.f32 1.0, %v3721_v51  ;;  %v3751_v35 = vmul.f32 %v6707_v17, %v6691_v47  ;;  %vm3756_vm12 = vweird.f32 %v6707_v17  ;;  %vm3742_vm11 = vmor %vm3740_vm13, %vm3741_vm9  ;;  %vm3755_vm13 = vweird.f32 %v6691_v47 }
0x1b98   :  { %v6721_v33 = vpop.eup %4535  ;;  %v3737_v53 = vsub.f32 1.0, %v3736_v61  ;;  %v3766_v16 = vmul.f32 %v6713_v32, %v6693_v19  ;;  %vm3771_vm6 = vweird.f32 %v6713_v32  ;;  %v3762_v47 = vor.u32 1.1754944e-38, %v3761_v14 }
0x1b99   :  { %v6726_v4 = vpop.eup %4537  ;;  %v3723_v31 = vmul.f32 %v4528_v5, %v3722_v41  ;;  %v3752_v52 = vsub.f32 1.0, %v3751_v35  ;;  %v3781_v44 = vmul.f32 %v6721_v33, %v6695_v24  ;;  %vm3772_vm15 = vmor %vm3770_vm14, %vm3771_vm6  ;;  %vm3775_vm9 = vcmp.eq.f32.partialorder %v3774_v42, 8.507059e+37 }
0x1b9a   :  { %v3738_v55 = vmul.f32 %v4530_v8, %v3737_v53  ;;  %v3767_v30 = vsub.f32 1.0, %v3766_v16  ;;  %v3796_v29 = vmul.f32 %v6726_v4, %v6697_v54  ;;  %v6742_v46 = vpop.eup %4539  ;;  %v3791_v61 = vand.u32 2147483648, %v6695_v24 }
0x1b9b   :  { %v3724_v56 = vadd.f32 %v4528_v5, %v3723_v31  ;;  %v3753_v18 = vmul.f32 %v6707_v17, %v3752_v52  ;;  %v3782_v2 = vsub.f32 1.0, %v3781_v44  ;;  %v6761_v62 = vpop.eup %4541  ;;  %v3826_v19 = vmul.f32 %v6742_v46, %v6703_v28 }
0x1b9c   :  { %v3739_v45 = vadd.f32 %v4530_v8, %v3738_v55  ;;  %v3768_v37 = vmul.f32 %v6713_v32, %v3767_v30  ;;  %v3797_v0 = vsub.f32 1.0, %v3796_v29  ;;  %v3811_v51 = vmul.f32 %v6761_v62, %v6705_v43 }
0x1b9d   :  { %v3728_v57 = vsel %vm3727_vm10, %v4528_v5, %v3724_v56  ;;  %v3754_v50 = vadd.f32 %v6707_v17, %v3753_v18  ;;  %v3806_v5 = vand.u32 2147483648, %v6697_v54  ;;  %vm3786_vm10 = vweird.f32 %v6721_v33 }
0x1b9e   :  { %v3743_v10 = vsel %vm3742_vm11, %v4530_v8, %v3739_v45  ;;  %v3733_v13 = vsel %vm6715_vm8, %v3732_v48, %v3728_v57  ;;  %v3769_v26 = vadd.f32 %v6713_v32, %v3768_v37  ;;  %vm3757_vm8 = vmor %vm3755_vm13, %vm3756_vm12  ;;  %v3798_v21 = vmul.f32 %v6726_v4, %v3797_v0 }
0x1b9f   :  { %v3748_v22 = vsel %vm6709_vm7, %v3747_v7, %v3743_v10  ;;  %v3734_v3 = vmul.f32 %v3733_v13, %v6651_v6  ;;  %v3758_v40 = vsel %vm3757_vm8, %v6707_v17, %v3754_v50  ;;  %v3783_v6 = vmul.f32 %v6721_v33, %v3782_v2  ;;  %v4649_v50 = vld [vmem:[#allocation16] sm:$0xff]  ;;  %v4650_v10 = vld [vmem:[#allocation16 + $0x8] sm:$0xff] }
0x1ba0   :  { %v3749_v23 = vmul.f32 %v3748_v22, %v6647_v27  ;;  %v3773_v27 = vsel %vm3772_vm15, %v6713_v32, %v3769_v26  ;;  %vm3760_vm7 = vcmp.eq.f32.partialorder %v3759_v20, 8.507059e+37  ;;  %v3799_v17 = vadd.f32 %v6726_v4, %v3798_v21 }
0x1ba1   :  { %3842 = vperm.xlu0 %4193, %v3734_v3   ;;  %v3763_v15 = vsel %vm3760_vm7, %v3762_v47, %v3758_v40  ;;  %v3778_v60 = vsel %vm3775_vm9, %v3777_v12, %v3773_v27  ;;  %v3784_v8 = vadd.f32 %v6721_v33, %v3783_v6  ;;  %vm3801_vm12 = vweird.f32 %v6726_v4 }
0x1ba2   :  { %3847 = vperm.xlu1 %4192, %v3749_v23   ;;  %v3827_v1 = vsub.f32 1.0, %v3826_v19  ;;  %v3764_v32 = vmul.f32 %v3763_v15, %v6644_v58  ;;  %vm3785_vm11 = vweird.f32 %v6695_v24  ;;  %v3789_v7 = vand.u32 2147483647, %v6695_v24  ;;  %v4651_v23 = vld [vmem:[#allocation16 + $0x10] sm:$0xff] }
0x1ba3   :  { %v3812_v41 = vsub.f32 1.0, %v3811_v51  ;;  %v3779_v59 = vmul.f32 %v3778_v60, %v6659_v63  ;;  %vm3800_vm6 = vweird.f32 %v6697_v54  ;;  %v3804_v35 = vand.u32 2147483647, %v6697_v54  ;;  %vm3787_vm13 = vmor %vm3785_vm11, %vm3786_vm10 }
0x1ba4   :  { %vm3802_vm14 = vmor %vm3800_vm6, %vm3801_vm12  ;;  %v3788_v53 = vsel %vm3787_vm13, %v6721_v33, %v3784_v8  ;;  %v3792_v16 = vor.u32 1.1754944e-38, %v3791_v61  ;;  %v3828_v24 = vmul.f32 %v6742_v46, %v3827_v1  ;;  %v3807_v31 = vor.u32 1.1754944e-38, %v3806_v5  ;;  %v4653_v1 = vld [vmem:[#allocation16 + $0x28] sm:$0xff] }
0x1ba5   :  { %v3813_v48 = vmul.f32 %v6761_v62, %v3812_v41  ;;  %v3803_v58 = vsel %vm3802_vm14, %v6726_v4, %v3799_v17  ;;  %vm3790_vm8 = vcmp.eq.f32.partialorder %v3789_v7, 8.507059e+37  ;;  %vm3805_vm15 = vcmp.eq.f32.partialorder %v3804_v35, 8.507059e+37 }
0x1ba6   :  { %v3793_v63 = vsel %vm3790_vm8, %v3792_v16, %v3788_v53  ;;  %v3808_v52 = vsel %vm3805_vm15, %v3807_v31, %v3803_v58  ;;  %vm3816_vm7 = vweird.f32 %v6761_v62  ;;  %v3829_v44 = vadd.f32 %v6742_v46, %v3828_v24 }
0x1ba7   :  { %v3814_v54 = vadd.f32 %v6761_v62, %v3813_v48  ;;  %vm3831_vm9 = vweird.f32 %v6742_v46  ;;  %v3821_v33 = vand.u32 2147483648, %v6705_v43  ;;  %v3794_v4 = vmul.f32 %v3793_v63, %v6663_v34 }
0x1ba8   :  { %v3836_v55 = vand.u32 2147483648, %v6703_v28  ;;  %vm3815_vm10 = vweird.f32 %v6705_v43  ;;  %v3819_v30 = vand.u32 2147483647, %v6705_v43  ;;  %v3809_v29 = vmul.f32 %v3808_v52, %v6656_v49 }
0x1ba9   :  { %3852 = vperm.xlu0 %4193, %v3764_v32   ;;  %vm3830_vm12 = vweird.f32 %v6703_v28  ;;  %v3834_v56 = vand.u32 2147483647, %v6703_v28  ;;  %vm3817_vm11 = vmor %vm3815_vm10, %vm3816_vm7  ;;  %v3822_v18 = vor.u32 1.1754944e-38, %v3821_v33  ;;  %vm7021_vm8 = vcmask 1046534  }
0x1baa   :  { %3857 = vperm.xlu1 %4192, %v3779_v59   ;;  %vm3832_vm6 = vmor %vm3830_vm12, %vm3831_vm9  ;;  %v3818_v36 = vsel %vm3817_vm11, %v6761_v62, %v3814_v54  ;;  %v3837_v14 = vor.u32 1.1754944e-38, %v3836_v55  ;;  %vm3820_vm13 = vcmp.eq.f32.partialorder %v3819_v30, 8.507059e+37  ;;  %vm7022_vm15 = vcmask 1047559  }
0x1bab   :  { %v3833_v34 = vsel %vm3832_vm6, %v6742_v46, %v3829_v44  ;;  %vm3835_vm14 = vcmp.eq.f32.partialorder %v3834_v56, 8.507059e+37  ;;  %v3823_v45 = vsel %vm3820_vm13, %v3822_v18, %v3818_v36  ;;  %v4654_v56 = vld [vmem:[#allocation16 + $0x38] sm:$0xff] }
0x1bac   :  { %v3838_v43 = vsel %vm3835_vm14, %v3837_v14, %v3833_v34  ;;  %v3824_v49 = vmul.f32 %v3823_v45, %v6668_v39 }
0x1bad   :  { %v3839_v37 = vmul.f32 %v3838_v43, %v6671_v9  ;;  %v4652_v9 = vld [vmem:[#allocation16 + $0x18] sm:$0xff] }
0x1bb1   :  { %3862 = vperm.xlu0 %4193, %v3794_v4  }
0x1bb2   :  { %3867 = vperm.xlu1 %4192, %v3809_v29  }
0x1bb9   :  { %3872 = vperm.xlu0 %4193, %v3824_v49  }
0x1bba   :  { %3877 = vperm.xlu1 %4192, %v3839_v37  }
0x1c13   :  { %v3843_v28 = vpop.permute.xlu0 %3842 }
0x1c14   :  { %v3848_v57 = vpop.permute.xlu1 %3847  ;;  %v3880_v2 = vmul.f32 %v4649_v50, %v3843_v28 }
0x1c15   :  { %v3881_v13 = vmul.f32 %v4650_v10, %v3848_v57 }
0x1c16   :  { %v3888_v46 = vsel %vm325_vm1, %v3880_v2, 0.0 }
0x1c17   :  { %v3895_v26 = vsel %vm325_vm1, %v3881_v13, 0.0  ;;  %v3889_v0 = vrot.slane %v3888_v46, 4 }
0x1c18   :  { %v3896_v22 = vrot.slane %v3895_v26, 4 }
0x1c19   :  { %v3890_v42 = vadd.f32 %v3889_v0, %v3888_v46 }
0x1c1a   :  { %v3897_v6 = vadd.f32 %v3896_v22, %v3895_v26 }
0x1c1b   :  { %v3853_v3 = vpop.permute.xlu0 %3852  ;;  %v3891_v19 = vrot.slane %v3890_v42, 2 }
0x1c1c   :  { %v3858_v20 = vpop.permute.xlu1 %3857  ;;  %v3882_v39 = vmul.f32 %v4651_v23, %v3853_v3  ;;  %v3898_v15 = vrot.slane %v3897_v6, 2 }
0x1c1d   :  { %v3883_v40 = vmul.f32 %v4652_v9, %v3858_v20  ;;  %v3892_v61 = vadd.f32 %v3891_v19, %v3890_v42  ;;  %v3453_v19 = vpop.f32.mrf.mxu0 }
0x1c1e   :  { %v3902_v62 = vsel %vm325_vm1, %v3882_v39, 0.0  ;;  %v3899_v7 = vadd.f32 %v3898_v15, %v3897_v6 }
0x1c1f   :  { %v3909_v27 = vsel %vm325_vm1, %v3883_v40, 0.0  ;;  %v3903_v47 = vrot.slane %v3902_v62, 4  ;;  %v3893_v16 = vrot.slane %v3892_v61, 1 }
0x1c20   :  { %v3910_v21 = vrot.slane %v3909_v27, 4  ;;  %v3900_v31 = vrot.slane %v3899_v7, 1 }
0x1c21   :  { %v3904_v12 = vadd.f32 %v3903_v47, %v3902_v62  ;;  %v3894_v30 = vadd.f32 %v3893_v16, %v3892_v61  ;;  %v3473_v61 = vpop.f32.mrf.mxu1 }
0x1c22   :  { %v3911_v5 = vadd.f32 %v3910_v21, %v3909_v27  ;;  %v3901_v34 = vadd.f32 %v3900_v31, %v3899_v7 }
0x1c23   :  { %v3905_v60 = vrot.slane %v3904_v12, 2  ;;  %v3863_v8 = vpop.permute.xlu0 %3862 }
0x1c24   :  { %v3868_v51 = vpop.permute.xlu1 %3867  ;;  %v3884_v17 = vmul.f32 %v6567_v11, %v3863_v8  ;;  %v3912_v41 = vrot.slane %v3911_v5, 2  ;;  %v3957_v2 = vsel %vm377_vm2, %v3901_v34, %v3894_v30  ;;  %vm7020_vm2 = vcmask 1045509  }
0x1c25   :  { %v3885_v32 = vmul.f32 %v4653_v1, %v3868_v51  ;;  %v3906_v35 = vadd.f32 %v3905_v60, %v3904_v12  ;;  %v3945_v12 = vld [vmem:[#allocation5 + $0x50] sm:$0xff]  ;;  %v3946_v1 = vld [vmem:[#allocation5 + $0x58] sm:$0xff] }
0x1c26   :  { %v3916_v59 = vsel %vm325_vm1, %v3884_v17, 0.0  ;;  %v3913_v63 = vadd.f32 %v3912_v41, %v3911_v5  ;;  %v3947_v15 = vadd.f32 %v3945_v12, %v3453_v19  ;;  %v3948_v7 = vadd.f32 %v3946_v1, %v3473_v61 }
0x1c27   :  { %v3923_v53 = vsel %vm325_vm1, %v3885_v32, 0.0  ;;  %v3917_v48 = vrot.slane %v3916_v59, 4  ;;  %v3907_v54 = vrot.slane %v3906_v35, 1 }
0x1c28   :  { %v3924_v58 = vrot.slane %v3923_v53, 4  ;;  %v3914_v18 = vrot.slane %v3913_v63, 1 }
0x1c29   :  { %v3918_v24 = vadd.f32 %v3917_v48, %v3916_v59  ;;  %v3908_v43 = vadd.f32 %v3907_v54, %v3906_v35 }
0x1c2a   :  { %v3925_v52 = vadd.f32 %v3924_v58, %v3923_v53  ;;  %v3915_v10 = vadd.f32 %v3914_v18, %v3913_v63 }
0x1c2b   :  { %v3919_v44 = vrot.slane %v3918_v24, 2  ;;  %v3873_v11 = vpop.permute.xlu0 %3872  ;;  %v3958_v46 = vsel %vm379_vm3, %v3908_v43, %v3957_v2 }
0x1c2c   :  { %v3926_v33 = vrot.slane %v3925_v52, 2  ;;  %v3878_v4 = vpop.permute.xlu1 %3877  ;;  %v3886_v55 = vmul.f32 %v6572_v25, %v3873_v11  ;;  %v3959_v23 = vsel %vm381_vm4, %v3915_v10, %v3958_v46 }
0x1c2d   :  { %v3920_v29 = vadd.f32 %v3919_v44, %v3918_v24  ;;  %v3887_v36 = vmul.f32 %v4654_v56, %v3878_v4 }
0x1c2e   :  { %v3927_v14 = vadd.f32 %v3926_v33, %v3925_v52  ;;  %v3930_v45 = vsel %vm325_vm1, %v3886_v55, 0.0 }
0x1c2f   :  { %v3921_v49 = vrot.slane %v3920_v29, 1  ;;  %v3937_v37 = vsel %vm325_vm1, %v3887_v36, 0.0  ;;  %v3931_v28 = vrot.slane %v3930_v45, 4 }
0x1c30   :  { %v3938_v57 = vrot.slane %v3937_v37, 4  ;;  %v3928_v25 = vrot.slane %v3927_v14, 1 }
0x1c31   :  { %v3932_v50 = vadd.f32 %v3931_v28, %v3930_v45  ;;  %v3922_v26 = vadd.f32 %v3921_v49, %v3920_v29 }
0x1c32   :  { %v3939_v13 = vadd.f32 %v3938_v57, %v3937_v37  ;;  %v3929_v20 = vadd.f32 %v3928_v25, %v3927_v14 }
0x1c33   :  { %v3933_v0 = vrot.slane %v3932_v50, 2  ;;  %v3960_v42 = vsel %vm383_vm5, %v3922_v26, %v3959_v23 }
0x1c34   :  { %v3940_v22 = vrot.slane %v3939_v13, 2  ;;  %v3961_v27 = vsel %vm7020_vm2, %v3929_v20, %v3960_v42 }
0x1c35   :  { %v3934_v3 = vadd.f32 %v3933_v0, %v3932_v50 }
0x1c36   :  { %v3941_v39 = vadd.f32 %v3940_v22, %v3939_v13 }
0x1c37   :  { %v3935_v9 = vrot.slane %v3934_v3, 1 }
0x1c38   :  { %v3942_v40 = vrot.slane %v3941_v39, 1 }
0x1c39   :  { %v3936_v6 = vadd.f32 %v3935_v9, %v3934_v3 }
0x1c3a   :  { %v3943_v62 = vadd.f32 %v3942_v40, %v3941_v39 }
0x1c3b   :  { %v3962_v47 = vsel %vm7021_vm8, %v3936_v6, %v3961_v27 }
0x1c3c   :  { %v3963_v21 = vsel %vm7022_vm15, %v3943_v62, %v3962_v47 }
0x1c3d   :  { %4164 = vmatmul.msk.f32.vlgmr.msra.gmra.mxu3 %vm325_vm1, %v3963_v21 }
0x1c45   :  { %4165 = vmatmul.msk.f32.vlgmr.msrb.gmra.mxu3 %vm325_vm1, %v3963_v21 }
0x1cc0   :  { %v3983_v5 = vpop.f32.mrf.mxu3 }
0x1cc1   :  { %v4006_v60 = vadd.f32 %v3983_v5, %v3947_v15 }
0x1cc3   :  { %v4166_v8 = vmul.f32 -1.442695, %v4006_v60 }
0x1cc5   :  { %4543 = vpow2.f32 %v4166_v8 }
0x1cc8   :  { %v4003_v32 = vpop.f32.mrf.mxu3 }
0x1cc9   :  { %v4007_v59 = vadd.f32 %v4003_v32, %v3948_v7 }
0x1ccb   :  { %v4544_v51 = vpop.eup %4543  ;;  %v4167_v11 = vmul.f32 -1.442695, %v4007_v59 }
0x1ccc   :  { %v4014_v17 = vadd.f32 1.0, %v4544_v51 }
0x1cce   :  { %4545 = vrcp.f32 %v4014_v17  ;;  %v4027_v48 = vand.u32 2147483648, %v4014_v17  ;;  %v4025_v16 = vand.u32 2147483647, %v4014_v17  ;;  %vm4021_vm3 = vweird.f32 %v4014_v17 }
0x1ccf   :  { %4547 = vtanh.f32 %v4007_v59 }
0x1cd0   :  { %v4028_v31 = vor.u32 1.1754944e-38, %v4027_v48  ;;  %vm4026_vm5 = vcmp.eq.f32.partialorder %v4025_v16, 8.507059e+37  ;;  %4549 = vpow2.f32 %v4167_v11 }
0x1cd4   :  { %v4546_v41 = vpop.eup %4545 }
0x1cd5   :  { %v4017_v35 = vmul.f32 %v4546_v41, %v4014_v17  ;;  %vm4022_vm1 = vweird.f32 %v4546_v41  ;;  %v4548_v52 = vpop.eup %4547 }
0x1cd6   :  { %vm4023_vm4 = vmor %vm4021_vm3, %vm4022_vm1  ;;  %v4550_v33 = vpop.eup %4549 }
0x1cd7   :  { %v4018_v53 = vsub.f32 1.0, %v4017_v35  ;;  %v4015_v4 = vadd.f32 1.0, %v4550_v33 }
0x1cd9   :  { %v4019_v58 = vmul.f32 %v4546_v41, %v4018_v53  ;;  %4551 = vrcp.f32 %v4015_v4  ;;  %v4042_v45 = vand.u32 2147483648, %v4015_v4  ;;  %vm4036_vm9 = vweird.f32 %v4015_v4 }
0x1cda   :  { %v4040_v43 = vand.u32 2147483647, %v4015_v4 }
0x1cdb   :  { %v4020_v24 = vadd.f32 %v4546_v41, %v4019_v58  ;;  %v4043_v37 = vor.u32 1.1754944e-38, %v4042_v45 }
0x1cdc   :  { %vm4041_vm12 = vcmp.eq.f32.partialorder %v4040_v43, 8.507059e+37 }
0x1cdd   :  { %v4024_v63 = vsel %vm4023_vm4, %v4546_v41, %v4020_v24 }
0x1cde   :  { %v4029_v54 = vsel %vm4026_vm5, %v4028_v31, %v4024_v63 }
0x1cdf   :  { %v4048_v44 = vmul.f32 %v4548_v52, %v4029_v54  ;;  %v4552_v55 = vpop.eup %4551  ;;  %v4047_v36 = vmul.f32 %v4029_v54, %v6600_v38 }
0x1ce0   :  { %v4032_v30 = vmul.f32 %v4552_v55, %v4015_v4  ;;  %vm4037_vm7 = vweird.f32 %v4552_v55 }
0x1ce1   :  { %4050 = vrot.lane.b32.xlu0 %v4048_v44, %s4921_s7  ;;  %vm4038_vm10 = vmor %vm4036_vm9, %vm4037_vm7 }
0x1ce2   :  { %v4033_v29 = vsub.f32 1.0, %v4032_v30 }
0x1ce4   :  { %v4034_v56 = vmul.f32 %v4552_v55, %v4033_v29 }
0x1ce6   :  { %v4035_v14 = vadd.f32 %v4552_v55, %v4034_v56 }
0x1ce8   :  { %v4039_v49 = vsel %vm4038_vm10, %v4552_v55, %v4035_v14 }
0x1ce9   :  { %v4044_v57 = vsel %vm4041_vm12, %v4043_v37, %v4039_v49 }
0x1d53   :  { %v4051_v34 = vpop.permute.xlu0 %4050 }
0x1d54   :  { %v4053_v18 = vadd.f32 %v4051_v34, %v4047_v36 }
0x1d56   :  { %4553 = vtanh.f32 %v4053_v18  ;;  %4064 = vrot.lane.b32.xlu0 %v4053_v18, %s4921_s7 }
0x1d5c   :  { %v4554_v28 = vpop.eup %4553 }
0x1d5d   :  { %v4055_v50 = vmul.f32 %v4554_v28, %v4044_v57 }
0x1d5f   :  { %4057 = vrot.lane.b32.xlu1 %v4055_v50, %s4921_s7 }
0x1dc8   :  { %v4065_v38 = vpop.permute.xlu0 %4064 }
0x1dc9   :  { %4067 = vst.msk [vmem:[#allocation3] sm:$0xff] %vm152_vm0, %v4065_v38 }
0x1dca   :  { %4072 = vst.msk [vmem:[#allocation20] sm:$0xff] %vm152_vm0, %v4065_v38 }
0x1dd1   :  { %v4058_v2 = vpop.permute.xlu1 %4057 }
0x1dd2   :  { %4061 = vst.msk [vmem:[#allocation17 + $0x28] sm:$0xff] %vm152_vm0, %v4058_v2 }
0x1dd3   :  { %4062 = vst.msk [vmem:[#allocation2] sm:$0xff] %vm152_vm0, %v4058_v2  ;;  %4085 = dma.vmem_to_hbm [thread:$0]  %s4078_s0, 768, %s4080_s14, [#allocation7], %s4912_s22, %s4912_s22, %s4913_s23  }
0x1dd4   :  { %4071 = vst.msk [vmem:[#allocation18] sm:$0xff] %vm152_vm0, %v4058_v2 }
0x1dd5   :  { %4096 = dma.vmem_to_hbm [thread:$0]  %s4092_s16, 128, %s4094_s18, [#allocation19]  }
0x1dd6   :  { %4107 = dma.vmem_to_hbm [thread:$0]  %s4103_s19, 128, %s4105_s20, [#allocation19]  }
0x1dd7   :  { %4903 = dma.done.wait [#allocation7], 768  }
0x1dd8   :  { %4904 = vsyncadd [#allocation7], 4294966528 }
0x1dd9   :  { %4905 = dma.done.wait [#allocation19], 256  }
0x1dda   :  { %4906 = vsyncadd [#allocation19], 4294967040 }
0x1ddb   :  { %4120 = vsyncpa [#allocation6], 1 }
0x1ddc   :  { %4121 = vsyncpa [#allocation9], 1 }
0x1ddd   :  { %4122 = vsyncpa [#allocation12], 1 }
0x1dde   :  { %4123 = vsyncpa [#allocation15], 1 }
0x1ddf   :  { %4124 = vsyncpa [#allocation7], 1 }
0x1de0   :  { %4125 = vsyncpa [#allocation19], 1 }

</bundles_post_ra>
